<compile_context>
chip_gen: v5e
topology: v5e:2x2
jax: 0.10.0
libtpu: 0.0.40
codegen_flags: <defaults>
</compile_context>

<pallas_src>
import functools

import numpy as np

import jax
import jax.numpy as jnp
from jax import lax
from jax.experimental import pallas as pl
from jax.experimental.pallas import tpu as pltpu

LEAKY_SLOPE = 0.01
STD = 0.01
BN_EPS = 1e-5

HPARAMS = [
    # (op,      k, s, p, out_feat, bias,  bn,    dropout, activation)
    ('conv2d',  4, 2, 1, 8,        False, True,  0.0,     'leaky_relu'),
    ('conv2d',  4, 2, 1, 16,       False, True,  0.0,     'leaky_relu'),
    ('conv2d',  4, 1, 0, 1,        False, False, 0.0,     'sigmoid'),
]


# ----------------------------------------------------------------------------
# Single fused Pallas kernel: the whole conv/bn/act pyramid in one launch.
# ----------------------------------------------------------------------------
def _fused_pyramid_kernel(*refs, layers, leaky_slope, eps):
    """refs = (x_ref, <per-layer operand refs...>, o_ref).

    Per layer the operands are (in this order):
      T      [C_in*H_in*W_in, OC*OH*OW]  conv-as-matmul operator (bf16 or f32)
      bias_b [1, OC*OH*OW]               only if bias=True
      Pb     [OC, OC*OH*OW]              per-channel 0/1 broadcast } only if
      gamma  [1, OC]                                               } bn=True
      beta   [1, OC]                                               }
    Activations stay as lane-dense f32 [N, C*H*W] values for the whole pyramid.
    """
    x_ref = refs[0]
    o_ref = refs[-1]
    p_refs = refs[1:-1]

    act = x_ref[...]                                    # [N, C0*H0*W0] f32
    n = act.shape[0]
    r = 0
    for cfg in layers:
        T = p_refs[r][...]; r += 1
        # conv2d(k, s, p) == one dense matmul with the precomputed operator.
        # bf16 operands use the native bf16 MXU path; accumulate in f32.
        lhs = act.astype(T.dtype) if T.dtype != act.dtype else act
        y = jnp.dot(lhs, T, preferred_element_type=jnp.float32)   # [N, cols] f32
        if cfg['bias']:
            y = y + p_refs[r][...]; r += 1
        if cfg['bn']:
            Pb = p_refs[r][...]; r += 1                  # [OC, cols], entries 0/1
            gamma = p_refs[r][...]; r += 1               # [1, OC]
            beta = p_refs[r][...]; r += 1                # [1, OC]
            inv_hw = cfg['inv_hw']
            # --- stats: ONE stacked matmul, contracting with Pb transposed
            #     (no separate Pr operand, no separate E[y^2] matmul).
            stacked = jnp.concatenate([y, y * y], axis=0)          # [2N, cols]
            sums = lax.dot_general(
                stacked, Pb, (((1,), (1,)), ((), ())),
                preferred_element_type=jnp.float32)                # [2N, OC]
            mean_c = jnp.mean(sums[:n], axis=0, keepdims=True) * inv_hw   # [1, OC]
            mean_sq = jnp.mean(sums[n:], axis=0, keepdims=True) * inv_hw  # [1, OC]
            var_c = jnp.maximum(mean_sq - mean_c * mean_c, 0.0)    # guard cancellation
            a_c = gamma * lax.rsqrt(var_c + eps)                   # [1, OC]
            b_c = beta - mean_c * a_c                              # [1, OC]
            # --- ONE stacked broadcast matmul, then a single fused axpy.
            ab = jnp.concatenate([a_c, b_c], axis=0)               # [2, OC]
            ab_b = jnp.dot(ab, Pb, preferred_element_type=jnp.float32)  # [2, cols]
            y = y * ab_b[0:1, :] + ab_b[1:2, :]
        # Dropout2d(p=0.0) == identity.
        a = cfg['act']
        if a == 'leaky_relu':
            y = jnp.where(y >= 0, y, leaky_slope * y)
        elif a == 'sigmoid':
            y = jax.nn.sigmoid(y)
        elif a == 'tanh':
            y = jnp.tanh(y)
        elif a == 'linear':
            pass
        act = y
    o_ref[...] = act.astype(o_ref.dtype)


# ----------------------------------------------------------------------------
# Host-side (once per weights) precompute of the per-layer matmul operators.
# ----------------------------------------------------------------------------
def _conv_as_matmul(wt, H, W, s, p):
    """Fold a Conv2d(weight=wt [OC,C,k,k], stride=s, pad=p) on an HxW input
    into a dense operator T with y_flat[NCHW] = x_flat[NCHW] @ T (exact)."""
    OC, C, k, _ = wt.shape
    OH = (H + 2 * p - k) // s + 1
    OW = (W + 2 * p - k) // s + 1
    T = np.zeros((C * H * W, OC * OH * OW), np.float32)
    oc_cols = np.arange(OC) * (OH * OW)
    for c in range(C):
        for i in range(k):
            for j in range(k):
                for oh in range(OH):
                    h = s * oh + i - p
                    if h < 0 or h >= H:
                        continue
                    for ow in range(OW):
                        w_in = s * ow + j - p
                        if w_in < 0 or w_in >= W:
                            continue
                        row = c * H * W + h * W + w_in
                        T[row, oc_cols + oh * OW + ow] += wt[:, c, i, j]
    return T, OH, OW


def _bn_broadcast_mat(OC, OH, OW):
    """Pb: per-channel 0/1 broadcast from [.., OC] to (oc, oh, ow) columns.
    Also reused (transposed contraction) for the per-channel reduction."""
    HW = OH * OW
    Pb = np.zeros((OC, OC * HW), np.float32)
    for oc in range(OC):
        Pb[oc, oc * HW:(oc + 1) * HW] = 1.0
    return Pb


def build_fused_inputs(params, hparams, nc, H, W):
    layers, operands = [], []
    cost = dict(flops_per_n=0, flops_const=0, transc_per_n=0, transc_const=0)
    C, Hc, Wc = nc, H, W
    n_layers = len(hparams)
    for idx, ((op, k, s, p, OC, b, bn, dp, act), lp) in enumerate(
            zip(hparams, params)):
        assert op == 'conv2d'  # TODO(synk): 'convt2d' not used by this config.
        T, OH, OW = _conv_as_matmul(np.asarray(lp['w'], np.float32), Hc, Wc, s, p)
        in_cols = C * Hc * Wc
        out_cols = OC * OH * OW
        # bf16 for the big hidden-layer operators; keep the tiny final
        # (sigmoid) layer in f32 so the output path stays full precision.
        use_bf16 = idx < n_layers - 1
        operands.append(jnp.asarray(T, jnp.bfloat16 if use_bf16 else jnp.float32))
        cost['flops_per_n'] += 2 * in_cols * out_cols
        if b:
            bias_b = np.repeat(np.asarray(lp['b'], np.float32).reshape(OC),
                               OH * OW)[None, :]
            operands.append(jnp.asarray(bias_b))
        if bn:
            operands.append(jnp.asarray(_bn_broadcast_mat(OC, OH, OW)))
            operands.append(jnp.asarray(lp['gamma'], jnp.float32).reshape(1, OC))
            operands.append(jnp.asarray(lp['beta'], jnp.float32).reshape(1, OC))
            cost['flops_per_n'] += 2 * 2 * out_cols * OC   # stacked stats matmul
            cost['flops_const'] += 2 * 2 * OC * out_cols   # stacked broadcast
            cost['transc_const'] += OC                     # rsqrt per channel
        if act in ('sigmoid', 'tanh'):
            cost['transc_per_n'] += out_cols
        layers.append(dict(bias=b, bn=bn, act=act, inv_hw=1.0 / (OH * OW)))
        C, Hc, Wc = OC, OH, OW
    return tuple(layers), operands, (C, Hc, Wc), cost


# ----------------------------------------------------------------------------
# Parameter init (matches the PyTorch module's __init__) and forward pass.
# ----------------------------------------------------------------------------
def init_params(key, nc, hparams, std=STD):
    params = []
    in_feat = nc
    for (op, k, s, p, out_feat, b, bn, dp, h) in hparams:
        key, kw, kg = jax.random.split(key, 3)
        w = jax.random.normal(kw, (out_feat, in_feat, k, k), jnp.float32) * std
        bias = jnp.zeros((1, out_feat), jnp.float32)       # bias=False -> zeros
        if bn:
            gamma = 1.0 + jax.random.normal(kg, (1, out_feat), jnp.float32) * std
            beta = jnp.zeros((1, out_feat), jnp.float32)
        else:
            gamma = jnp.ones((1, out_feat), jnp.float32)
            beta = jnp.zeros((1, out_feat), jnp.float32)
        params.append(dict(w=w, b=bias, gamma=gamma, beta=beta))
        in_feat = out_feat
    return params


def cnn_forward(x, layers, operands, out_chw, cost,
                leaky_slope=LEAKY_SLOPE, eps=BN_EPS):
    """x: [N, C, H, W] float32 (NCHW). Whole pyramid in one pallas_call.
    N should be a multiple of 8 (f32 sublane) to amortize launch/DMA costs."""
    N = x.shape[0]
    OC, OH, OW = out_chw
    out_cols = OC * OH * OW
    x2d = x.reshape(N, -1)
    inputs = [x2d] + list(operands)

    kernel = functools.partial(_fused_pyramid_kernel, layers=layers,
                               leaky_slope=leaky_slope, eps=eps)

    # Advisory cost estimate: only real matmul FLOPs + actual transcendentals.
    flops = int(N * cost['flops_per_n'] + cost['flops_const'])
    transc = int(N * cost['transc_per_n'] + cost['transc_const'])
    bytes_accessed = int(sum(a.size * a.dtype.itemsize for a in inputs)
                         + 4 * N * out_cols)

    y2d = pl.pallas_call(
        kernel,
        out_shape=jax.ShapeDtypeStruct((N, out_cols), jnp.float32),
        grid=(1,),
        in_specs=[pl.BlockSpec(tuple(a.shape), lambda i: (0, 0)) for a in inputs],
        # NOTE: dims below (8, 128) are legal only because they equal the full
        # array dims — keep that invariant.
        out_specs=pl.BlockSpec((N, out_cols), lambda i: (0, 0)),
        compiler_params=pltpu.CompilerParams(
            dimension_semantics=("arbitrary",),
            vmem_limit_bytes=32 * 1024 * 1024),
        cost_estimate=pl.CostEstimate(flops=flops, transcendentals=transc,
                                      bytes_accessed=bytes_accessed),
    )(*inputs)
    return y2d.reshape(N, OC, OH, OW)


# pure-JAX reference (f32 end-to-end) for a numerical sanity check
def ref_forward(x, params, hparams, leaky_slope=LEAKY_SLOPE, eps=BN_EPS):
    for (op, k, s, p, out_feat, b, bn, dp, h), lp in zip(hparams, params):
        y = lax.conv_general_dilated(
            x, lp['w'], (s, s), [(p, p), (p, p)],
            dimension_numbers=('NCHW', 'OIHW', 'NCHW'))
        y = y + lp['b'].reshape(1, -1, 1, 1)
        if bn:
            mean = jnp.mean(y, axis=(0, 2, 3), keepdims=True)
            var = jnp.mean(jnp.square(y - mean), axis=(0, 2, 3), keepdims=True)
            y = ((y - mean) * lax.rsqrt(var + eps)
                 * lp['gamma'].reshape(1, -1, 1, 1)
                 + lp['beta'].reshape(1, -1, 1, 1))
        if h == 'leaky_relu':
            y = jnp.where(y >= 0, y, leaky_slope * y)
        elif h == 'sigmoid':
            y = jax.nn.sigmoid(y)
        elif h == 'tanh':
            y = jnp.tanh(y)
        x = y
    return x


if __name__ == "__main__":
    # batch = 8: smallest batch that fills the f32 sublane dimension and
    # amortizes the fixed operand-DMA / launch cost (scales to 64-256+).
    nc, input_size, batch = 4, 16, 8
    key = jax.random.PRNGKey(0)
    kx, kp = jax.random.split(key)
    x = jax.random.normal(kx, (batch, nc, input_size, input_size), jnp.float32)
    assert x.shape[2] == input_size, "Wrong input size"

    params = init_params(kp, nc, HPARAMS)
    layers, operands, out_chw, cost = build_fused_inputs(
        params, HPARAMS, nc, input_size, input_size)

    out = jax.block_until_ready(cnn_forward(x, layers, operands, out_chw, cost))

    ref = jax.block_until_ready(ref_forward(x, params, HPARAMS))
    assert out.shape == ref.shape == (batch, 1, 1, 1), out.shape
    # bf16 T1/T2 operands => tolerance loosened vs. the all-f32 reference.
    assert jnp.allclose(out, ref, rtol=2e-2, atol=2e-2), (
        f"mismatch: max abs err {float(jnp.max(jnp.abs(out - ref)))}")

    print("KERNEL_OK")
</pallas_src>

<mosaic_0001>
module attributes {stable_mosaic.version = 11 : i64} {
  func.func @_fused_pyramid_kernel(%arg0: i32, %arg1: memref<8x1024xf32, #tpu.memory_space<vmem>>, %arg2: memref<1024x512xbf16, #tpu.memory_space<vmem>>, %arg3: memref<8x512xf32, #tpu.memory_space<vmem>>, %arg4: memref<1x8xf32, #tpu.memory_space<vmem>>, %arg5: memref<1x8xf32, #tpu.memory_space<vmem>>, %arg6: memref<512x256xbf16, #tpu.memory_space<vmem>>, %arg7: memref<16x256xf32, #tpu.memory_space<vmem>>, %arg8: memref<1x16xf32, #tpu.memory_space<vmem>>, %arg9: memref<1x16xf32, #tpu.memory_space<vmem>>, %arg10: memref<256x1xf32, #tpu.memory_space<vmem>>, %arg11: memref<8x1xf32, #tpu.memory_space<vmem>>) attributes {dimension_semantics = [#tpu.dimension_semantics<arbitrary>], iteration_bounds = array<i64: 1>, scalar_prefetch = 0 : i64, scratch_operands = 0 : i64, tpu.core_type = #tpu.core_type<tc>, window_params = [{pipeline_mode = #tpu.pipeline_mode<synchronous>, transform_indices = @transform_0, window_bounds = array<i64: 8, 1024>}, {pipeline_mode = #tpu.pipeline_mode<synchronous>, transform_indices = @transform_1, window_bounds = array<i64: 1024, 512>}, {pipeline_mode = #tpu.pipeline_mode<synchronous>, transform_indices = @transform_2, window_bounds = array<i64: 8, 512>}, {pipeline_mode = #tpu.pipeline_mode<synchronous>, transform_indices = @transform_3, window_bounds = array<i64: 1, 8>}, {pipeline_mode = #tpu.pipeline_mode<synchronous>, transform_indices = @transform_4, window_bounds = array<i64: 1, 8>}, {pipeline_mode = #tpu.pipeline_mode<synchronous>, transform_indices = @transform_5, window_bounds = array<i64: 512, 256>}, {pipeline_mode = #tpu.pipeline_mode<synchronous>, transform_indices = @transform_6, window_bounds = array<i64: 16, 256>}, {pipeline_mode = #tpu.pipeline_mode<synchronous>, transform_indices = @transform_7, window_bounds = array<i64: 1, 16>}, {pipeline_mode = #tpu.pipeline_mode<synchronous>, transform_indices = @transform_8, window_bounds = array<i64: 1, 16>}, {pipeline_mode = #tpu.pipeline_mode<synchronous>, transform_indices = @transform_9, window_bounds = array<i64: 256, 1>}, {pipeline_mode = #tpu.pipeline_mode<synchronous>, transform_indices = @transform_10, window_bounds = array<i64: 8, 1>}]} {
    %c0 = arith.constant 0 : index
    %c0_0 = arith.constant 0 : index
    %0 = vector.load %arg1[%c0, %c0_0] : memref<8x1024xf32, #tpu.memory_space<vmem>>, vector<8x1024xf32>
    %c0_1 = arith.constant 0 : index
    %c0_2 = arith.constant 0 : index
    %1 = vector.load %arg2[%c0_1, %c0_2] : memref<1024x512xbf16, #tpu.memory_space<vmem>>, vector<1024x512xbf16>
    %2 = arith.truncf %0 : vector<8x1024xf32> to vector<8x1024xbf16>
    %cst = arith.constant dense<0.000000e+00> : vector<8x512xf32>
    %3 = tpu.matmul %2, %1, %cst {dimension_numbers = #tpu.dot_dimension_numbers<[1], [0], [0], [1], [0, 0, 1, 1], [], []>} : vector<8x1024xbf16>, vector<1024x512xbf16>, vector<8x512xf32> -> vector<8x512xf32>
    %c0_3 = arith.constant 0 : index
    %c0_4 = arith.constant 0 : index
    %4 = vector.load %arg3[%c0_3, %c0_4] : memref<8x512xf32, #tpu.memory_space<vmem>>, vector<8x512xf32>
    %c0_5 = arith.constant 0 : index
    %c0_6 = arith.constant 0 : index
    %5 = vector.load %arg4[%c0_5, %c0_6] : memref<1x8xf32, #tpu.memory_space<vmem>>, vector<1x8xf32>
    %c0_7 = arith.constant 0 : index
    %c0_8 = arith.constant 0 : index
    %6 = vector.load %arg5[%c0_7, %c0_8] : memref<1x8xf32, #tpu.memory_space<vmem>>, vector<1x8xf32>
    %7 = arith.mulf %3, %3 : vector<8x512xf32>
    %8 = tpu.concatenate %3, %7 in 0 : vector<8x512xf32>, vector<8x512xf32> -> vector<16x512xf32>
    %cst_9 = arith.constant dense<0.000000e+00> : vector<16x8xf32>
    %9 = tpu.matmul %8, %4, %cst_9 {dimension_numbers = #tpu.dot_dimension_numbers<[1], [1], [0], [0], [0, 0, 1, 0], [], []>} : vector<16x512xf32>, vector<8x512xf32>, vector<16x8xf32> -> vector<16x8xf32>
    %10 = vector.extract_strided_slice %9 {offsets = [0, 0], sizes = [8, 8], strides = [1, 1]} : vector<16x8xf32> to vector<8x8xf32>
    %cst_10 = arith.constant dense<0.000000e+00> : vector<8xf32>
    %11 = vector.multi_reduction <add>, %10, %cst_10 [0] : vector<8x8xf32> to vector<8xf32>
    %12 = vector.shape_cast %11 : vector<8xf32> to vector<1x8xf32>
    %cst_11 = arith.constant 8.000000e+00 : f32
    %13 = vector.broadcast %cst_11 : f32 to vector<1x8xf32>
    %14 = arith.divf %12, %13 : vector<1x8xf32>
    %cst_12 = arith.constant 1.562500e-02 : f32
    %15 = vector.broadcast %cst_12 : f32 to vector<1x8xf32>
    %16 = arith.mulf %14, %15 : vector<1x8xf32>
    %17 = vector.extract_strided_slice %9 {offsets = [8, 0], sizes = [8, 8], strides = [1, 1]} : vector<16x8xf32> to vector<8x8xf32>
    %cst_13 = arith.constant dense<0.000000e+00> : vector<8xf32>
    %18 = vector.multi_reduction <add>, %17, %cst_13 [0] : vector<8x8xf32> to vector<8xf32>
    %19 = vector.shape_cast %18 : vector<8xf32> to vector<1x8xf32>
    %cst_14 = arith.constant 8.000000e+00 : f32
    %20 = vector.broadcast %cst_14 : f32 to vector<1x8xf32>
    %21 = arith.divf %19, %20 : vector<1x8xf32>
    %cst_15 = arith.constant 1.562500e-02 : f32
    %22 = vector.broadcast %cst_15 : f32 to vector<1x8xf32>
    %23 = arith.mulf %21, %22 : vector<1x8xf32>
    %24 = arith.mulf %16, %16 : vector<1x8xf32>
    %25 = arith.subf %23, %24 : vector<1x8xf32>
    %cst_16 = arith.constant 0.000000e+00 : f32
    %26 = vector.broadcast %cst_16 : f32 to vector<1x8xf32>
    %27 = arith.maximumf %25, %26 : vector<1x8xf32>
    %cst_17 = arith.constant 9.99999974E-6 : f32
    %28 = vector.broadcast %cst_17 : f32 to vector<1x8xf32>
    %29 = arith.addf %27, %28 : vector<1x8xf32>
    %30 = math.rsqrt %29 : vector<1x8xf32>
    %31 = arith.mulf %5, %30 : vector<1x8xf32>
    %32 = arith.mulf %16, %31 : vector<1x8xf32>
    %33 = arith.subf %6, %32 : vector<1x8xf32>
    %34 = tpu.concatenate %31, %33 in 0 : vector<1x8xf32>, vector<1x8xf32> -> vector<2x8xf32>
    %cst_18 = arith.constant dense<0.000000e+00> : vector<2x512xf32>
    %35 = tpu.matmul %34, %4, %cst_18 {dimension_numbers = #tpu.dot_dimension_numbers<[1], [0], [0], [1], [0, 0, 1, 1], [], []>} : vector<2x8xf32>, vector<8x512xf32>, vector<2x512xf32> -> vector<2x512xf32>
    %36 = vector.extract_strided_slice %35 {offsets = [0, 0], sizes = [1, 512], strides = [1, 1]} : vector<2x512xf32> to vector<1x512xf32>
    %37 = vector.broadcast %36 : vector<1x512xf32> to vector<8x512xf32>
    %38 = arith.mulf %3, %37 : vector<8x512xf32>
    %39 = vector.extract_strided_slice %35 {offsets = [1, 0], sizes = [1, 512], strides = [1, 1]} : vector<2x512xf32> to vector<1x512xf32>
    %40 = vector.broadcast %39 : vector<1x512xf32> to vector<8x512xf32>
    %41 = arith.addf %38, %40 : vector<8x512xf32>
    %cst_19 = arith.constant 0.000000e+00 : f32
    %42 = vector.broadcast %cst_19 : f32 to vector<8x512xf32>
    %43 = arith.cmpf oge, %41, %42 : vector<8x512xf32>
    %cst_20 = arith.constant 0.00999999977 : f32
    %44 = vector.broadcast %cst_20 : f32 to vector<8x512xf32>
    %45 = arith.mulf %44, %41 : vector<8x512xf32>
    %46 = arith.select %43, %41, %45 : vector<8x512xi1>, vector<8x512xf32>
    %c0_21 = arith.constant 0 : index
    %c0_22 = arith.constant 0 : index
    %47 = vector.load %arg6[%c0_21, %c0_22] : memref<512x256xbf16, #tpu.memory_space<vmem>>, vector<512x256xbf16>
    %48 = arith.truncf %46 : vector<8x512xf32> to vector<8x512xbf16>
    %cst_23 = arith.constant dense<0.000000e+00> : vector<8x256xf32>
    %49 = tpu.matmul %48, %47, %cst_23 {dimension_numbers = #tpu.dot_dimension_numbers<[1], [0], [0], [1], [0, 0, 1, 1], [], []>} : vector<8x512xbf16>, vector<512x256xbf16>, vector<8x256xf32> -> vector<8x256xf32>
    %c0_24 = arith.constant 0 : index
    %c0_25 = arith.constant 0 : index
    %50 = vector.load %arg7[%c0_24, %c0_25] : memref<16x256xf32, #tpu.memory_space<vmem>>, vector<16x256xf32>
    %c0_26 = arith.constant 0 : index
    %c0_27 = arith.constant 0 : index
    %51 = vector.load %arg8[%c0_26, %c0_27] : memref<1x16xf32, #tpu.memory_space<vmem>>, vector<1x16xf32>
    %c0_28 = arith.constant 0 : index
    %c0_29 = arith.constant 0 : index
    %52 = vector.load %arg9[%c0_28, %c0_29] : memref<1x16xf32, #tpu.memory_space<vmem>>, vector<1x16xf32>
    %53 = arith.mulf %49, %49 : vector<8x256xf32>
    %54 = tpu.concatenate %49, %53 in 0 : vector<8x256xf32>, vector<8x256xf32> -> vector<16x256xf32>
    %cst_30 = arith.constant dense<0.000000e+00> : vector<16x16xf32>
    %55 = tpu.matmul %54, %50, %cst_30 {dimension_numbers = #tpu.dot_dimension_numbers<[1], [1], [0], [0], [0, 0, 1, 0], [], []>} : vector<16x256xf32>, vector<16x256xf32>, vector<16x16xf32> -> vector<16x16xf32>
    %56 = vector.extract_strided_slice %55 {offsets = [0, 0], sizes = [8, 16], strides = [1, 1]} : vector<16x16xf32> to vector<8x16xf32>
    %cst_31 = arith.constant dense<0.000000e+00> : vector<16xf32>
    %57 = vector.multi_reduction <add>, %56, %cst_31 [0] : vector<8x16xf32> to vector<16xf32>
    %58 = vector.shape_cast %57 : vector<16xf32> to vector<1x16xf32>
    %cst_32 = arith.constant 8.000000e+00 : f32
    %59 = vector.broadcast %cst_32 : f32 to vector<1x16xf32>
    %60 = arith.divf %58, %59 : vector<1x16xf32>
    %cst_33 = arith.constant 6.250000e-02 : f32
    %61 = vector.broadcast %cst_33 : f32 to vector<1x16xf32>
    %62 = arith.mulf %60, %61 : vector<1x16xf32>
    %63 = vector.extract_strided_slice %55 {offsets = [8, 0], sizes = [8, 16], strides = [1, 1]} : vector<16x16xf32> to vector<8x16xf32>
    %cst_34 = arith.constant dense<0.000000e+00> : vector<16xf32>
    %64 = vector.multi_reduction <add>, %63, %cst_34 [0] : vector<8x16xf32> to vector<16xf32>
    %65 = vector.shape_cast %64 : vector<16xf32> to vector<1x16xf32>
    %cst_35 = arith.constant 8.000000e+00 : f32
    %66 = vector.broadcast %cst_35 : f32 to vector<1x16xf32>
    %67 = arith.divf %65, %66 : vector<1x16xf32>
    %cst_36 = arith.constant 6.250000e-02 : f32
    %68 = vector.broadcast %cst_36 : f32 to vector<1x16xf32>
    %69 = arith.mulf %67, %68 : vector<1x16xf32>
    %70 = arith.mulf %62, %62 : vector<1x16xf32>
    %71 = arith.subf %69, %70 : vector<1x16xf32>
    %cst_37 = arith.constant 0.000000e+00 : f32
    %72 = vector.broadcast %cst_37 : f32 to vector<1x16xf32>
    %73 = arith.maximumf %71, %72 : vector<1x16xf32>
    %cst_38 = arith.constant 9.99999974E-6 : f32
    %74 = vector.broadcast %cst_38 : f32 to vector<1x16xf32>
    %75 = arith.addf %73, %74 : vector<1x16xf32>
    %76 = math.rsqrt %75 : vector<1x16xf32>
    %77 = arith.mulf %51, %76 : vector<1x16xf32>
    %78 = arith.mulf %62, %77 : vector<1x16xf32>
    %79 = arith.subf %52, %78 : vector<1x16xf32>
    %80 = tpu.concatenate %77, %79 in 0 : vector<1x16xf32>, vector<1x16xf32> -> vector<2x16xf32>
    %cst_39 = arith.constant dense<0.000000e+00> : vector<2x256xf32>
    %81 = tpu.matmul %80, %50, %cst_39 {dimension_numbers = #tpu.dot_dimension_numbers<[1], [0], [0], [1], [0, 0, 1, 1], [], []>} : vector<2x16xf32>, vector<16x256xf32>, vector<2x256xf32> -> vector<2x256xf32>
    %82 = vector.extract_strided_slice %81 {offsets = [0, 0], sizes = [1, 256], strides = [1, 1]} : vector<2x256xf32> to vector<1x256xf32>
    %83 = vector.broadcast %82 : vector<1x256xf32> to vector<8x256xf32>
    %84 = arith.mulf %49, %83 : vector<8x256xf32>
    %85 = vector.extract_strided_slice %81 {offsets = [1, 0], sizes = [1, 256], strides = [1, 1]} : vector<2x256xf32> to vector<1x256xf32>
    %86 = vector.broadcast %85 : vector<1x256xf32> to vector<8x256xf32>
    %87 = arith.addf %84, %86 : vector<8x256xf32>
    %cst_40 = arith.constant 0.000000e+00 : f32
    %88 = vector.broadcast %cst_40 : f32 to vector<8x256xf32>
    %89 = arith.cmpf oge, %87, %88 : vector<8x256xf32>
    %cst_41 = arith.constant 0.00999999977 : f32
    %90 = vector.broadcast %cst_41 : f32 to vector<8x256xf32>
    %91 = arith.mulf %90, %87 : vector<8x256xf32>
    %92 = arith.select %89, %87, %91 : vector<8x256xi1>, vector<8x256xf32>
    %c0_42 = arith.constant 0 : index
    %c0_43 = arith.constant 0 : index
    %93 = vector.load %arg10[%c0_42, %c0_43] : memref<256x1xf32, #tpu.memory_space<vmem>>, vector<256x1xf32>
    %cst_44 = arith.constant dense<0.000000e+00> : vector<8x1xf32>
    %94 = tpu.matmul %92, %93, %cst_44 {dimension_numbers = #tpu.dot_dimension_numbers<[1], [0], [0], [1], [0, 0, 1, 1], [], []>} : vector<8x256xf32>, vector<256x1xf32>, vector<8x1xf32> -> vector<8x1xf32>
    %95 = arith.negf %94 : vector<8x1xf32>
    %96 = math.exp %95 : vector<8x1xf32>
    %cst_45 = arith.constant 1.000000e+00 : f32
    %97 = vector.broadcast %cst_45 : f32 to vector<8x1xf32>
    %98 = arith.addf %97, %96 : vector<8x1xf32>
    %99 = arith.divf %97, %98 : vector<8x1xf32>
    %c0_46 = arith.constant 0 : index
    %c0_47 = arith.constant 0 : index
    %100 = vector.load %arg11[%c0_46, %c0_47] : memref<8x1xf32, #tpu.memory_space<vmem>>, vector<8x1xf32>
    tpu.vector_store %arg11[%c0_46, %c0_47], %99 {strides = array<i32>} : memref<8x1xf32, #tpu.memory_space<vmem>>, vector<8x1xf32>,
    return
  }
  func.func @transform_0(%arg0: i32) -> (i32, i32) {
    %c0_i32 = arith.constant 0 : i32
    %c0_i32_0 = arith.constant 0 : i32
    %c0_i32_1 = arith.constant 0 : i32
    return %c0_i32, %c0_i32_0 : i32, i32
  }
  func.func @transform_1(%arg0: i32) -> (i32, i32) {
    %c0_i32 = arith.constant 0 : i32
    %c0_i32_0 = arith.constant 0 : i32
    %c0_i32_1 = arith.constant 0 : i32
    return %c0_i32, %c0_i32_0 : i32, i32
  }
  func.func @transform_2(%arg0: i32) -> (i32, i32) {
    %c0_i32 = arith.constant 0 : i32
    %c0_i32_0 = arith.constant 0 : i32
    %c0_i32_1 = arith.constant 0 : i32
    return %c0_i32, %c0_i32_0 : i32, i32
  }
  func.func @transform_3(%arg0: i32) -> (i32, i32) {
    %c0_i32 = arith.constant 0 : i32
    %c0_i32_0 = arith.constant 0 : i32
    %c0_i32_1 = arith.constant 0 : i32
    return %c0_i32, %c0_i32_0 : i32, i32
  }
  func.func @transform_4(%arg0: i32) -> (i32, i32) {
    %c0_i32 = arith.constant 0 : i32
    %c0_i32_0 = arith.constant 0 : i32
    %c0_i32_1 = arith.constant 0 : i32
    return %c0_i32, %c0_i32_0 : i32, i32
  }
  func.func @transform_5(%arg0: i32) -> (i32, i32) {
    %c0_i32 = arith.constant 0 : i32
    %c0_i32_0 = arith.constant 0 : i32
    %c0_i32_1 = arith.constant 0 : i32
    return %c0_i32, %c0_i32_0 : i32, i32
  }
  func.func @transform_6(%arg0: i32) -> (i32, i32) {
    %c0_i32 = arith.constant 0 : i32
    %c0_i32_0 = arith.constant 0 : i32
    %c0_i32_1 = arith.constant 0 : i32
    return %c0_i32, %c0_i32_0 : i32, i32
  }
  func.func @transform_7(%arg0: i32) -> (i32, i32) {
    %c0_i32 = arith.constant 0 : i32
    %c0_i32_0 = arith.constant 0 : i32
    %c0_i32_1 = arith.constant 0 : i32
    return %c0_i32, %c0_i32_0 : i32, i32
  }
  func.func @transform_8(%arg0: i32) -> (i32, i32) {
    %c0_i32 = arith.constant 0 : i32
    %c0_i32_0 = arith.constant 0 : i32
    %c0_i32_1 = arith.constant 0 : i32
    return %c0_i32, %c0_i32_0 : i32, i32
  }
  func.func @transform_9(%arg0: i32) -> (i32, i32) {
    %c0_i32 = arith.constant 0 : i32
    %c0_i32_0 = arith.constant 0 : i32
    %c0_i32_1 = arith.constant 0 : i32
    return %c0_i32, %c0_i32_0 : i32, i32
  }
  func.func @transform_10(%arg0: i32) -> (i32, i32) {
    %c0_i32 = arith.constant 0 : i32
    %c0_i32_0 = arith.constant 0 : i32
    %c0_i32_1 = arith.constant 0 : i32
    return %c0_i32, %c0_i32_0 : i32, i32
  }
}

</mosaic_0001>

<bundles_post_ra>
// kernel: tpu_custom_call.1
= control target key start
LH: loop header
LB: loop body
LE: loop exit
PB: predicated region body
PF: predicated region fallthrough
CT: control target
= control target key end

     0   :  { %15 = vsyncpa [#allocation3], 0  ;;  %s5098_s0 = inlined_call_operand.vmem [shape: f32[8,1024], index: 0, kind: input, shape index: {}]   ;;  %s5099_s1 = inlined_call_operand.hbm [shape: bf16[1024,512], index: 1, kind: input, shape index: {}]   ;;  %s5100_s2 = inlined_call_operand.vmem [shape: f32[8,512], index: 2, kind: input, shape index: {}]   ;;  %s5101_s3 = inlined_call_operand.vmem [shape: f32[1,8], index: 3, kind: input, shape index: {}]   ;;  %s5102_s4 = inlined_call_operand.vmem [shape: f32[1,8], index: 4, kind: input, shape index: {}]   ;;  %s5103_s5 = inlined_call_operand.hbm [shape: bf16[512,256], index: 5, kind: input, shape index: {}]   ;;  %s5104_s6 = inlined_call_operand.vmem [shape: f32[16,256], index: 6, kind: input, shape index: {}]   ;;  %s5105_s7 = inlined_call_operand.vmem [shape: f32[1,16], index: 7, kind: input, shape index: {}]   ;;  %s5106_s8 = inlined_call_operand.vmem [shape: f32[1,16], index: 8, kind: input, shape index: {}]   ;;  %s5107_s9 = inlined_call_operand.vmem [shape: f32[256,1], index: 9, kind: input, shape index: {}]   ;;  %s5108_s10 = inlined_call_operand.vmem [shape: f32[8,1], index: 10, kind: output, shape index: {}]  }
   0x1   :  { %s23_s15 = sshll.u32 %s5099_s1, 4  ;;  %s24_s15 = int_to_ptr.hbm [resolvable:$true] %s23_s15 }
   0x2   :  { %16 = vsyncpa [#allocation5], 0  ;;  %s4714_s16 = smov [#allocation2]   ;;  %s42_s20 = sshll.u32 %s5103_s5, 4  ;;  %s43_s20 = int_to_ptr.hbm [resolvable:$true] %s42_s20 }
   0x3   :  { %s25_s17 = sshll.u32 %s4714_s16, 4  ;;  %s4715_s21 = smov 256   ;;  %s26_s17 = int_to_ptr.vmem [resolvable:$true] %s25_s17 }
   0x4   :  { %s4716_s22 = smov 16   ;;  %s4717_s23 = smov [#allocation4]  }
   0x5   :  { %31 = dma.hbm_to_vmem [thread:$0]  %s24_s15, 32768, %s26_s17, [#allocation3], %s4715_s21, %s4715_s21, %s4716_s22  }
   0x6   :  { %s44_s24 = sshll.u32 %s4717_s23, 4  ;;  %s4718_s25 = smov 128   ;;  %s45_s24 = int_to_ptr.vmem [resolvable:$true] %s44_s24 }
   0x7   :  { %s4719_s26 = smov 8  }
   0x8   :  { %50 = dma.hbm_to_vmem [thread:$0]  %s43_s20, 8192, %s45_s24, [#allocation5], %s4718_s25, %s4718_s25, %s4719_s26  }
   0x9   :  { %4710 = dma.done.wait [#allocation3], 32768  }
   0xa   :  { %4711 = vsyncadd [#allocation3], 4294934528 }
   0xb   :  { %4712 = dma.done.wait [#allocation5], 8192  }
   0xc   :  { %4713 = vsyncadd [#allocation5], 4294959104  ;;  %v3152_v0 = vld [vmem:[#allocation2 + $0xe0] sm:$0xf]  ;;  %v4355_v1 = vld [vmem:[#allocation2 + $0xec] sm:$0xf0] }
   0xd   :  { %v3280_v2 = vld [vmem:[#allocation2 + $0x1e0] sm:$0xf]  ;;  %v3153_v3 = vor.u32 %v4355_v1, %v3152_v0  ;;  %v4387_v4 = vld [vmem:[#allocation2 + $0x1ec] sm:$0xf0]  ;;  %vm2137_vm0 = vcmask 64512   ;;  %vm2183_vm5 = vcmask 1040384  }
   0xe   :  { %v3408_v5 = vld [vmem:[#allocation2 + $0x2e0] sm:$0xf]  ;;  %v4419_v6 = vld [vmem:[#allocation2 + $0x2ec] sm:$0xf0]  ;;  %v3281_v7 = vor.u32 %v4387_v4, %v3280_v2  ;;  %vm2842_vm10 = vcmask 130048  }
   0xf   :  { %v3409_v8 = vor.u32 %v4419_v6, %v3408_v5  ;;  %v3536_v9 = vld [vmem:[#allocation2 + $0x3e0] sm:$0xf]  ;;  %v4451_v10 = vld [vmem:[#allocation2 + $0x3ec] sm:$0xf0]  ;;  %1619 = vmatpush.bf16.msra.mxu0 %v3153_v3 }
  0x10   :  { %v3136_v11 = vld [vmem:[#allocation2 + $0xc0] sm:$0xf]  ;;  %v3537_v12 = vor.u32 %v4451_v10, %v3536_v9  ;;  %v4351_v13 = vld [vmem:[#allocation2 + $0xcc] sm:$0xf0]  ;;  %1632 = vmatpush.bf16.msra.mxu1 %v3281_v7 }
  0x11   :  { %v3264_v14 = vld [vmem:[#allocation2 + $0x1c0] sm:$0xf]  ;;  %v4383_v15 = vld [vmem:[#allocation2 + $0x1cc] sm:$0xf0]  ;;  %1645 = vmatpush.bf16.msra.mxu2 %v3409_v8  ;;  %v3137_v16 = vor.u32 %v4351_v13, %v3136_v11 }
  0x12   :  { %v3265_v17 = vor.u32 %v4383_v15, %v3264_v14  ;;  %v3392_v18 = vld [vmem:[#allocation2 + $0x2c0] sm:$0xf]  ;;  %v4415_v19 = vld [vmem:[#allocation2 + $0x2cc] sm:$0xf0]  ;;  %1658 = vmatpush.bf16.msra.mxu3 %v3537_v12 }
  0x13   :  { %v3520_v20 = vld [vmem:[#allocation2 + $0x3c0] sm:$0xf]  ;;  %v3393_v21 = vor.u32 %v4415_v19, %v3392_v18  ;;  %v4447_v22 = vld [vmem:[#allocation2 + $0x3cc] sm:$0xf0]  ;;  %1620 = vmatpush.bf16.msra.mxu0 %v3137_v16 }
  0x14   :  { %v3120_v23 = vld [vmem:[#allocation2 + $0xa0] sm:$0xf]  ;;  %v4347_v24 = vld [vmem:[#allocation2 + $0xac] sm:$0xf0]  ;;  %v3521_v25 = vor.u32 %v4447_v22, %v3520_v20  ;;  %1633 = vmatpush.bf16.msra.mxu1 %v3265_v17 }
  0x15   :  { %v3248_v26 = vld [vmem:[#allocation2 + $0x1a0] sm:$0xf]  ;;  %v4379_v27 = vld [vmem:[#allocation2 + $0x1ac] sm:$0xf0]  ;;  %v3121_v29 = vor.u32 %v4347_v24, %v3120_v23  ;;  %1646 = vmatpush.bf16.msra.mxu2 %v3393_v21 }
  0x16   :  { %v3376_v28 = vld [vmem:[#allocation2 + $0x2a0] sm:$0xf]  ;;  %v4411_v30 = vld [vmem:[#allocation2 + $0x2ac] sm:$0xf0]  ;;  %v3249_v33 = vor.u32 %v4379_v27, %v3248_v26  ;;  %1659 = vmatpush.bf16.msra.mxu3 %v3521_v25 }
  0x17   :  { %v3504_v31 = vld [vmem:[#allocation2 + $0x3a0] sm:$0xf]  ;;  %v4443_v32 = vld [vmem:[#allocation2 + $0x3ac] sm:$0xf0]  ;;  %v3377_v34 = vor.u32 %v4411_v30, %v3376_v28  ;;  %1621 = vmatpush.bf16.msra.mxu0 %v3121_v29 }
  0x18   :  { %v3104_v35 = vld [vmem:[#allocation2 + $0x80] sm:$0xf]  ;;  %v4343_v36 = vld [vmem:[#allocation2 + $0x8c] sm:$0xf0]  ;;  %v3505_v38 = vor.u32 %v4443_v32, %v3504_v31  ;;  %1634 = vmatpush.bf16.msra.mxu1 %v3249_v33 }
  0x19   :  { %v3232_v37 = vld [vmem:[#allocation2 + $0x180] sm:$0xf]  ;;  %v4375_v39 = vld [vmem:[#allocation2 + $0x18c] sm:$0xf0]  ;;  %v3105_v44 = vor.u32 %v4343_v36, %v3104_v35  ;;  %1647 = vmatpush.bf16.msra.mxu2 %v3377_v34 }
  0x1a   :  { %v3360_v40 = vld [vmem:[#allocation2 + $0x280] sm:$0xf]  ;;  %v4407_v41 = vld [vmem:[#allocation2 + $0x28c] sm:$0xf0]  ;;  %v3233_v45 = vor.u32 %v4375_v39, %v3232_v37  ;;  %1660 = vmatpush.bf16.msra.mxu3 %v3505_v38 }
  0x1b   :  { %v3488_v42 = vld [vmem:[#allocation2 + $0x380] sm:$0xf]  ;;  %v4439_v43 = vld [vmem:[#allocation2 + $0x38c] sm:$0xf0]  ;;  %v3361_v46 = vor.u32 %v4407_v41, %v3360_v40  ;;  %1622 = vmatpush.bf16.msra.mxu0 %v3105_v44 }
  0x1c   :  { %v3088_v47 = vld [vmem:[#allocation2 + $0x60] sm:$0xf]  ;;  %v4339_v48 = vld [vmem:[#allocation2 + $0x6c] sm:$0xf0]  ;;  %v3489_v50 = vor.u32 %v4439_v43, %v3488_v42  ;;  %1635 = vmatpush.bf16.msra.mxu1 %v3233_v45 }
  0x1d   :  { %v3216_v49 = vld [vmem:[#allocation2 + $0x160] sm:$0xf]  ;;  %v4371_v51 = vld [vmem:[#allocation2 + $0x16c] sm:$0xf0]  ;;  %v3089_v56 = vor.u32 %v4339_v48, %v3088_v47  ;;  %1648 = vmatpush.bf16.msra.mxu2 %v3361_v46 }
  0x1e   :  { %v3344_v52 = vld [vmem:[#allocation2 + $0x260] sm:$0xf]  ;;  %v4403_v53 = vld [vmem:[#allocation2 + $0x26c] sm:$0xf0]  ;;  %v3217_v57 = vor.u32 %v4371_v51, %v3216_v49  ;;  %1661 = vmatpush.bf16.msra.mxu3 %v3489_v50 }
  0x1f   :  { %v3472_v54 = vld [vmem:[#allocation2 + $0x360] sm:$0xf]  ;;  %v4435_v55 = vld [vmem:[#allocation2 + $0x36c] sm:$0xf0]  ;;  %v3345_v58 = vor.u32 %v4403_v53, %v3344_v52  ;;  %1623 = vmatpush.bf16.msra.mxu0 %v3089_v56 }
  0x20   :  { %v3072_v59 = vld [vmem:[#allocation2 + $0x40] sm:$0xf]  ;;  %v4335_v60 = vld [vmem:[#allocation2 + $0x4c] sm:$0xf0]  ;;  %v3473_v62 = vor.u32 %v4435_v55, %v3472_v54  ;;  %1636 = vmatpush.bf16.msra.mxu1 %v3217_v57 }
  0x21   :  { %v3200_v61 = vld [vmem:[#allocation2 + $0x140] sm:$0xf]  ;;  %v4367_v63 = vld [vmem:[#allocation2 + $0x14c] sm:$0xf0]  ;;  %v3073_v4 = vor.u32 %v4335_v60, %v3072_v59  ;;  %1649 = vmatpush.bf16.msra.mxu2 %v3345_v58 }
  0x22   :  { %v3328_v0 = vld [vmem:[#allocation2 + $0x240] sm:$0xf]  ;;  %v4399_v1 = vld [vmem:[#allocation2 + $0x24c] sm:$0xf0]  ;;  %v3201_v5 = vor.u32 %v4367_v63, %v3200_v61  ;;  %1662 = vmatpush.bf16.msra.mxu3 %v3473_v62 }
  0x23   :  { %v3456_v2 = vld [vmem:[#allocation2 + $0x340] sm:$0xf]  ;;  %v4431_v3 = vld [vmem:[#allocation2 + $0x34c] sm:$0xf0]  ;;  %v3329_v6 = vor.u32 %v4399_v1, %v3328_v0  ;;  %1624 = vmatpush.bf16.msra.mxu0 %v3073_v4 }
  0x24   :  { %v3056_v7 = vld [vmem:[#allocation2 + $0x20] sm:$0xf]  ;;  %v4331_v8 = vld [vmem:[#allocation2 + $0x2c] sm:$0xf0]  ;;  %v3457_v10 = vor.u32 %v4431_v3, %v3456_v2  ;;  %1637 = vmatpush.bf16.msra.mxu1 %v3201_v5 }
  0x25   :  { %v3184_v9 = vld [vmem:[#allocation2 + $0x120] sm:$0xf]  ;;  %v4363_v11 = vld [vmem:[#allocation2 + $0x12c] sm:$0xf0]  ;;  %v3057_v16 = vor.u32 %v4331_v8, %v3056_v7  ;;  %1650 = vmatpush.bf16.msra.mxu2 %v3329_v6 }
  0x26   :  { %v3312_v12 = vld [vmem:[#allocation2 + $0x220] sm:$0xf]  ;;  %v4395_v13 = vld [vmem:[#allocation2 + $0x22c] sm:$0xf0]  ;;  %v3185_v19 = vor.u32 %v4363_v11, %v3184_v9  ;;  %1663 = vmatpush.bf16.msra.mxu3 %v3457_v10  ;;  %v70_v10 = vld [vmem:[%s5098_s0 + $0x18] sm:$0xff] }
  0x27   :  { %v3440_v14 = vld [vmem:[#allocation2 + $0x320] sm:$0xf]  ;;  %v4427_v15 = vld [vmem:[#allocation2 + $0x32c] sm:$0xf0]  ;;  %v3313_v20 = vor.u32 %v4395_v13, %v3312_v12  ;;  %1625 = vmatpush.bf16.msra.mxu0 %v3057_v16  ;;  %v68_v11 = vld [vmem:[%s5098_s0 + $0x8] sm:$0xff]  ;;  %v4799_v16 = vpack.c.bf16 %v70_v10, %v70_v10 }
  0x28   :  { %v3040_v17 = vld [vmem:[#allocation2] sm:$0xf]  ;;  %v4327_v18 = vld [vmem:[#allocation2 + $0xc] sm:$0xf0]  ;;  %v3441_v24 = vor.u32 %v4427_v15, %v3440_v14  ;;  %1638 = vmatpush.bf16.msra.mxu1 %v3185_v19  ;;  %v3282_v10 = vld [vmem:[#allocation2 + $0x1f0] sm:$0xf0] }
  0x29   :  { %v3168_v21 = vld [vmem:[#allocation2 + $0x100] sm:$0xf]  ;;  %v4359_v22 = vld [vmem:[#allocation2 + $0x10c] sm:$0xf0]  ;;  %v3041_v31 = vor.u32 %v4327_v18, %v3040_v17  ;;  %1651 = vmatpush.bf16.msra.mxu2 %v3313_v20  ;;  %v4801_v17 = vpack.c.bf16 %v68_v11, %v68_v11  ;;  %v4417_v11 = vld [vmem:[#allocation2 + $0x2e4] sm:$0xf] }
  0x2a   :  { %v3296_v23 = vld [vmem:[#allocation2 + $0x200] sm:$0xf]  ;;  %v4391_v25 = vld [vmem:[#allocation2 + $0x20c] sm:$0xf0]  ;;  %v3169_v35 = vor.u32 %v4359_v22, %v3168_v21  ;;  %1664 = vmatpush.bf16.msra.mxu3 %v3441_v24 }
  0x2b   :  { %v3424_v26 = vld [vmem:[#allocation2 + $0x300] sm:$0xf]  ;;  %v4423_v27 = vld [vmem:[#allocation2 + $0x30c] sm:$0xf0]  ;;  %v3297_v36 = vor.u32 %v4391_v25, %v3296_v23  ;;  %1626 = vmatpush.bf16.msra.mxu0 %v3041_v31 }
  0x2c   :  { %v3664_v28 = vld [vmem:[#allocation2 + $0x4e0] sm:$0xf]  ;;  %v4483_v29 = vld [vmem:[#allocation2 + $0x4ec] sm:$0xf0]  ;;  %v3425_v39 = vor.u32 %v4423_v27, %v3424_v26  ;;  %1639 = vmatpush.bf16.msra.mxu1 %v3169_v35 }
  0x2d   :  { %v3792_v30 = vld [vmem:[#allocation2 + $0x5e0] sm:$0xf]  ;;  %v4515_v32 = vld [vmem:[#allocation2 + $0x5ec] sm:$0xf0]  ;;  %v3665_v40 = vor.u32 %v4483_v29, %v3664_v28  ;;  %1652 = vmatpush.bf16.msra.mxu2 %v3297_v36 }
  0x2e   :  { %v3920_v33 = vld [vmem:[#allocation2 + $0x6e0] sm:$0xf]  ;;  %v4547_v34 = vld [vmem:[#allocation2 + $0x6ec] sm:$0xf0]  ;;  %v3793_v41 = vor.u32 %v4515_v32, %v3792_v30  ;;  %1665 = vmatpush.bf16.msra.mxu3 %v3425_v39 }
  0x2f   :  { %v4048_v37 = vld [vmem:[#allocation2 + $0x7e0] sm:$0xf]  ;;  %v4579_v38 = vld [vmem:[#allocation2 + $0x7ec] sm:$0xf0]  ;;  %v3921_v42 = vor.u32 %v4547_v34, %v3920_v33  ;;  %1671 = vmatpush.bf16.msrb.mxu0 %v3665_v40  ;;  %1640 = vmatmul.bf16.vlgmr.msra.gmra.mxu1 %v4801_v17 }
  0x30   :  { %v3648_v43 = vld [vmem:[#allocation2 + $0x4c0] sm:$0xf]  ;;  %v4479_v44 = vld [vmem:[#allocation2 + $0x4cc] sm:$0xf0]  ;;  %v4049_v46 = vor.u32 %v4579_v38, %v4048_v37  ;;  %1684 = vmatpush.bf16.msrb.mxu1 %v3793_v41 }
  0x31   :  { %v3776_v45 = vld [vmem:[#allocation2 + $0x5c0] sm:$0xf]  ;;  %v4511_v47 = vld [vmem:[#allocation2 + $0x5cc] sm:$0xf0]  ;;  %v3649_v52 = vor.u32 %v4479_v44, %v3648_v43  ;;  %1697 = vmatpush.bf16.msrb.mxu2 %v3921_v42  ;;  %1666 = vmatmul.bf16.vlgmr.msra.gmra.mxu3 %v4799_v16 }
  0x32   :  { %v3904_v48 = vld [vmem:[#allocation2 + $0x6c0] sm:$0xf]  ;;  %v4543_v49 = vld [vmem:[#allocation2 + $0x6cc] sm:$0xf0]  ;;  %v3777_v54 = vor.u32 %v4511_v47, %v3776_v45  ;;  %1710 = vmatpush.bf16.msrb.mxu3 %v4049_v46 }
  0x33   :  { %v4032_v50 = vld [vmem:[#allocation2 + $0x7c0] sm:$0xf]  ;;  %v4575_v51 = vld [vmem:[#allocation2 + $0x7cc] sm:$0xf0]  ;;  %v3905_v55 = vor.u32 %v4543_v49, %v3904_v48  ;;  %1672 = vmatpush.bf16.msrb.mxu0 %v3649_v52 }
  0x34   :  { %v3632_v53 = vld [vmem:[#allocation2 + $0x4a0] sm:$0xf]  ;;  %v4475_v56 = vld [vmem:[#allocation2 + $0x4ac] sm:$0xf0]  ;;  %v4033_v59 = vor.u32 %v4575_v51, %v4032_v50  ;;  %1685 = vmatpush.bf16.msrb.mxu1 %v3777_v54 }
  0x35   :  { %v3760_v57 = vld [vmem:[#allocation2 + $0x5a0] sm:$0xf]  ;;  %v69_v58 = vld [vmem:[%s5098_s0 + $0x10] sm:$0xff]  ;;  %v3633_v2 = vor.u32 %v4475_v56, %v3632_v53  ;;  %1698 = vmatpush.bf16.msrb.mxu2 %v3905_v55 }
  0x36   :  { %v4507_v60 = vld [vmem:[#allocation2 + $0x5ac] sm:$0xf0]  ;;  %v3888_v61 = vld [vmem:[#allocation2 + $0x6a0] sm:$0xf]  ;;  %v4785_v63 = vpack.c.bf16 %v69_v58, %v69_v58  ;;  %1711 = vmatpush.bf16.msrb.mxu3 %v4033_v59 }
  0x37   :  { %v4539_v62 = vld [vmem:[#allocation2 + $0x6ac] sm:$0xf0]  ;;  %v4016_v0 = vld [vmem:[#allocation2 + $0x7a0] sm:$0xf]  ;;  %v3761_v6 = vor.u32 %v4507_v60, %v3760_v57  ;;  %1673 = vmatpush.bf16.msrb.mxu0 %v3633_v2 }
  0x38   :  { %v4571_v1 = vld [vmem:[#allocation2 + $0x7ac] sm:$0xf0]  ;;  %v3616_v3 = vld [vmem:[#allocation2 + $0x480] sm:$0xf]  ;;  %1653 = vmatmul.bf16.vlgmr.msra.gmra.mxu2 %v4785_v63  ;;  %v3889_v7 = vor.u32 %v4539_v62, %v3888_v61 }
  0x39   :  { %v4471_v4 = vld [vmem:[#allocation2 + $0x48c] sm:$0xf0]  ;;  %v67_v5 = vld [vmem:[%s5098_s0] sm:$0xff]  ;;  %v4017_v12 = vor.u32 %v4571_v1, %v4016_v0  ;;  %1686 = vmatpush.bf16.msrb.mxu1 %v3761_v6  ;;  %v3154_v6 = vld [vmem:[#allocation2 + $0xf0] sm:$0xf0] }
  0x3a   :  { %v3744_v8 = vld [vmem:[#allocation2 + $0x580] sm:$0xf]  ;;  %v4791_v9 = vpack.c.bf16 %v67_v5, %v67_v5  ;;  %v4503_v13 = vld [vmem:[#allocation2 + $0x58c] sm:$0xf0]  ;;  %v3617_v20 = vor.u32 %v4471_v4, %v3616_v3  ;;  %1699 = vmatpush.bf16.msrb.mxu2 %v3889_v7  ;;  %v4353_v5 = vld [vmem:[#allocation2 + $0xe4] sm:$0xf] }
  0x3b   :  { %v3872_v14 = vld [vmem:[#allocation2 + $0x680] sm:$0xf]  ;;  %v4535_v15 = vld [vmem:[#allocation2 + $0x68c] sm:$0xf0]  ;;  %v3745_v21 = vor.u32 %v4503_v13, %v3744_v8  ;;  %1712 = vmatpush.bf16.msrb.mxu3 %v4017_v12  ;;  %v4385_v7 = vld [vmem:[#allocation2 + $0x1e4] sm:$0xf] }
  0x3c   :  { %v4000_v18 = vld [vmem:[#allocation2 + $0x780] sm:$0xf]  ;;  %v4567_v19 = vld [vmem:[#allocation2 + $0x78c] sm:$0xf0]  ;;  %1627 = vmatmul.bf16.vlgmr.msra.gmra.mxu0 %v4791_v9  ;;  %v3873_v22 = vor.u32 %v4535_v15, %v3872_v14  ;;  %v3410_v12 = vld [vmem:[#allocation2 + $0x2f0] sm:$0xf0] }
  0x3d   :  { %v3600_v23 = vld [vmem:[#allocation2 + $0x460] sm:$0xf]  ;;  %v4467_v24 = vld [vmem:[#allocation2 + $0x46c] sm:$0xf0]  ;;  %v4001_v26 = vor.u32 %v4567_v19, %v4000_v18  ;;  %1674 = vmatpush.bf16.msrb.mxu0 %v3617_v20  ;;  %1687 = vmatpush.bf16.msrb.mxu1 %v3745_v21  ;;  %v4449_v15 = vld [vmem:[#allocation2 + $0x3e4] sm:$0xf]  ;;  %v3157_v21 = vor.u32 %v4353_v5, %v3154_v6 }
  0x3e   :  { %v3728_v25 = vld [vmem:[#allocation2 + $0x560] sm:$0xf]  ;;  %v4499_v27 = vld [vmem:[#allocation2 + $0x56c] sm:$0xf0]  ;;  %v3601_v32 = vor.u32 %v4467_v24, %v3600_v23  ;;  %1700 = vmatpush.bf16.msrb.mxu2 %v3873_v22  ;;  %v3538_v18 = vld [vmem:[#allocation2 + $0x3f0] sm:$0xf0] }
  0x3f   :  { %v3856_v28 = vld [vmem:[#allocation2 + $0x660] sm:$0xf]  ;;  %v4531_v29 = vld [vmem:[#allocation2 + $0x66c] sm:$0xf0]  ;;  %v3729_v33 = vor.u32 %v4499_v27, %v3728_v25  ;;  %1713 = vmatpush.bf16.msrb.mxu3 %v4001_v26  ;;  %v4349_v22 = vld [vmem:[#allocation2 + $0xc4] sm:$0xf]  ;;  %v3285_v25 = vor.u32 %v4385_v7, %v3282_v10  ;;  %v3413_v26 = vor.u32 %v4417_v11, %v3410_v12 }
  0x40   :  { %v3984_v30 = vld [vmem:[#allocation2 + $0x760] sm:$0xf]  ;;  %v4563_v31 = vld [vmem:[#allocation2 + $0x76c] sm:$0xf0]  ;;  %v3857_v34 = vor.u32 %v4531_v29, %v3856_v28  ;;  %v74_v24 = vld [vmem:[%s5098_s0 + $0x38] sm:$0xff] }
  0x41   :  { %v3584_v35 = vld [vmem:[#allocation2 + $0x440] sm:$0xf]  ;;  %v4463_v36 = vld [vmem:[#allocation2 + $0x44c] sm:$0xf0]  ;;  %v3985_v38 = vor.u32 %v4563_v31, %v3984_v30  ;;  %1675 = vmatpush.bf16.msrb.mxu0 %v3601_v32  ;;  %1688 = vmatpush.bf16.msrb.mxu1 %v3729_v33  ;;  %v3138_v27 = vld [vmem:[#allocation2 + $0xd0] sm:$0xf0]  ;;  %v3541_v30 = vor.u32 %v4449_v15, %v3538_v18 }
  0x42   :  { %v3712_v37 = vld [vmem:[#allocation2 + $0x540] sm:$0xf]  ;;  %v4495_v39 = vld [vmem:[#allocation2 + $0x54c] sm:$0xf0]  ;;  %v3585_v44 = vor.u32 %v4463_v36, %v3584_v35  ;;  %1701 = vmatpush.bf16.msrb.mxu2 %v3857_v34  ;;  %v4381_v28 = vld [vmem:[#allocation2 + $0x1c4] sm:$0xf] }
  0x43   :  { %v3840_v40 = vld [vmem:[#allocation2 + $0x640] sm:$0xf]  ;;  %v4527_v41 = vld [vmem:[#allocation2 + $0x64c] sm:$0xf0]  ;;  %v3713_v45 = vor.u32 %v4495_v39, %v3712_v37  ;;  %1714 = vmatpush.bf16.msrb.mxu3 %v3985_v38  ;;  %v72_v29 = vld [vmem:[%s5098_s0 + $0x28] sm:$0xff]  ;;  %v4822_v38 = vpack.c.bf16 %v74_v24, %v74_v24  ;;  %v3141_v39 = vor.u32 %v4349_v22, %v3138_v27 }
  0x44   :  { %v3968_v42 = vld [vmem:[#allocation2 + $0x740] sm:$0xf]  ;;  %v4559_v43 = vld [vmem:[#allocation2 + $0x74c] sm:$0xf0]  ;;  %v3841_v46 = vor.u32 %v4527_v41, %v3840_v40  ;;  %v3266_v31 = vld [vmem:[#allocation2 + $0x1d0] sm:$0xf0]  ;;  %v4824_v40 = vpack.c.bf16 %v72_v29, %v72_v29 }
  0x45   :  { %v3568_v47 = vld [vmem:[#allocation2 + $0x420] sm:$0xf]  ;;  %v4459_v48 = vld [vmem:[#allocation2 + $0x42c] sm:$0xf0]  ;;  %v3969_v50 = vor.u32 %v4559_v43, %v3968_v42  ;;  %1676 = vmatpush.bf16.msrb.mxu0 %v3585_v44  ;;  %1689 = vmatpush.bf16.msrb.mxu1 %v3713_v45  ;;  %v4413_v32 = vld [vmem:[#allocation2 + $0x2c4] sm:$0xf]  ;;  %v3269_v41 = vor.u32 %v4381_v28, %v3266_v31 }
  0x46   :  { %v3696_v49 = vld [vmem:[#allocation2 + $0x520] sm:$0xf]  ;;  %v4491_v51 = vld [vmem:[#allocation2 + $0x52c] sm:$0xf0]  ;;  %v3569_v56 = vor.u32 %v4459_v48, %v3568_v47  ;;  %1702 = vmatpush.bf16.msrb.mxu2 %v3841_v46  ;;  %v3394_v33 = vld [vmem:[#allocation2 + $0x2d0] sm:$0xf0] }
  0x47   :  { %v3824_v52 = vld [vmem:[#allocation2 + $0x620] sm:$0xf]  ;;  %v4523_v53 = vld [vmem:[#allocation2 + $0x62c] sm:$0xf0]  ;;  %v3697_v59 = vor.u32 %v4491_v51, %v3696_v49  ;;  %1715 = vmatpush.bf16.msrb.mxu3 %v3969_v50  ;;  %v4445_v35 = vld [vmem:[#allocation2 + $0x3c4] sm:$0xf]  ;;  %v3397_v42 = vor.u32 %v4413_v32, %v3394_v33 }
  0x48   :  { %v3952_v54 = vld [vmem:[#allocation2 + $0x720] sm:$0xf]  ;;  %v4555_v55 = vld [vmem:[#allocation2 + $0x72c] sm:$0xf0]  ;;  %v3825_v60 = vor.u32 %v4523_v53, %v3824_v52  ;;  %v3522_v36 = vld [vmem:[#allocation2 + $0x3d0] sm:$0xf0] }
  0x49   :  { %v3552_v57 = vld [vmem:[#allocation2 + $0x400] sm:$0xf]  ;;  %v4455_v58 = vld [vmem:[#allocation2 + $0x40c] sm:$0xf0]  ;;  %v3953_v1 = vor.u32 %v4555_v55, %v3952_v54  ;;  %1677 = vmatpush.bf16.msrb.mxu0 %v3569_v56  ;;  %1690 = vmatpush.bf16.msrb.mxu1 %v3697_v59  ;;  %v4345_v43 = vld [vmem:[#allocation2 + $0xa4] sm:$0xf]  ;;  %v3525_v46 = vor.u32 %v4445_v35, %v3522_v36 }
  0x4a   :  { %v3680_v61 = vld [vmem:[#allocation2 + $0x500] sm:$0xf]  ;;  %v4487_v62 = vld [vmem:[#allocation2 + $0x50c] sm:$0xf0]  ;;  %v3553_v8 = vor.u32 %v4455_v58, %v3552_v57  ;;  %1703 = vmatpush.bf16.msrb.mxu2 %v3825_v60  ;;  %v3122_v44 = vld [vmem:[#allocation2 + $0xb0] sm:$0xf0] }
  0x4b   :  { %v3808_v0 = vld [vmem:[#allocation2 + $0x600] sm:$0xf]  ;;  %v4519_v2 = vld [vmem:[#allocation2 + $0x60c] sm:$0xf0]  ;;  %v3681_v13 = vor.u32 %v4487_v62, %v3680_v61  ;;  %1716 = vmatpush.bf16.msrb.mxu3 %v3953_v1  ;;  %v4377_v45 = vld [vmem:[#allocation2 + $0x1a4] sm:$0xf]  ;;  %v3125_v52 = vor.u32 %v4345_v43, %v3122_v44 }
  0x4c   :  { %v3936_v3 = vld [vmem:[#allocation2 + $0x700] sm:$0xf]  ;;  %v4551_v4 = vld [vmem:[#allocation2 + $0x70c] sm:$0xf0]  ;;  %v3809_v14 = vor.u32 %v4519_v2, %v3808_v0  ;;  %v3250_v47 = vld [vmem:[#allocation2 + $0x1b0] sm:$0xf0] }
  0x4d   :  { %v73_v19 = vld [vmem:[%s5098_s0 + $0x30] sm:$0xff]  ;;  %v3937_v20 = vor.u32 %v4551_v4, %v3936_v3  ;;  %v71_v23 = vld [vmem:[%s5098_s0 + $0x20] sm:$0xff]  ;;  %1678 = vmatpush.bf16.msrb.mxu0 %v3553_v8  ;;  %1691 = vmatpush.bf16.msrb.mxu1 %v3681_v13  ;;  %v3253_v53 = vor.u32 %v4377_v45, %v3250_v47 }
  0x4e   :  { %v4818_v34 = vpack.c.bf16 %v73_v19, %v73_v19  ;;  %1704 = vmatpush.bf16.msrb.mxu2 %v3809_v14  ;;  %v4820_v37 = vpack.c.bf16 %v71_v23, %v71_v23  ;;  %v4409_v48 = vld [vmem:[#allocation2 + $0x2a4] sm:$0xf]  ;;  %v3378_v49 = vld [vmem:[#allocation2 + $0x2b0] sm:$0xf0] }
  0x4f   :  { %1717 = vmatpush.bf16.msrb.mxu3 %v3937_v20  ;;  %v4441_v50 = vld [vmem:[#allocation2 + $0x3a4] sm:$0xf]  ;;  %v3506_v51 = vld [vmem:[#allocation2 + $0x3b0] sm:$0xf0]  ;;  %v3381_v54 = vor.u32 %v4409_v48, %v3378_v49 }
  0x50   :  { %1679 = vmatmul.bf16.vlgmr.msrb.gmra.mxu0 %v4820_v37  ;;  %1692 = vmatmul.bf16.vlgmr.msrb.gmra.mxu1 %v4824_v40  ;;  %v4341_v55 = vld [vmem:[#allocation2 + $0x84] sm:$0xf]  ;;  %v3106_v56 = vld [vmem:[#allocation2 + $0x90] sm:$0xf0]  ;;  %v3509_v58 = vor.u32 %v4441_v50, %v3506_v51 }
  0x51   :  { %1723 = vmatpush.bf16.msra.mxu0 %v3157_v21  ;;  %1736 = vmatpush.bf16.msra.mxu1 %v3285_v25  ;;  %v4373_v57 = vld [vmem:[#allocation2 + $0x184] sm:$0xf]  ;;  %v3234_v59 = vld [vmem:[#allocation2 + $0x190] sm:$0xf0]  ;;  %v3109_v1 = vor.u32 %v4341_v55, %v3106_v56 }
  0x52   :  { %1749 = vmatpush.bf16.msra.mxu2 %v3413_v26  ;;  %1718 = vmatmul.bf16.vlgmr.msrb.gmra.mxu3 %v4822_v38  ;;  %v4405_v60 = vld [vmem:[#allocation2 + $0x284] sm:$0xf]  ;;  %v3362_v61 = vld [vmem:[#allocation2 + $0x290] sm:$0xf0]  ;;  %v3237_v2 = vor.u32 %v4373_v57, %v3234_v59 }
  0x53   :  { %1762 = vmatpush.bf16.msra.mxu3 %v3541_v30  ;;  %1705 = vmatmul.bf16.vlgmr.msrb.gmra.mxu2 %v4818_v34  ;;  %v4437_v62 = vld [vmem:[#allocation2 + $0x384] sm:$0xf]  ;;  %v3490_v0 = vld [vmem:[#allocation2 + $0x390] sm:$0xf0]  ;;  %v3365_v3 = vor.u32 %v4405_v60, %v3362_v61 }
  0x54   :  { %v4337_v4 = vld [vmem:[#allocation2 + $0x64] sm:$0xf]  ;;  %v3090_v5 = vld [vmem:[#allocation2 + $0x70] sm:$0xf0]  ;;  %v3493_v7 = vor.u32 %v4437_v62, %v3490_v0 }
  0x55   :  { %1724 = vmatpush.bf16.msra.mxu0 %v3141_v39  ;;  %1737 = vmatpush.bf16.msra.mxu1 %v3269_v41  ;;  %v4369_v6 = vld [vmem:[#allocation2 + $0x164] sm:$0xf]  ;;  %v3218_v8 = vld [vmem:[#allocation2 + $0x170] sm:$0xf0]  ;;  %v3093_v14 = vor.u32 %v4337_v4, %v3090_v5 }
  0x56   :  { %1750 = vmatpush.bf16.msra.mxu2 %v3397_v42  ;;  %v4401_v10 = vld [vmem:[#allocation2 + $0x264] sm:$0xf]  ;;  %v3346_v11 = vld [vmem:[#allocation2 + $0x270] sm:$0xf0]  ;;  %v3221_v15 = vor.u32 %v4369_v6, %v3218_v8 }
  0x57   :  { %1763 = vmatpush.bf16.msra.mxu3 %v3525_v46  ;;  %v4433_v12 = vld [vmem:[#allocation2 + $0x364] sm:$0xf]  ;;  %v3474_v13 = vld [vmem:[#allocation2 + $0x370] sm:$0xf0]  ;;  %v3349_v18 = vor.u32 %v4401_v10, %v3346_v11 }
  0x58   :  { %v4333_v19 = vld [vmem:[#allocation2 + $0x44] sm:$0xf]  ;;  %v3074_v20 = vld [vmem:[#allocation2 + $0x50] sm:$0xf0]  ;;  %v3477_v22 = vor.u32 %v4433_v12, %v3474_v13 }
  0x59   :  { %1725 = vmatpush.bf16.msra.mxu0 %v3125_v52  ;;  %1738 = vmatpush.bf16.msra.mxu1 %v3253_v53  ;;  %v4365_v21 = vld [vmem:[#allocation2 + $0x144] sm:$0xf]  ;;  %v3202_v23 = vld [vmem:[#allocation2 + $0x150] sm:$0xf0]  ;;  %v3077_v28 = vor.u32 %v4333_v19, %v3074_v20 }
  0x5a   :  { %1751 = vmatpush.bf16.msra.mxu2 %v3381_v54  ;;  %v4397_v24 = vld [vmem:[#allocation2 + $0x244] sm:$0xf]  ;;  %v3330_v25 = vld [vmem:[#allocation2 + $0x250] sm:$0xf0]  ;;  %v3205_v29 = vor.u32 %v4365_v21, %v3202_v23 }
  0x5b   :  { %1764 = vmatpush.bf16.msra.mxu3 %v3509_v58  ;;  %v4429_v26 = vld [vmem:[#allocation2 + $0x344] sm:$0xf]  ;;  %v3458_v27 = vld [vmem:[#allocation2 + $0x350] sm:$0xf0]  ;;  %v3333_v30 = vor.u32 %v4397_v24, %v3330_v25 }
  0x5c   :  { %v4329_v31 = vld [vmem:[#allocation2 + $0x24] sm:$0xf]  ;;  %v3058_v32 = vld [vmem:[#allocation2 + $0x30] sm:$0xf0]  ;;  %v3461_v35 = vor.u32 %v4429_v26, %v3458_v27 }
  0x5d   :  { %1726 = vmatpush.bf16.msra.mxu0 %v3109_v1  ;;  %1739 = vmatpush.bf16.msra.mxu1 %v3237_v2  ;;  %v4361_v33 = vld [vmem:[#allocation2 + $0x124] sm:$0xf]  ;;  %v3186_v36 = vld [vmem:[#allocation2 + $0x130] sm:$0xf0]  ;;  %v3061_v44 = vor.u32 %v4329_v31, %v3058_v32 }
  0x5e   :  { %1752 = vmatpush.bf16.msra.mxu2 %v3365_v3  ;;  %v4393_v39 = vld [vmem:[#allocation2 + $0x224] sm:$0xf]  ;;  %v3314_v41 = vld [vmem:[#allocation2 + $0x230] sm:$0xf0]  ;;  %v3189_v47 = vor.u32 %v4361_v33, %v3186_v36 }
  0x5f   :  { %1765 = vmatpush.bf16.msra.mxu3 %v3493_v7  ;;  %v4425_v42 = vld [vmem:[#allocation2 + $0x324] sm:$0xf]  ;;  %v3442_v43 = vld [vmem:[#allocation2 + $0x330] sm:$0xf0]  ;;  %v3317_v48 = vor.u32 %v4393_v39, %v3314_v41 }
  0x60   :  { %v4325_v45 = vld [vmem:[#allocation2 + $0x4] sm:$0xf]  ;;  %v3042_v46 = vld [vmem:[#allocation2 + $0x10] sm:$0xf0]  ;;  %v3445_v52 = vor.u32 %v4425_v42, %v3442_v43 }
  0x61   :  { %1727 = vmatpush.bf16.msra.mxu0 %v3093_v14  ;;  %1740 = vmatpush.bf16.msra.mxu1 %v3221_v15  ;;  %v4357_v49 = vld [vmem:[#allocation2 + $0x104] sm:$0xf]  ;;  %v3170_v50 = vld [vmem:[#allocation2 + $0x110] sm:$0xf0]  ;;  %v3045_v59 = vor.u32 %v4325_v45, %v3042_v46 }
  0x62   :  { %1753 = vmatpush.bf16.msra.mxu2 %v3349_v18  ;;  %v4389_v51 = vld [vmem:[#allocation2 + $0x204] sm:$0xf]  ;;  %v3298_v53 = vld [vmem:[#allocation2 + $0x210] sm:$0xf0]  ;;  %v3173_v0 = vor.u32 %v4357_v49, %v3170_v50 }
  0x63   :  { %1766 = vmatpush.bf16.msra.mxu3 %v3477_v22  ;;  %v4421_v54 = vld [vmem:[#allocation2 + $0x304] sm:$0xf]  ;;  %v3426_v55 = vld [vmem:[#allocation2 + $0x310] sm:$0xf0]  ;;  %v3301_v1 = vor.u32 %v4389_v51, %v3298_v53 }
  0x64   :  { %v4481_v56 = vld [vmem:[#allocation2 + $0x4e4] sm:$0xf]  ;;  %v3666_v57 = vld [vmem:[#allocation2 + $0x4f0] sm:$0xf0]  ;;  %v3429_v4 = vor.u32 %v4421_v54, %v3426_v55 }
  0x65   :  { %1728 = vmatpush.bf16.msra.mxu0 %v3077_v28  ;;  %1741 = vmatpush.bf16.msra.mxu1 %v3205_v29  ;;  %v4513_v58 = vld [vmem:[#allocation2 + $0x5e4] sm:$0xf]  ;;  %v3794_v60 = vld [vmem:[#allocation2 + $0x5f0] sm:$0xf0]  ;;  %v3669_v5 = vor.u32 %v4481_v56, %v3666_v57 }
  0x66   :  { %1754 = vmatpush.bf16.msra.mxu2 %v3333_v30  ;;  %v4545_v61 = vld [vmem:[#allocation2 + $0x6e4] sm:$0xf]  ;;  %v3922_v62 = vld [vmem:[#allocation2 + $0x6f0] sm:$0xf0]  ;;  %v3797_v6 = vor.u32 %v4513_v58, %v3794_v60 }
  0x67   :  { %1767 = vmatpush.bf16.msra.mxu3 %v3461_v35  ;;  %v4577_v2 = vld [vmem:[#allocation2 + $0x7e4] sm:$0xf]  ;;  %v4050_v3 = vld [vmem:[#allocation2 + $0x7f0] sm:$0xf0]  ;;  %v3925_v7 = vor.u32 %v4545_v61, %v3922_v62 }
  0x68   :  { %v4477_v8 = vld [vmem:[#allocation2 + $0x4c4] sm:$0xf]  ;;  %v3650_v10 = vld [vmem:[#allocation2 + $0x4d0] sm:$0xf0]  ;;  %v4053_v12 = vor.u32 %v4577_v2, %v4050_v3 }
  0x69   :  { %1729 = vmatpush.bf16.msra.mxu0 %v3061_v44  ;;  %1742 = vmatpush.bf16.msra.mxu1 %v3189_v47  ;;  %v4509_v11 = vld [vmem:[#allocation2 + $0x5c4] sm:$0xf]  ;;  %v3778_v13 = vld [vmem:[#allocation2 + $0x5d0] sm:$0xf0]  ;;  %v3653_v20 = vor.u32 %v4477_v8, %v3650_v10 }
  0x6a   :  { %1755 = vmatpush.bf16.msra.mxu2 %v3317_v48  ;;  %v4541_v14 = vld [vmem:[#allocation2 + $0x6c4] sm:$0xf]  ;;  %v3906_v15 = vld [vmem:[#allocation2 + $0x6d0] sm:$0xf0]  ;;  %v3781_v21 = vor.u32 %v4509_v11, %v3778_v13 }
  0x6b   :  { %1768 = vmatpush.bf16.msra.mxu3 %v3445_v52  ;;  %v4573_v18 = vld [vmem:[#allocation2 + $0x7c4] sm:$0xf]  ;;  %v4034_v19 = vld [vmem:[#allocation2 + $0x7d0] sm:$0xf0]  ;;  %v3909_v22 = vor.u32 %v4541_v14, %v3906_v15 }
  0x6c   :  { %v4473_v23 = vld [vmem:[#allocation2 + $0x4a4] sm:$0xf]  ;;  %v3634_v24 = vld [vmem:[#allocation2 + $0x4b0] sm:$0xf0]  ;;  %v4037_v26 = vor.u32 %v4573_v18, %v4034_v19 }
  0x6d   :  { %1730 = vmatpush.bf16.msra.mxu0 %v3045_v59  ;;  %1743 = vmatpush.bf16.msra.mxu1 %v3173_v0  ;;  %v4505_v25 = vld [vmem:[#allocation2 + $0x5a4] sm:$0xf]  ;;  %v3762_v27 = vld [vmem:[#allocation2 + $0x5b0] sm:$0xf0]  ;;  %v3637_v32 = vor.u32 %v4473_v23, %v3634_v24 }
  0x6e   :  { %1756 = vmatpush.bf16.msra.mxu2 %v3301_v1  ;;  %v4537_v28 = vld [vmem:[#allocation2 + $0x6a4] sm:$0xf]  ;;  %v3890_v29 = vld [vmem:[#allocation2 + $0x6b0] sm:$0xf0]  ;;  %v3765_v33 = vor.u32 %v4505_v25, %v3762_v27 }
  0x6f   :  { %1769 = vmatpush.bf16.msra.mxu3 %v3429_v4  ;;  %v4569_v30 = vld [vmem:[#allocation2 + $0x7a4] sm:$0xf]  ;;  %v4018_v31 = vld [vmem:[#allocation2 + $0x7b0] sm:$0xf0]  ;;  %v3893_v35 = vor.u32 %v4537_v28, %v3890_v29 }
  0x70   :  { %1731 = vmatmul.bf16.vlgmr.msra.gmra.mxu0 %v4791_v9  ;;  %1744 = vmatmul.bf16.vlgmr.msra.gmra.mxu1 %v4801_v17  ;;  %v4469_v36 = vld [vmem:[#allocation2 + $0x484] sm:$0xf]  ;;  %v3618_v39 = vld [vmem:[#allocation2 + $0x490] sm:$0xf0]  ;;  %v4021_v42 = vor.u32 %v4569_v30, %v4018_v31 }
  0x71   :  { %1775 = vmatpush.bf16.msrb.mxu0 %v3669_v5  ;;  %1788 = vmatpush.bf16.msrb.mxu1 %v3797_v6  ;;  %v4501_v41 = vld [vmem:[#allocation2 + $0x584] sm:$0xf]  ;;  %v3746_v43 = vld [vmem:[#allocation2 + $0x590] sm:$0xf0]  ;;  %v3621_v48 = vor.u32 %v4469_v36, %v3618_v39  ;;  %v3160_v39 = vld [vmem:[#allocation2 + $0xe8] sm:$0xf] }
  0x72   :  { %1801 = vmatpush.bf16.msrb.mxu2 %v3925_v7  ;;  %1770 = vmatmul.bf16.vlgmr.msra.gmra.mxu3 %v4799_v16  ;;  %v4533_v44 = vld [vmem:[#allocation2 + $0x684] sm:$0xf]  ;;  %v3874_v45 = vld [vmem:[#allocation2 + $0x690] sm:$0xf0]  ;;  %v3749_v49 = vor.u32 %v4501_v41, %v3746_v43  ;;  %v4356_v41 = vld [vmem:[#allocation2 + $0xf4] sm:$0xf0] }
  0x73   :  { %1814 = vmatpush.bf16.msrb.mxu3 %v4053_v12  ;;  %1757 = vmatmul.bf16.vlgmr.msra.gmra.mxu2 %v4785_v63  ;;  %v4565_v46 = vld [vmem:[#allocation2 + $0x784] sm:$0xf]  ;;  %v4002_v47 = vld [vmem:[#allocation2 + $0x790] sm:$0xf0]  ;;  %v3877_v50 = vor.u32 %v4533_v44, %v3874_v45  ;;  %v4388_v44 = vld [vmem:[#allocation2 + $0x1f4] sm:$0xf0] }
  0x74   :  { %v4465_v51 = vld [vmem:[#allocation2 + $0x464] sm:$0xf]  ;;  %v3602_v52 = vld [vmem:[#allocation2 + $0x470] sm:$0xf0]  ;;  %v4005_v54 = vor.u32 %v4565_v46, %v4002_v47  ;;  %v3416_v45 = vld [vmem:[#allocation2 + $0x2e8] sm:$0xf] }
  0x75   :  { %1776 = vmatpush.bf16.msrb.mxu0 %v3653_v20  ;;  %1789 = vmatpush.bf16.msrb.mxu1 %v3781_v21  ;;  %v4497_v53 = vld [vmem:[#allocation2 + $0x564] sm:$0xf]  ;;  %v3730_v55 = vld [vmem:[#allocation2 + $0x570] sm:$0xf0]  ;;  %v3605_v60 = vor.u32 %v4465_v51, %v3602_v52  ;;  %v4420_v46 = vld [vmem:[#allocation2 + $0x2f4] sm:$0xf0]  ;;  %v3161_v52 = vor.u32 %v4356_v41, %v3160_v39 }
  0x76   :  { %1802 = vmatpush.bf16.msrb.mxu2 %v3909_v22  ;;  %v4529_v56 = vld [vmem:[#allocation2 + $0x664] sm:$0xf]  ;;  %v3858_v57 = vld [vmem:[#allocation2 + $0x670] sm:$0xf0]  ;;  %v3733_v61 = vor.u32 %v4497_v53, %v3730_v55  ;;  %v3144_v55 = vld [vmem:[#allocation2 + $0xc8] sm:$0xf] }
  0x77   :  { %1815 = vmatpush.bf16.msrb.mxu3 %v4037_v26  ;;  %v4561_v58 = vld [vmem:[#allocation2 + $0x764] sm:$0xf]  ;;  %v3986_v59 = vld [vmem:[#allocation2 + $0x770] sm:$0xf0]  ;;  %v3861_v62 = vor.u32 %v4529_v56, %v3858_v57  ;;  %v4352_v56 = vld [vmem:[#allocation2 + $0xd4] sm:$0xf0] }
  0x78   :  { %v4461_v0 = vld [vmem:[#allocation2 + $0x444] sm:$0xf]  ;;  %v3586_v1 = vld [vmem:[#allocation2 + $0x450] sm:$0xf0]  ;;  %v3989_v3 = vor.u32 %v4561_v58, %v3986_v59  ;;  %v3272_v57 = vld [vmem:[#allocation2 + $0x1c8] sm:$0xf] }
  0x79   :  { %1777 = vmatpush.bf16.msrb.mxu0 %v3637_v32  ;;  %1790 = vmatpush.bf16.msrb.mxu1 %v3765_v33  ;;  %v4493_v2 = vld [vmem:[#allocation2 + $0x544] sm:$0xf]  ;;  %v3714_v4 = vld [vmem:[#allocation2 + $0x550] sm:$0xf0]  ;;  %v3589_v10 = vor.u32 %v4461_v0, %v3586_v1  ;;  %v4384_v59 = vld [vmem:[#allocation2 + $0x1d4] sm:$0xf0]  ;;  %v3145_v1 = vor.u32 %v4352_v56, %v3144_v55 }
  0x7a   :  { %1803 = vmatpush.bf16.msrb.mxu2 %v3893_v35  ;;  %v4525_v5 = vld [vmem:[#allocation2 + $0x644] sm:$0xf]  ;;  %v3842_v6 = vld [vmem:[#allocation2 + $0x650] sm:$0xf0]  ;;  %v3717_v11 = vor.u32 %v4493_v2, %v3714_v4  ;;  %v4448_v0 = vld [vmem:[#allocation2 + $0x3d4] sm:$0xf0]  ;;  %v3273_v2 = vor.u32 %v4384_v59, %v3272_v57 }
  0x7b   :  { %1816 = vmatpush.bf16.msrb.mxu3 %v4021_v42  ;;  %v4557_v7 = vld [vmem:[#allocation2 + $0x744] sm:$0xf]  ;;  %v3970_v8 = vld [vmem:[#allocation2 + $0x750] sm:$0xf0]  ;;  %v3845_v12 = vor.u32 %v4525_v5, %v3842_v6  ;;  %v3288_v42 = vld [vmem:[#allocation2 + $0x1e8] sm:$0xf] }
  0x7c   :  { %v4457_v13 = vld [vmem:[#allocation2 + $0x424] sm:$0xf]  ;;  %v3570_v14 = vld [vmem:[#allocation2 + $0x430] sm:$0xf0]  ;;  %v3973_v18 = vor.u32 %v4557_v7, %v3970_v8  ;;  %v3289_v53 = vor.u32 %v4388_v44, %v3288_v42  ;;  %v3128_v4 = vld [vmem:[#allocation2 + $0xa8] sm:$0xf] }
  0x7d   :  { %1778 = vmatpush.bf16.msrb.mxu0 %v3621_v48  ;;  %1791 = vmatpush.bf16.msrb.mxu1 %v3749_v49  ;;  %v4489_v15 = vld [vmem:[#allocation2 + $0x524] sm:$0xf]  ;;  %v3698_v19 = vld [vmem:[#allocation2 + $0x530] sm:$0xf0]  ;;  %v3573_v24 = vor.u32 %v4457_v13, %v3570_v14  ;;  %v3544_v49 = vld [vmem:[#allocation2 + $0x3e8] sm:$0xf] }
  0x7e   :  { %1804 = vmatpush.bf16.msrb.mxu2 %v3877_v50  ;;  %v4521_v20 = vld [vmem:[#allocation2 + $0x624] sm:$0xf]  ;;  %v3826_v21 = vld [vmem:[#allocation2 + $0x630] sm:$0xf0]  ;;  %v3701_v27 = vor.u32 %v4489_v15, %v3698_v19  ;;  %v4452_v50 = vld [vmem:[#allocation2 + $0x3f4] sm:$0xf0] }
  0x7f   :  { %1817 = vmatpush.bf16.msrb.mxu3 %v4005_v54  ;;  %v4553_v22 = vld [vmem:[#allocation2 + $0x724] sm:$0xf]  ;;  %v3954_v23 = vld [vmem:[#allocation2 + $0x730] sm:$0xf0]  ;;  %v3829_v28 = vor.u32 %v4521_v20, %v3826_v21  ;;  %v3417_v54 = vor.u32 %v4420_v46, %v3416_v45  ;;  %v3545_v58 = vor.u32 %v4452_v50, %v3544_v49  ;;  %v4348_v5 = vld [vmem:[#allocation2 + $0xb4] sm:$0xf0] }
  0x80   :  { %v4453_v25 = vld [vmem:[#allocation2 + $0x404] sm:$0xf]  ;;  %v3554_v26 = vld [vmem:[#allocation2 + $0x410] sm:$0xf0]  ;;  %v3957_v32 = vor.u32 %v4553_v22, %v3954_v23  ;;  %v3256_v6 = vld [vmem:[#allocation2 + $0x1a8] sm:$0xf]  ;;  %v3129_v14 = vor.u32 %v4348_v5, %v3128_v4 }
  0x81   :  { %1779 = vmatpush.bf16.msrb.mxu0 %v3605_v60  ;;  %1792 = vmatpush.bf16.msrb.mxu1 %v3733_v61  ;;  %v4485_v29 = vld [vmem:[#allocation2 + $0x504] sm:$0xf]  ;;  %v3682_v30 = vld [vmem:[#allocation2 + $0x510] sm:$0xf0]  ;;  %v3557_v43 = vor.u32 %v4453_v25, %v3554_v26  ;;  %v3400_v60 = vld [vmem:[#allocation2 + $0x2c8] sm:$0xf] }
  0x82   :  { %1805 = vmatpush.bf16.msrb.mxu2 %v3861_v62  ;;  %v4517_v31 = vld [vmem:[#allocation2 + $0x604] sm:$0xf]  ;;  %v3810_v33 = vld [vmem:[#allocation2 + $0x610] sm:$0xf0]  ;;  %v3685_v47 = vor.u32 %v4485_v29, %v3682_v30  ;;  %v4416_v61 = vld [vmem:[#allocation2 + $0x2d4] sm:$0xf0] }
  0x83   :  { %1818 = vmatpush.bf16.msrb.mxu3 %v3989_v3  ;;  %v4549_v35 = vld [vmem:[#allocation2 + $0x704] sm:$0xf]  ;;  %v3938_v36 = vld [vmem:[#allocation2 + $0x710] sm:$0xf0]  ;;  %v3813_v48 = vor.u32 %v4517_v31, %v3810_v33  ;;  %v3528_v62 = vld [vmem:[#allocation2 + $0x3c8] sm:$0xf]  ;;  %v3401_v3 = vor.u32 %v4416_v61, %v3400_v60 }
  0x84   :  { %v3941_v51 = vor.u32 %v4549_v35, %v3938_v36  ;;  %v3529_v7 = vor.u32 %v4448_v0, %v3528_v62  ;;  %v4380_v8 = vld [vmem:[#allocation2 + $0x1b4] sm:$0xf0]  ;;  %v3112_v19 = vld [vmem:[#allocation2 + $0x88] sm:$0xf] }
  0x85   :  { %1780 = vmatpush.bf16.msrb.mxu0 %v3589_v10  ;;  %1793 = vmatpush.bf16.msrb.mxu1 %v3717_v11  ;;  %v3384_v10 = vld [vmem:[#allocation2 + $0x2a8] sm:$0xf]  ;;  %v4412_v11 = vld [vmem:[#allocation2 + $0x2b4] sm:$0xf0]  ;;  %v3257_v15 = vor.u32 %v4380_v8, %v3256_v6 }
  0x86   :  { %1806 = vmatpush.bf16.msrb.mxu2 %v3845_v12  ;;  %v3512_v12 = vld [vmem:[#allocation2 + $0x3a8] sm:$0xf]  ;;  %v4444_v13 = vld [vmem:[#allocation2 + $0x3b4] sm:$0xf0] }
  0x87   :  { %1819 = vmatpush.bf16.msrb.mxu3 %v3973_v18  ;;  %v3385_v18 = vor.u32 %v4412_v11, %v3384_v10  ;;  %v4344_v20 = vld [vmem:[#allocation2 + $0x94] sm:$0xf0]  ;;  %v3240_v21 = vld [vmem:[#allocation2 + $0x188] sm:$0xf]  ;;  %v3513_v22 = vor.u32 %v4444_v13, %v3512_v12 }
  0x88   :  { %v4376_v23 = vld [vmem:[#allocation2 + $0x194] sm:$0xf0]  ;;  %v3496_v26 = vld [vmem:[#allocation2 + $0x388] sm:$0xf] }
  0x89   :  { %1781 = vmatpush.bf16.msrb.mxu0 %v3573_v24  ;;  %1794 = vmatpush.bf16.msrb.mxu1 %v3701_v27  ;;  %v3368_v24 = vld [vmem:[#allocation2 + $0x288] sm:$0xf]  ;;  %v4408_v25 = vld [vmem:[#allocation2 + $0x294] sm:$0xf0]  ;;  %v3241_v29 = vor.u32 %v4376_v23, %v3240_v21 }
  0x8a   :  { %1807 = vmatpush.bf16.msrb.mxu2 %v3829_v28  ;;  %v4440_v27 = vld [vmem:[#allocation2 + $0x394] sm:$0xf0]  ;;  %v3113_v28 = vor.u32 %v4344_v20, %v3112_v19  ;;  %v3369_v30 = vor.u32 %v4408_v25, %v3368_v24  ;;  %v3096_v31 = vld [vmem:[#allocation2 + $0x68] sm:$0xf] }
  0x8b   :  { %1820 = vmatpush.bf16.msrb.mxu3 %v3957_v32  ;;  %v4340_v32 = vld [vmem:[#allocation2 + $0x74] sm:$0xf0]  ;;  %v3224_v33 = vld [vmem:[#allocation2 + $0x168] sm:$0xf]  ;;  %v3497_v35 = vor.u32 %v4440_v27, %v3496_v26 }
  0x8c   :  { %v4372_v36 = vld [vmem:[#allocation2 + $0x174] sm:$0xf0]  ;;  %v3352_v39 = vld [vmem:[#allocation2 + $0x268] sm:$0xf]  ;;  %v3097_v44 = vor.u32 %v4340_v32, %v3096_v31 }
  0x8d   :  { %1782 = vmatpush.bf16.msrb.mxu0 %v3557_v43  ;;  %1795 = vmatpush.bf16.msrb.mxu1 %v3685_v47  ;;  %v4404_v41 = vld [vmem:[#allocation2 + $0x274] sm:$0xf0]  ;;  %v3480_v42 = vld [vmem:[#allocation2 + $0x368] sm:$0xf]  ;;  %v3225_v45 = vor.u32 %v4372_v36, %v3224_v33 }
  0x8e   :  { %1808 = vmatpush.bf16.msrb.mxu2 %v3813_v48  ;;  %v4436_v43 = vld [vmem:[#allocation2 + $0x374] sm:$0xf0]  ;;  %v3353_v46 = vor.u32 %v4404_v41, %v3352_v39  ;;  %v3080_v47 = vld [vmem:[#allocation2 + $0x48] sm:$0xf] }
  0x8f   :  { %1821 = vmatpush.bf16.msrb.mxu3 %v3941_v51  ;;  %v4336_v48 = vld [vmem:[#allocation2 + $0x54] sm:$0xf0]  ;;  %v3208_v49 = vld [vmem:[#allocation2 + $0x148] sm:$0xf]  ;;  %v3481_v50 = vor.u32 %v4436_v43, %v3480_v42 }
  0x90   :  { %1783 = vmatmul.bf16.vlgmr.msrb.gmra.mxu0 %v4820_v37  ;;  %1796 = vmatmul.bf16.vlgmr.msrb.gmra.mxu1 %v4824_v40  ;;  %v4368_v51 = vld [vmem:[#allocation2 + $0x154] sm:$0xf0]  ;;  %v3081_v56 = vor.u32 %v4336_v48, %v3080_v47  ;;  %v3064_v59 = vld [vmem:[#allocation2 + $0x28] sm:$0xf] }
  0x91   :  { %1827 = vmatpush.bf16.msra.mxu0 %v3161_v52  ;;  %1840 = vmatpush.bf16.msra.mxu1 %v3289_v53  ;;  %v3336_v52 = vld [vmem:[#allocation2 + $0x248] sm:$0xf]  ;;  %v4400_v53 = vld [vmem:[#allocation2 + $0x254] sm:$0xf0]  ;;  %v3209_v57 = vor.u32 %v4368_v51, %v3208_v49 }
  0x92   :  { %1853 = vmatpush.bf16.msra.mxu2 %v3417_v54  ;;  %1822 = vmatmul.bf16.vlgmr.msrb.gmra.mxu3 %v4822_v38  ;;  %v3464_v54 = vld [vmem:[#allocation2 + $0x348] sm:$0xf]  ;;  %v4432_v55 = vld [vmem:[#allocation2 + $0x354] sm:$0xf0] }
  0x93   :  { %1866 = vmatpush.bf16.msra.mxu3 %v3545_v58  ;;  %1809 = vmatmul.bf16.vlgmr.msrb.gmra.mxu2 %v4818_v34  ;;  %v3337_v58 = vor.u32 %v4400_v53, %v3336_v52  ;;  %v4332_v60 = vld [vmem:[#allocation2 + $0x34] sm:$0xf0]  ;;  %v3192_v61 = vld [vmem:[#allocation2 + $0x128] sm:$0xf]  ;;  %v3465_v62 = vor.u32 %v4432_v55, %v3464_v54 }
  0x94   :  { %v4364_v0 = vld [vmem:[#allocation2 + $0x134] sm:$0xf0]  ;;  %v3065_v5 = vor.u32 %v4332_v60, %v3064_v59  ;;  %v3048_v6 = vld [vmem:[#allocation2 + $0x8] sm:$0xf] }
  0x95   :  { %1828 = vmatpush.bf16.msra.mxu0 %v3145_v1  ;;  %1841 = vmatpush.bf16.msra.mxu1 %v3273_v2  ;;  %v3320_v1 = vld [vmem:[#allocation2 + $0x228] sm:$0xf]  ;;  %v4396_v2 = vld [vmem:[#allocation2 + $0x234] sm:$0xf0]  ;;  %v3193_v8 = vor.u32 %v4364_v0, %v3192_v61 }
  0x96   :  { %1854 = vmatpush.bf16.msra.mxu2 %v3401_v3  ;;  %v3448_v3 = vld [vmem:[#allocation2 + $0x328] sm:$0xf]  ;;  %v4428_v4 = vld [vmem:[#allocation2 + $0x334] sm:$0xf0]  ;;  %v3321_v10 = vor.u32 %v4396_v2, %v3320_v1 }
  0x97   :  { %1867 = vmatpush.bf16.msra.mxu3 %v3529_v7  ;;  %v4328_v7 = vld [vmem:[#allocation2 + $0x14] sm:$0xf0]  ;;  %v3176_v11 = vld [vmem:[#allocation2 + $0x108] sm:$0xf] }
  0x98   :  { %v4360_v12 = vld [vmem:[#allocation2 + $0x114] sm:$0xf0]  ;;  %v3304_v13 = vld [vmem:[#allocation2 + $0x208] sm:$0xf]  ;;  %v3049_v23 = vor.u32 %v4328_v7, %v3048_v6 }
  0x99   :  { %1829 = vmatpush.bf16.msra.mxu0 %v3129_v14  ;;  %1842 = vmatpush.bf16.msra.mxu1 %v3257_v15  ;;  %v3449_v14 = vor.u32 %v4428_v4, %v3448_v3  ;;  %v4392_v15 = vld [vmem:[#allocation2 + $0x214] sm:$0xf0]  ;;  %v3672_v20 = vld [vmem:[#allocation2 + $0x4e8] sm:$0xf]  ;;  %v3177_v27 = vor.u32 %v4360_v12, %v3176_v11 }
  0x9a   :  { %1855 = vmatpush.bf16.msra.mxu2 %v3385_v18  ;;  %v3432_v18 = vld [vmem:[#allocation2 + $0x308] sm:$0xf]  ;;  %v4424_v19 = vld [vmem:[#allocation2 + $0x314] sm:$0xf0] }
  0x9b   :  { %1868 = vmatpush.bf16.msra.mxu3 %v3513_v22  ;;  %v4484_v21 = vld [vmem:[#allocation2 + $0x4f4] sm:$0xf0]  ;;  %v3800_v22 = vld [vmem:[#allocation2 + $0x5e8] sm:$0xf]  ;;  %v3433_v31 = vor.u32 %v4424_v19, %v3432_v18 }
  0x9c   :  { %v4516_v24 = vld [vmem:[#allocation2 + $0x5f4] sm:$0xf0]  ;;  %v3928_v25 = vld [vmem:[#allocation2 + $0x6e8] sm:$0xf]  ;;  %v3673_v32 = vor.u32 %v4484_v21, %v3672_v20 }
  0x9d   :  { %1830 = vmatpush.bf16.msra.mxu0 %v3113_v28  ;;  %1843 = vmatpush.bf16.msra.mxu1 %v3241_v29  ;;  %v4548_v26 = vld [vmem:[#allocation2 + $0x6f4] sm:$0xf0]  ;;  %v3305_v28 = vor.u32 %v4392_v15, %v3304_v13  ;;  %v4056_v29 = vld [vmem:[#allocation2 + $0x7e8] sm:$0xf]  ;;  %v3801_v33 = vor.u32 %v4516_v24, %v3800_v22 }
  0x9e   :  { %1856 = vmatpush.bf16.msra.mxu2 %v3369_v30  ;;  %v4580_v30 = vld [vmem:[#allocation2 + $0x7f4] sm:$0xf0]  ;;  %v3656_v36 = vld [vmem:[#allocation2 + $0x4c8] sm:$0xf] }
  0x9f   :  { %1869 = vmatpush.bf16.msra.mxu3 %v3497_v35  ;;  %v3929_v35 = vor.u32 %v4548_v26, %v3928_v25  ;;  %v4480_v39 = vld [vmem:[#allocation2 + $0x4d4] sm:$0xf0]  ;;  %v3784_v41 = vld [vmem:[#allocation2 + $0x5c8] sm:$0xf]  ;;  %v4057_v42 = vor.u32 %v4580_v30, %v4056_v29 }
  0xa0   :  { %v4512_v43 = vld [vmem:[#allocation2 + $0x5d4] sm:$0xf0]  ;;  %v3657_v48 = vor.u32 %v4480_v39, %v3656_v36  ;;  %v3640_v51 = vld [vmem:[#allocation2 + $0x4a8] sm:$0xf] }
  0xa1   :  { %1831 = vmatpush.bf16.msra.mxu0 %v3097_v44  ;;  %1844 = vmatpush.bf16.msra.mxu1 %v3225_v45  ;;  %v3912_v44 = vld [vmem:[#allocation2 + $0x6c8] sm:$0xf]  ;;  %v4544_v45 = vld [vmem:[#allocation2 + $0x6d4] sm:$0xf0]  ;;  %v3785_v49 = vor.u32 %v4512_v43, %v3784_v41 }
  0xa2   :  { %1857 = vmatpush.bf16.msra.mxu2 %v3353_v46  ;;  %v4040_v46 = vld [vmem:[#allocation2 + $0x7c8] sm:$0xf]  ;;  %v4576_v47 = vld [vmem:[#allocation2 + $0x7d4] sm:$0xf0] }
  0xa3   :  { %1870 = vmatpush.bf16.msra.mxu3 %v3481_v50  ;;  %v3913_v50 = vor.u32 %v4544_v45, %v3912_v44  ;;  %v4476_v52 = vld [vmem:[#allocation2 + $0x4b4] sm:$0xf0]  ;;  %v3768_v53 = vld [vmem:[#allocation2 + $0x5a8] sm:$0xf]  ;;  %v4041_v54 = vor.u32 %v4576_v47, %v4040_v46 }
  0xa4   :  { %v4508_v55 = vld [vmem:[#allocation2 + $0x5b4] sm:$0xf0]  ;;  %v3641_v60 = vor.u32 %v4476_v52, %v3640_v51  ;;  %v3624_v0 = vld [vmem:[#allocation2 + $0x488] sm:$0xf] }
  0xa5   :  { %1832 = vmatpush.bf16.msra.mxu0 %v3081_v56  ;;  %1845 = vmatpush.bf16.msra.mxu1 %v3209_v57  ;;  %v3896_v56 = vld [vmem:[#allocation2 + $0x6a8] sm:$0xf]  ;;  %v4540_v57 = vld [vmem:[#allocation2 + $0x6b4] sm:$0xf0]  ;;  %v3769_v61 = vor.u32 %v4508_v55, %v3768_v53 }
  0xa6   :  { %1858 = vmatpush.bf16.msra.mxu2 %v3337_v58  ;;  %v4024_v58 = vld [vmem:[#allocation2 + $0x7a8] sm:$0xf]  ;;  %v4572_v59 = vld [vmem:[#allocation2 + $0x7b4] sm:$0xf0] }
  0xa7   :  { %1871 = vmatpush.bf16.msra.mxu3 %v3465_v62  ;;  %v3897_v62 = vor.u32 %v4540_v57, %v3896_v56  ;;  %v4472_v1 = vld [vmem:[#allocation2 + $0x494] sm:$0xf0]  ;;  %v3752_v2 = vld [vmem:[#allocation2 + $0x588] sm:$0xf]  ;;  %v4025_v3 = vor.u32 %v4572_v59, %v4024_v58 }
  0xa8   :  { %v4504_v4 = vld [vmem:[#allocation2 + $0x594] sm:$0xf0]  ;;  %v4008_v7 = vld [vmem:[#allocation2 + $0x788] sm:$0xf] }
  0xa9   :  { %1833 = vmatpush.bf16.msra.mxu0 %v3065_v5  ;;  %1846 = vmatpush.bf16.msra.mxu1 %v3193_v8  ;;  %v3880_v5 = vld [vmem:[#allocation2 + $0x688] sm:$0xf]  ;;  %v4536_v6 = vld [vmem:[#allocation2 + $0x694] sm:$0xf0]  ;;  %v3753_v11 = vor.u32 %v4504_v4, %v3752_v2 }
  0xaa   :  { %1859 = vmatpush.bf16.msra.mxu2 %v3321_v10  ;;  %v4568_v8 = vld [vmem:[#allocation2 + $0x794] sm:$0xf0]  ;;  %v3625_v10 = vor.u32 %v4472_v1, %v3624_v0  ;;  %v3881_v12 = vor.u32 %v4536_v6, %v3880_v5  ;;  %v3608_v13 = vld [vmem:[#allocation2 + $0x468] sm:$0xf] }
  0xab   :  { %1872 = vmatpush.bf16.msra.mxu3 %v3449_v14  ;;  %v4468_v14 = vld [vmem:[#allocation2 + $0x474] sm:$0xf0]  ;;  %v3736_v15 = vld [vmem:[#allocation2 + $0x568] sm:$0xf]  ;;  %v4009_v18 = vor.u32 %v4568_v8, %v4008_v7  ;;  %v4354_v7 = vld [vmem:[#allocation2 + $0xec] sm:$0xf] }
  0xac   :  { %v4500_v19 = vld [vmem:[#allocation2 + $0x574] sm:$0xf0]  ;;  %v3864_v20 = vld [vmem:[#allocation2 + $0x668] sm:$0xf]  ;;  %v3609_v24 = vor.u32 %v4468_v14, %v3608_v13  ;;  %v1641_v41 = vpop.f32.mrf.mxu1  ;;  %v3162_v8 = vld [vmem:[#allocation2 + $0xf8] sm:$0xf0] }
  0xad   :  { %1834 = vmatpush.bf16.msra.mxu0 %v3049_v23  ;;  %1847 = vmatpush.bf16.msra.mxu1 %v3177_v27  ;;  %v4532_v21 = vld [vmem:[#allocation2 + $0x674] sm:$0xf0]  ;;  %v3992_v22 = vld [vmem:[#allocation2 + $0x768] sm:$0xf]  ;;  %v3737_v26 = vor.u32 %v4500_v19, %v3736_v15  ;;  %v3290_v14 = vld [vmem:[#allocation2 + $0x1f8] sm:$0xf0] }
  0xae   :  { %1860 = vmatpush.bf16.msra.mxu2 %v3305_v28  ;;  %v4564_v23 = vld [vmem:[#allocation2 + $0x774] sm:$0xf0]  ;;  %v3865_v27 = vor.u32 %v4532_v21, %v3864_v20  ;;  %v3592_v28 = vld [vmem:[#allocation2 + $0x448] sm:$0xf]  ;;  %v4418_v15 = vld [vmem:[#allocation2 + $0x2ec] sm:$0xf] }
  0xaf   :  { %1873 = vmatpush.bf16.msra.mxu3 %v3433_v31  ;;  %v4464_v29 = vld [vmem:[#allocation2 + $0x454] sm:$0xf0]  ;;  %v3720_v30 = vld [vmem:[#allocation2 + $0x548] sm:$0xf]  ;;  %v3993_v31 = vor.u32 %v4564_v23, %v3992_v22  ;;  %v4450_v21 = vld [vmem:[#allocation2 + $0x3ec] sm:$0xf] }
  0xb0   :  { %1835 = vmatmul.bf16.vlgmr.msra.gmra.mxu0 %v4791_v9  ;;  %1848 = vmatmul.bf16.vlgmr.msra.gmra.mxu1 %v4801_v17  ;;  %v3976_v36 = vld [vmem:[#allocation2 + $0x748] sm:$0xf]  ;;  %v4560_v39 = vld [vmem:[#allocation2 + $0x754] sm:$0xf0]  ;;  %v3593_v43 = vor.u32 %v4464_v29, %v3592_v28  ;;  %v3546_v22 = vld [vmem:[#allocation2 + $0x3f8] sm:$0xf0] }
  0xb1   :  { %1879 = vmatpush.bf16.msrb.mxu0 %v3673_v32  ;;  %1892 = vmatpush.bf16.msrb.mxu1 %v3801_v33  ;;  %v4496_v32 = vld [vmem:[#allocation2 + $0x554] sm:$0xf0]  ;;  %v3848_v33 = vld [vmem:[#allocation2 + $0x648] sm:$0xf]  ;;  %v3146_v28 = vld [vmem:[#allocation2 + $0xd8] sm:$0xf0] }
  0xb2   :  { %1905 = vmatpush.bf16.msrb.mxu2 %v3929_v35  ;;  %1874 = vmatmul.bf16.vlgmr.msra.gmra.mxu3 %v4799_v16  ;;  %v4528_v35 = vld [vmem:[#allocation2 + $0x654] sm:$0xf0]  ;;  %v3721_v45 = vor.u32 %v4496_v32, %v3720_v30  ;;  %v3576_v47 = vld [vmem:[#allocation2 + $0x428] sm:$0xf]  ;;  %v4382_v29 = vld [vmem:[#allocation2 + $0x1cc] sm:$0xf] }
  0xb3   :  { %1918 = vmatpush.bf16.msrb.mxu3 %v4057_v42  ;;  %1861 = vmatmul.bf16.vlgmr.msra.gmra.mxu2 %v4785_v63  ;;  %v3849_v46 = vor.u32 %v4528_v35, %v3848_v33  ;;  %v4492_v51 = vld [vmem:[#allocation2 + $0x534] sm:$0xf0]  ;;  %v3832_v52 = vld [vmem:[#allocation2 + $0x628] sm:$0xf]  ;;  %v3274_v32 = vld [vmem:[#allocation2 + $0x1d8] sm:$0xf0] }
  0xb4   :  { %v4524_v53 = vld [vmem:[#allocation2 + $0x634] sm:$0xf0]  ;;  %v4846_v56 = vpop.f32.mrf.mxu3  ;;  %v3560_v58 = vld [vmem:[#allocation2 + $0x408] sm:$0xf]  ;;  %v4414_v33 = vld [vmem:[#allocation2 + $0x2cc] sm:$0xf] }
  0xb5   :  { %1880 = vmatpush.bf16.msrb.mxu0 %v3657_v48  ;;  %1893 = vmatpush.bf16.msrb.mxu1 %v3785_v49  ;;  %v4460_v48 = vld [vmem:[#allocation2 + $0x434] sm:$0xf0]  ;;  %v3704_v49 = vld [vmem:[#allocation2 + $0x528] sm:$0xf]  ;;  %v3402_v35 = vld [vmem:[#allocation2 + $0x2d8] sm:$0xf0] }
  0xb6   :  { %1906 = vmatpush.bf16.msrb.mxu2 %v3913_v50  ;;  %v3977_v50 = vor.u32 %v4560_v39, %v3976_v36  ;;  %v4556_v55 = vld [vmem:[#allocation2 + $0x734] sm:$0xf0]  ;;  %v3577_v57 = vor.u32 %v4460_v48, %v3576_v47  ;;  %v3688_v0 = vld [vmem:[#allocation2 + $0x508] sm:$0xf]  ;;  %v4446_v36 = vld [vmem:[#allocation2 + $0x3cc] sm:$0xf] }
  0xb7   :  { %1919 = vmatpush.bf16.msrb.mxu3 %v4041_v54  ;;  %v3960_v54 = vld [vmem:[#allocation2 + $0x728] sm:$0xf]  ;;  %v4456_v59 = vld [vmem:[#allocation2 + $0x414] sm:$0xf0]  ;;  %v3530_v39 = vld [vmem:[#allocation2 + $0x3d8] sm:$0xf0] }
  0xb8   :  { %v4488_v1 = vld [vmem:[#allocation2 + $0x514] sm:$0xf0]  ;;  %v3816_v2 = vld [vmem:[#allocation2 + $0x608] sm:$0xf]  ;;  %v3561_v13 = vor.u32 %v4456_v59, %v3560_v58  ;;  %v3130_v47 = vld [vmem:[#allocation2 + $0xb8] sm:$0xf0] }
  0xb9   :  { %1881 = vmatpush.bf16.msrb.mxu0 %v3641_v60  ;;  %1894 = vmatpush.bf16.msrb.mxu1 %v3769_v61  ;;  %v1628_v25 = vpop.f32.mrf.mxu0  ;;  %v3705_v61 = vor.u32 %v4492_v51, %v3704_v49  ;;  %v4520_v4 = vld [vmem:[#allocation2 + $0x614] sm:$0xf0]  ;;  %v3944_v5 = vld [vmem:[#allocation2 + $0x708] sm:$0xf]  ;;  %v3689_v19 = vor.u32 %v4488_v1, %v3688_v0  ;;  %v4378_v48 = vld [vmem:[#allocation2 + $0x1ac] sm:$0xf]  ;;  %v3533_v49 = vor.u32 %v4446_v36, %v3530_v39 }
  0xba   :  { %1907 = vmatpush.bf16.msrb.mxu2 %v3897_v62  ;;  %v4844_v44 = vadd.f32 %v1641_v41, %v1628_v25  ;;  %v3833_v62 = vor.u32 %v4524_v53, %v3832_v52  ;;  %v4552_v6 = vld [vmem:[#allocation2 + $0x714] sm:$0xf0]  ;;  %v3817_v20 = vor.u32 %v4520_v4, %v3816_v2  ;;  %v4410_v51 = vld [vmem:[#allocation2 + $0x2ac] sm:$0xf]  ;;  %v3386_v52 = vld [vmem:[#allocation2 + $0x2b8] sm:$0xf0] }
  0xbb   :  { %1920 = vmatpush.bf16.msrb.mxu3 %v4025_v3  ;;  %v4842_v42 = vpop.f32.mrf.mxu2  ;;  %v3961_v3 = vor.u32 %v4556_v55, %v3960_v54  ;;  %v3945_v23 = vor.u32 %v4552_v6, %v3944_v5  ;;  %v4442_v53 = vld [vmem:[#allocation2 + $0x3ac] sm:$0xf]  ;;  %v3514_v54 = vld [vmem:[#allocation2 + $0x3b8] sm:$0xf0]  ;;  %v3389_v58 = vor.u32 %v4410_v51, %v3386_v52 }
  0xbc   :  { %v1669_v30 = vpop.f32.mrf.mxu3  ;;  %v4342_v59 = vld [vmem:[#allocation2 + $0x8c] sm:$0xf]  ;;  %v3242_v0 = vld [vmem:[#allocation2 + $0x198] sm:$0xf0] }
  0xbd   :  { %1882 = vmatpush.bf16.msrb.mxu0 %v3625_v10  ;;  %1895 = vmatpush.bf16.msrb.mxu1 %v3753_v11  ;;  %v4386_v10 = vld [vmem:[#allocation2 + $0x1ec] sm:$0xf]  ;;  %v1643_v11 = vpop.f32.mrf.mxu1  ;;  %v3370_v2 = vld [vmem:[#allocation2 + $0x298] sm:$0xf0] }
  0xbe   :  { %1908 = vmatpush.bf16.msrb.mxu2 %v3881_v12  ;;  %v3293_v25 = vor.u32 %v4386_v10, %v3290_v14  ;;  %v4406_v1 = vld [vmem:[#allocation2 + $0x28c] sm:$0xf]  ;;  %v3498_v4 = vld [vmem:[#allocation2 + $0x398] sm:$0xf0] }
  0xbf   :  { %1921 = vmatpush.bf16.msrb.mxu3 %v4009_v18  ;;  %v3418_v18 = vld [vmem:[#allocation2 + $0x2f8] sm:$0xf0]  ;;  %v4338_v10 = vld [vmem:[#allocation2 + $0x6c] sm:$0xf] }
  0xc0   :  { %v3098_v11 = vld [vmem:[#allocation2 + $0x78] sm:$0xf0]  ;;  %v4394_v52 = vld [vmem:[#allocation2 + $0x22c] sm:$0xf] }
  0xc1   :  { %1883 = vmatpush.bf16.msrb.mxu0 %v3609_v24  ;;  %1896 = vmatpush.bf16.msrb.mxu1 %v3737_v26  ;;  %v1630_v60 = vpop.f32.mrf.mxu0  ;;  %v3165_v24 = vor.u32 %v4354_v7, %v3162_v8  ;;  %v3421_v26 = vor.u32 %v4418_v15, %v3418_v18  ;;  %v3373_v8 = vor.u32 %v4406_v1, %v3370_v2  ;;  %v3226_v15 = vld [vmem:[#allocation2 + $0x178] sm:$0xf0]  ;;  %v4402_v18 = vld [vmem:[#allocation2 + $0x26c] sm:$0xf] }
  0xc2   :  { %1909 = vmatpush.bf16.msrb.mxu2 %v3865_v27  ;;  %v4350_v27 = vld [vmem:[#allocation2 + $0xcc] sm:$0xf]  ;;  %v3114_v60 = vld [vmem:[#allocation2 + $0x98] sm:$0xf0] }
  0xc3   :  { %1922 = vmatpush.bf16.msrb.mxu3 %v3993_v31  ;;  %v1656_v12 = vpop.f32.mrf.mxu2  ;;  %v3549_v31 = vor.u32 %v4450_v21, %v3546_v22  ;;  %v3149_v41 = vor.u32 %v4350_v27, %v3146_v28  ;;  %v3117_v5 = vor.u32 %v4342_v59, %v3114_v60  ;;  %v3482_v21 = vld [vmem:[#allocation2 + $0x378] sm:$0xf0]  ;;  %v3101_v22 = vor.u32 %v4338_v10, %v3098_v11  ;;  %v4366_v27 = vld [vmem:[#allocation2 + $0x14c] sm:$0xf] }
  0xc4   :  { %v4370_v12 = vld [vmem:[#allocation2 + $0x16c] sm:$0xf]  ;;  %v3210_v30 = vld [vmem:[#allocation2 + $0x158] sm:$0xf0] }
  0xc5   :  { %1884 = vmatpush.bf16.msrb.mxu0 %v3593_v43  ;;  %1897 = vmatpush.bf16.msrb.mxu1 %v3721_v45  ;;  %v3277_v43 = vor.u32 %v4382_v29, %v3274_v32  ;;  %v3405_v45 = vor.u32 %v4414_v33, %v3402_v35  ;;  %v3338_v32 = vld [vmem:[#allocation2 + $0x258] sm:$0xf0]  ;;  %v4430_v35 = vld [vmem:[#allocation2 + $0x34c] sm:$0xf] }
  0xc6   :  { %1910 = vmatpush.bf16.msrb.mxu2 %v3849_v46  ;;  %v4346_v46 = vld [vmem:[#allocation2 + $0xac] sm:$0xf]  ;;  %v3466_v36 = vld [vmem:[#allocation2 + $0x358] sm:$0xf0] }
  0xc7   :  { %1923 = vmatpush.bf16.msrb.mxu3 %v3977_v50  ;;  %v3258_v50 = vld [vmem:[#allocation2 + $0x1b8] sm:$0xf0]  ;;  %v3133_v55 = vor.u32 %v4346_v46, %v3130_v47  ;;  %v4330_v46 = vld [vmem:[#allocation2 + $0x2c] sm:$0xf] }
  0xc8   :  { %v3066_v47 = vld [vmem:[#allocation2 + $0x38] sm:$0xf0]  ;;  %v4390_v1 = vld [vmem:[#allocation2 + $0x20c] sm:$0xf] }
  0xc9   :  { %1885 = vmatpush.bf16.msrb.mxu0 %v3577_v57  ;;  %1898 = vmatpush.bf16.msrb.mxu1 %v3705_v61  ;;  %v3261_v57 = vor.u32 %v4378_v48, %v3258_v50  ;;  %v4374_v61 = vld [vmem:[#allocation2 + $0x18c] sm:$0xf]  ;;  %v3469_v50 = vor.u32 %v4430_v35, %v3466_v36  ;;  %v3194_v51 = vld [vmem:[#allocation2 + $0x138] sm:$0xf0] }
  0xca   :  { %1911 = vmatpush.bf16.msrb.mxu2 %v3833_v62  ;;  %v3517_v62 = vor.u32 %v4442_v53, %v3514_v54  ;;  %v3245_v7 = vor.u32 %v4374_v61, %v3242_v0  ;;  %v4362_v48 = vld [vmem:[#allocation2 + $0x12c] sm:$0xf]  ;;  %v3322_v53 = vld [vmem:[#allocation2 + $0x238] sm:$0xf0] }
  0xcb   :  { %1924 = vmatpush.bf16.msrb.mxu3 %v3961_v3  ;;  %v4438_v3 = vld [vmem:[#allocation2 + $0x38c] sm:$0xf]  ;;  %v3050_v59 = vld [vmem:[#allocation2 + $0x18] sm:$0xf0]  ;;  %v3197_v60 = vor.u32 %v4362_v48, %v3194_v51  ;;  %v3325_v61 = vor.u32 %v4394_v52, %v3322_v53 }
  0xcc   :  { %v3501_v14 = vor.u32 %v4438_v3, %v3498_v4  ;;  %v4426_v54 = vld [vmem:[#allocation2 + $0x32c] sm:$0xf]  ;;  %v3178_v0 = vld [vmem:[#allocation2 + $0x118] sm:$0xf0] }
  0xcd   :  { %1886 = vmatpush.bf16.msrb.mxu0 %v3561_v13  ;;  %1899 = vmatpush.bf16.msrb.mxu1 %v3689_v19  ;;  %v4852_v6 = vpop.f32.mrf.mxu0  ;;  %v4854_v13 = vpop.f32.mrf.mxu1  ;;  %v3354_v19 = vld [vmem:[#allocation2 + $0x278] sm:$0xf0]  ;;  %v4482_v10 = vld [vmem:[#allocation2 + $0x4ec] sm:$0xf] }
  0xce   :  { %1912 = vmatpush.bf16.msrb.mxu2 %v3817_v20  ;;  %v4434_v20 = vld [vmem:[#allocation2 + $0x36c] sm:$0xf]  ;;  %v3306_v4 = vld [vmem:[#allocation2 + $0x218] sm:$0xf0] }
  0xcf   :  { %1925 = vmatpush.bf16.msrb.mxu3 %v3945_v23  ;;  %v3229_v23 = vor.u32 %v4370_v12, %v3226_v15  ;;  %v3485_v29 = vor.u32 %v4434_v20, %v3482_v21  ;;  %v3674_v11 = vld [vmem:[#allocation2 + $0x4f8] sm:$0xf0]  ;;  %v4514_v12 = vld [vmem:[#allocation2 + $0x5ec] sm:$0xf]  ;;  %v3309_v21 = vor.u32 %v4390_v1, %v3306_v4 }
  0xd0   :  { %1887 = vmatmul.bf16.vlgmr.msrb.gmra.mxu0 %v4820_v37  ;;  %1900 = vmatmul.bf16.vlgmr.msrb.gmra.mxu1 %v4824_v40  ;;  %v3802_v15 = vld [vmem:[#allocation2 + $0x5f8] sm:$0xf0]  ;;  %v4542_v36 = vld [vmem:[#allocation2 + $0x6cc] sm:$0xf] }
  0xd1   :  { %1931 = vmatpush.bf16.msra.mxu0 %v3165_v24  ;;  %1944 = vmatpush.bf16.msra.mxu1 %v3293_v25  ;;  %v3357_v24 = vor.u32 %v4402_v18, %v3354_v19  ;;  %v4334_v25 = vld [vmem:[#allocation2 + $0x4c] sm:$0xf]  ;;  %v3930_v19 = vld [vmem:[#allocation2 + $0x6f8] sm:$0xf0] }
  0xd2   :  { %1957 = vmatpush.bf16.msra.mxu2 %v3421_v26  ;;  %1926 = vmatmul.bf16.vlgmr.msrb.gmra.mxu3 %v4822_v38  ;;  %v3082_v26 = vld [vmem:[#allocation2 + $0x58] sm:$0xf0]  ;;  %v4546_v18 = vld [vmem:[#allocation2 + $0x6ec] sm:$0xf] }
  0xd3   :  { %1970 = vmatpush.bf16.msra.mxu3 %v3549_v31  ;;  %1913 = vmatmul.bf16.vlgmr.msrb.gmra.mxu2 %v4818_v34  ;;  %v4398_v31 = vld [vmem:[#allocation2 + $0x24c] sm:$0xf]  ;;  %v3085_v39 = vor.u32 %v4334_v25, %v3082_v26  ;;  %v3677_v25 = vor.u32 %v4482_v10, %v3674_v11  ;;  %v3805_v26 = vor.u32 %v4514_v12, %v3802_v15  ;;  %v3786_v35 = vld [vmem:[#allocation2 + $0x5d8] sm:$0xf0] }
  0xd4   :  { %v4474_v48 = vld [vmem:[#allocation2 + $0x4ac] sm:$0xf]  ;;  %v3770_v52 = vld [vmem:[#allocation2 + $0x5b8] sm:$0xf0] }
  0xd5   :  { %1932 = vmatpush.bf16.msra.mxu0 %v3149_v41  ;;  %1945 = vmatpush.bf16.msra.mxu1 %v3277_v43  ;;  %v4858_v33 = vpop.f32.mrf.mxu3  ;;  %v1682_v41 = vpop.f32.mrf.mxu0  ;;  %v3213_v43 = vor.u32 %v4366_v27, %v3210_v30  ;;  %v3933_v27 = vor.u32 %v4546_v18, %v3930_v19  ;;  %v3658_v30 = vld [vmem:[#allocation2 + $0x4d8] sm:$0xf0]  ;;  %v4538_v53 = vld [vmem:[#allocation2 + $0x6ac] sm:$0xf] }
  0xd6   :  { %1958 = vmatpush.bf16.msra.mxu2 %v3405_v45  ;;  %v4856_v28 = vpop.f32.mrf.mxu2  ;;  %v3341_v45 = vor.u32 %v4398_v31, %v3338_v32  ;;  %v4510_v31 = vld [vmem:[#allocation2 + $0x5cc] sm:$0xf]  ;;  %v3754_v1 = vld [vmem:[#allocation2 + $0x598] sm:$0xf0] }
  0xd7   :  { %1971 = vmatpush.bf16.msra.mxu3 %v3533_v49  ;;  %v1695_v49 = vpop.f32.mrf.mxu1  ;;  %v4574_v41 = vld [vmem:[#allocation2 + $0x7cc] sm:$0xf]  ;;  %v3610_v10 = vld [vmem:[#allocation2 + $0x478] sm:$0xf0] }
  0xd8   :  { %v3642_v49 = vld [vmem:[#allocation2 + $0x4b8] sm:$0xf0]  ;;  %v4566_v4 = vld [vmem:[#allocation2 + $0x78c] sm:$0xf] }
  0xd9   :  { %1933 = vmatpush.bf16.msra.mxu0 %v3133_v55  ;;  %1946 = vmatpush.bf16.msra.mxu1 %v3261_v57  ;;  %v3450_v55 = vld [vmem:[#allocation2 + $0x338] sm:$0xf0]  ;;  %v3069_v57 = vor.u32 %v4330_v46, %v3066_v47  ;;  %v3789_v46 = vor.u32 %v4510_v31, %v3786_v35  ;;  %v4498_v11 = vld [vmem:[#allocation2 + $0x56c] sm:$0xf] }
  0xda   :  { %1959 = vmatpush.bf16.msra.mxu2 %v3389_v58  ;;  %v4326_v58 = vld [vmem:[#allocation2 + $0xc] sm:$0xf]  ;;  %v3453_v3 = vor.u32 %v4426_v54, %v3450_v55  ;;  %v3898_v54 = vld [vmem:[#allocation2 + $0x6b8] sm:$0xf0] }
  0xdb   :  { %1972 = vmatpush.bf16.msra.mxu3 %v3517_v62  ;;  %v4358_v62 = vld [vmem:[#allocation2 + $0x10c] sm:$0xf]  ;;  %v3738_v15 = vld [vmem:[#allocation2 + $0x578] sm:$0xf0] }
  0xdc   :  { %v3181_v20 = vor.u32 %v4358_v62, %v3178_v0  ;;  %v4570_v55 = vld [vmem:[#allocation2 + $0x7ac] sm:$0xf]  ;;  %v3626_v62 = vld [vmem:[#allocation2 + $0x498] sm:$0xf0] }
  0xdd   :  { %1934 = vmatpush.bf16.msra.mxu0 %v3117_v5  ;;  %1947 = vmatpush.bf16.msra.mxu1 %v3245_v7  ;;  %v4422_v5 = vld [vmem:[#allocation2 + $0x30c] sm:$0xf]  ;;  %v3434_v7 = vld [vmem:[#allocation2 + $0x318] sm:$0xf0] }
  0xde   :  { %1960 = vmatpush.bf16.msra.mxu2 %v3373_v8  ;;  %v1708_v2 = vpop.f32.mrf.mxu2  ;;  %v1721_v8 = vpop.f32.mrf.mxu3  ;;  %v4530_v18 = vld [vmem:[#allocation2 + $0x66c] sm:$0xf]  ;;  %v3866_v19 = vld [vmem:[#allocation2 + $0x678] sm:$0xf0] }
  0xdf   :  { %1973 = vmatpush.bf16.msra.mxu3 %v3501_v14  ;;  %v3053_v14 = vor.u32 %v4326_v58, %v3050_v59  ;;  %v3645_v58 = vor.u32 %v4474_v48, %v3642_v49  ;;  %v4534_v2 = vld [vmem:[#allocation2 + $0x68c] sm:$0xf]  ;;  %v3722_v31 = vld [vmem:[#allocation2 + $0x558] sm:$0xf0] }
  0xe0   :  { %v4466_v8 = vld [vmem:[#allocation2 + $0x46c] sm:$0xf]  ;;  %v3850_v35 = vld [vmem:[#allocation2 + $0x658] sm:$0xf0] }
  0xe1   :  { %1935 = vmatpush.bf16.msra.mxu0 %v3101_v22  ;;  %1948 = vmatpush.bf16.msra.mxu1 %v3229_v23  ;;  %v4578_v22 = vld [vmem:[#allocation2 + $0x7ec] sm:$0xf]  ;;  %v4058_v23 = vld [vmem:[#allocation2 + $0x7f8] sm:$0xf0] }
  0xe2   :  { %1961 = vmatpush.bf16.msra.mxu2 %v3357_v24  ;;  %v3437_v24 = vor.u32 %v4422_v5, %v3434_v7  ;;  %v4061_v32 = vor.u32 %v4578_v22, %v4058_v23  ;;  %v3613_v22 = vor.u32 %v4466_v8, %v3610_v10  ;;  %v3741_v23 = vor.u32 %v4498_v11, %v3738_v15  ;;  %v4458_v48 = vld [vmem:[#allocation2 + $0x42c] sm:$0xf]  ;;  %v3578_v49 = vld [vmem:[#allocation2 + $0x438] sm:$0xf0] }
  0xe3   :  { %1974 = vmatpush.bf16.msra.mxu3 %v3485_v29  ;;  %v4478_v29 = vld [vmem:[#allocation2 + $0x4cc] sm:$0xf] }
  0xe5   :  { %1936 = vmatpush.bf16.msra.mxu0 %v3085_v39  ;;  %1949 = vmatpush.bf16.msra.mxu1 %v3213_v43  ;;  %v3914_v39 = vld [vmem:[#allocation2 + $0x6d8] sm:$0xf0] }
  0xe6   :  { %1962 = vmatpush.bf16.msra.mxu2 %v3341_v45  ;;  %v4042_v43 = vld [vmem:[#allocation2 + $0x7d8] sm:$0xf0]  ;;  %v3661_v45 = vor.u32 %v4478_v29, %v3658_v30  ;;  %v3917_v47 = vor.u32 %v4542_v36, %v3914_v39  ;;  %v4558_v39 = vld [vmem:[#allocation2 + $0x74c] sm:$0xf] }
  0xe7   :  { %1975 = vmatpush.bf16.msra.mxu3 %v3469_v50  ;;  %v4506_v50 = vld [vmem:[#allocation2 + $0x5ac] sm:$0xf]  ;;  %v4045_v51 = vor.u32 %v4574_v41, %v4042_v43  ;;  %v3978_v41 = vld [vmem:[#allocation2 + $0x758] sm:$0xf0] }
  0xe8   :  { %v3773_v59 = vor.u32 %v4506_v50, %v3770_v52  ;;  %v4490_v50 = vld [vmem:[#allocation2 + $0x52c] sm:$0xf]  ;;  %v3981_v52 = vor.u32 %v4558_v39, %v3978_v41 }
  0xe9   :  { %1937 = vmatpush.bf16.msra.mxu0 %v3069_v57  ;;  %1950 = vmatpush.bf16.msra.mxu1 %v3197_v60  ;;  %v4026_v57 = vld [vmem:[#allocation2 + $0x7b8] sm:$0xf0]  ;;  %v3901_v60 = vor.u32 %v4538_v53, %v3898_v54  ;;  %v4522_v54 = vld [vmem:[#allocation2 + $0x62c] sm:$0xf] }
  0xea   :  { %1963 = vmatpush.bf16.msra.mxu2 %v3325_v61  ;;  %v4470_v61 = vld [vmem:[#allocation2 + $0x48c] sm:$0xf]  ;;  %v4029_v0 = vor.u32 %v4570_v55, %v4026_v57  ;;  %v3706_v53 = vld [vmem:[#allocation2 + $0x538] sm:$0xf0] }
  0xeb   :  { %1976 = vmatpush.bf16.msra.mxu3 %v3453_v3  ;;  %v3882_v3 = vld [vmem:[#allocation2 + $0x698] sm:$0xf0]  ;;  %v4554_v57 = vld [vmem:[#allocation2 + $0x72c] sm:$0xf] }
  0xec   :  { %v3885_v7 = vor.u32 %v4534_v2, %v3882_v3  ;;  %v3834_v55 = vld [vmem:[#allocation2 + $0x638] sm:$0xf0] }
  0xed   :  { %1938 = vmatpush.bf16.msra.mxu0 %v3053_v14  ;;  %1951 = vmatpush.bf16.msra.mxu1 %v3181_v20  ;;  %v4864_v5 = vpop.f32.mrf.mxu0  ;;  %v4866_v12 = vpop.f32.mrf.mxu1  ;;  %v4562_v20 = vld [vmem:[#allocation2 + $0x76c] sm:$0xf]  ;;  %v3690_v3 = vld [vmem:[#allocation2 + $0x518] sm:$0xf0] }
  0xee   :  { %1964 = vmatpush.bf16.msra.mxu2 %v3309_v21  ;;  %v3994_v21 = vld [vmem:[#allocation2 + $0x778] sm:$0xf0] }
  0xef   :  { %1977 = vmatpush.bf16.msra.mxu3 %v3437_v24  ;;  %v3869_v24 = vor.u32 %v4530_v18, %v3866_v19  ;;  %v3997_v30 = vor.u32 %v4562_v20, %v3994_v21  ;;  %v1746_v18 = vadd.f32 %v4866_v12, %v4864_v5  ;;  %v2035_v19 = vld [vmem:[%s5100_s2] sm:$0xff]  ;;  %v2036_v20 = vld [vmem:[%s5100_s2 + $0x8] sm:$0xff] }
  0xf0   :  { %1939 = vmatmul.bf16.vlgmr.msra.gmra.mxu0 %v4791_v9  ;;  %1952 = vmatmul.bf16.vlgmr.msra.gmra.mxu1 %v4801_v17  ;;  %v4010_v9 = vld [vmem:[#allocation2 + $0x798] sm:$0xf0] }
  0xf1   :  { %1983 = vmatpush.bf16.msrb.mxu0 %v3677_v25  ;;  %1996 = vmatpush.bf16.msrb.mxu1 %v3805_v26  ;;  %v4013_v14 = vor.u32 %v4566_v4, %v4010_v9  ;;  %v4462_v25 = vld [vmem:[#allocation2 + $0x44c] sm:$0xf]  ;;  %v3594_v26 = vld [vmem:[#allocation2 + $0x458] sm:$0xf0] }
  0xf2   :  { %2009 = vmatpush.bf16.msrb.mxu2 %v3933_v27  ;;  %1978 = vmatmul.bf16.vlgmr.msra.gmra.mxu3 %v4799_v16  ;;  %v3629_v16 = vor.u32 %v4470_v61, %v3626_v62  ;;  %v4494_v27 = vld [vmem:[#allocation2 + $0x54c] sm:$0xf]  ;;  %v3597_v43 = vor.u32 %v4462_v25, %v3594_v26  ;;  %v3837_v61 = vor.u32 %v4522_v54, %v3834_v55  ;;  %v3818_v9 = vld [vmem:[#allocation2 + $0x618] sm:$0xf0] }
  0xf3   :  { %2022 = vmatpush.bf16.msrb.mxu3 %v4061_v32  ;;  %1965 = vmatmul.bf16.vlgmr.msra.gmra.mxu2 %v4785_v63  ;;  %v4502_v63 = vld [vmem:[#allocation2 + $0x58c] sm:$0xf] }
  0xf4   :  { %v3757_v17 = vor.u32 %v4502_v63, %v3754_v1  ;;  %v4526_v32 = vld [vmem:[#allocation2 + $0x64c] sm:$0xf]  ;;  %v3562_v63 = vld [vmem:[#allocation2 + $0x418] sm:$0xf0] }
  0xf5   :  { %1984 = vmatpush.bf16.msrb.mxu0 %v3661_v45  ;;  %1997 = vmatpush.bf16.msrb.mxu1 %v3789_v46  ;;  %v4870_v36 = vpop.f32.mrf.mxu3  ;;  %v1734_v45 = vpop.f32.mrf.mxu0  ;;  %v3725_v46 = vor.u32 %v4494_v27, %v3722_v31  ;;  %v4454_v62 = vld [vmem:[#allocation2 + $0x40c] sm:$0xf] }
  0xf6   :  { %2010 = vmatpush.bf16.msrb.mxu2 %v3917_v47  ;;  %v4868_v29 = vpop.f32.mrf.mxu2  ;;  %v3853_v47 = vor.u32 %v4526_v32, %v3850_v35  ;;  %v4518_v4 = vld [vmem:[#allocation2 + $0x60c] sm:$0xf]  ;;  %v3565_v8 = vor.u32 %v4454_v62, %v3562_v63 }
  0xf7   :  { %2023 = vmatpush.bf16.msrb.mxu3 %v4045_v51  ;;  %v1747_v51 = vpop.f32.mrf.mxu1  ;;  %v3821_v11 = vor.u32 %v4518_v4, %v3818_v9 }
  0xf9   :  { %1985 = vmatpush.bf16.msrb.mxu0 %v3645_v58  ;;  %1998 = vmatpush.bf16.msrb.mxu1 %v3773_v59  ;;  %v3962_v58 = vld [vmem:[#allocation2 + $0x738] sm:$0xf0]  ;;  %v3581_v59 = vor.u32 %v4458_v48, %v3578_v49 }
  0xfa   :  { %2011 = vmatpush.bf16.msrb.mxu2 %v3901_v60  ;;  %v3709_v60 = vor.u32 %v4490_v50, %v3706_v53  ;;  %v3965_v2 = vor.u32 %v4554_v57, %v3962_v58 }
  0xfb   :  { %2024 = vmatpush.bf16.msrb.mxu3 %v4029_v0  ;;  %v4486_v0 = vld [vmem:[#allocation2 + $0x50c] sm:$0xf] }
  0xfc   :  { %v3693_v10 = vor.u32 %v4486_v0, %v3690_v3 }
  0xfd   :  { %1986 = vmatpush.bf16.msrb.mxu0 %v3629_v16  ;;  %1999 = vmatpush.bf16.msrb.mxu1 %v3757_v17  ;;  %v1773_v16 = vpop.f32.mrf.mxu3  ;;  %v4550_v17 = vld [vmem:[#allocation2 + $0x70c] sm:$0xf] }
  0xfe   :  { %2012 = vmatpush.bf16.msrb.mxu2 %v3885_v7  ;;  %v1760_v1 = vpop.f32.mrf.mxu2  ;;  %v3946_v7 = vld [vmem:[#allocation2 + $0x718] sm:$0xf0] }
  0xff   :  { %2025 = vmatpush.bf16.msrb.mxu3 %v4013_v14  ;;  %v1655_v14 = vadd.f32 %v4842_v42, %v4844_v44  ;;  %v3949_v15 = vor.u32 %v4550_v17, %v3946_v7  ;;  %v1759_v42 = vadd.f32 %v4868_v29, %v1746_v18 }
 0x101   :  { %1987 = vmatpush.bf16.msrb.mxu0 %v3613_v22  ;;  %2000 = vmatpush.bf16.msrb.mxu1 %v3741_v23  ;;  %v1668_v21 = vadd.f32 %v4846_v56, %v1655_v14  ;;  %v1772_v5 = vadd.f32 %v4870_v36, %v1759_v42  ;;  %v2037_v36 = vld [vmem:[%s5100_s2 + $0x10] sm:$0xff] }
 0x102   :  { %2013 = vmatpush.bf16.msrb.mxu2 %v3869_v24 }
 0x103   :  { %2026 = vmatpush.bf16.msrb.mxu3 %v3997_v30  ;;  %v1681_v44 = vadd.f32 %v4852_v6, %v1668_v21 }
 0x105   :  { %1988 = vmatpush.bf16.msrb.mxu0 %v3597_v43  ;;  %2001 = vmatpush.bf16.msrb.mxu1 %v3725_v46  ;;  %v1694_v56 = vadd.f32 %v4854_v13, %v1681_v44 }
 0x106   :  { %2014 = vmatpush.bf16.msrb.mxu2 %v3853_v47 }
 0x107   :  { %2027 = vmatpush.bf16.msrb.mxu3 %v3981_v52 }
 0x109   :  { %1989 = vmatpush.bf16.msrb.mxu0 %v3581_v59  ;;  %2002 = vmatpush.bf16.msrb.mxu1 %v3709_v60  ;;  %v2038_v60 = vld [vmem:[%s5100_s2 + $0x18] sm:$0xff] }
 0x10a   :  { %2015 = vmatpush.bf16.msrb.mxu2 %v3837_v61 }
 0x10b   :  { %2028 = vmatpush.bf16.msrb.mxu3 %v3965_v2 }
 0x10d   :  { %1990 = vmatpush.bf16.msrb.mxu0 %v3565_v8  ;;  %2003 = vmatpush.bf16.msrb.mxu1 %v3693_v10  ;;  %v1784_v12 = vpop.f32.mrf.mxu0  ;;  %v1797_v23 = vpop.f32.mrf.mxu1 }
 0x10e   :  { %2016 = vmatpush.bf16.msrb.mxu2 %v3821_v11  ;;  %v1785_v22 = vadd.f32 %v1784_v12, %v1772_v5 }
 0x10f   :  { %2029 = vmatpush.bf16.msrb.mxu3 %v3949_v15 }
 0x110   :  { %1991 = vmatmul.bf16.vlgmr.msrb.gmra.mxu0 %v4820_v37  ;;  %2004 = vmatmul.bf16.vlgmr.msrb.gmra.mxu1 %v4824_v40  ;;  %v1798_v24 = vadd.f32 %v1797_v23, %v1785_v22  ;;  %v1707_v37 = vadd.f32 %v4856_v28, %v1694_v56 }
 0x111   :  { %2017 = vmatmul.bf16.vlgmr.msrb.gmra.mxu2 %v4818_v34  ;;  %2203 = vmatpush.msra.mxu0 %v2035_v19 }
 0x112   :  { %2060 = vmatpush.xpose.msra.mxu2 %v2035_v19  ;;  %2030 = vmatmul.bf16.vlgmr.msrb.gmra.mxu3 %v4822_v38  ;;  %v4893_v34 = vadd.f32 %v4858_v33, %v1707_v37 }
 0x113   :  { %2083 = vmatpush.xpose.msra.mxu3 %v2036_v20  ;;  %2223 = vmatpush.msra.mxu1 %v2036_v20 }
 0x114   :  { %v2041_v30 = vmul.f32 %v4893_v34, %v4893_v34 }
 0x115   :  { %v1823_v26 = vpop.f32.mrf.mxu3  ;;  %v1786_v6 = vpop.f32.mrf.mxu0 }
 0x116   :  { %v1810_v25 = vpop.f32.mrf.mxu2  ;;  %v1799_v27 = vpop.f32.mrf.mxu1  ;;  %2106 = vmatpush.xpose.msrb.mxu2 %v2037_v36 }
 0x117   :  { %v1811_v40 = vadd.f32 %v1810_v25, %v1798_v24  ;;  %2129 = vmatpush.xpose.msrb.mxu3 %v2038_v60  ;;  %v4720_v25 = vmov 8.0  }
 0x118   :  { %4652 = vrcp.f32 %v4720_v25  ;;  %v4172_v25 = vld [vmem:[#allocation4 + $0xd0] sm:$0xf] }
 0x119   :  { %v4895_v38 = vadd.f32 %v1823_v26, %v1811_v40 }
 0x11b   :  { %v2042_v28 = vmul.f32 %v4895_v38, %v4895_v38 }
 0x11d   :  { %v1825_v29 = vpop.f32.mrf.mxu3 }
 0x11e   :  { %v1812_v13 = vpop.f32.mrf.mxu2  ;;  %v4653_v6 = vpop.eup %4652 }
 0x11f   :  { %v2146_v29 = vmul.f32 8.0, %v4653_v6  ;;  %vm2150_vm1 = vweird.f32 %v4653_v6 }
 0x121   :  { %2061 = vmatmul.f32.vlgmr.msra.gmra.mxu2 %v4893_v34 }
 0x122   :  { %2084 = vmatmul.f32.vlgmr.msra.gmra.mxu3 %v4895_v38  ;;  %2243 = vmatpush.msra.mxu2 %v2037_v36 }
 0x123   :  { %2263 = vmatpush.msra.mxu3 %v2038_v60 }
 0x129   :  { %2064 = vmatmul.f32.gmra.mxu2 %v2041_v30 }
 0x12a   :  { %2087 = vmatmul.f32.gmra.mxu3 %v2042_v28 }
 0x12d   :  { %v1836_v33 = vpop.f32.mrf.mxu0  ;;  %v1849_v31 = vpop.f32.mrf.mxu1 }
 0x12e   :  { %v1850_v46 = vadd.f32 %v1849_v31, %v1836_v33  ;;  %v2147_v31 = vsub.f32 1.0, %v2146_v29 }
 0x135   :  { %v1875_v35 = vpop.f32.mrf.mxu3  ;;  %v1838_v39 = vpop.f32.mrf.mxu0 }
 0x136   :  { %v1862_v32 = vpop.f32.mrf.mxu2  ;;  %v1851_v41 = vpop.f32.mrf.mxu1 }
 0x137   :  { %v1863_v47 = vadd.f32 %v1862_v32, %v1850_v46 }
 0x139   :  { %v1876_v48 = vadd.f32 %v1875_v35, %v1863_v47 }
 0x13d   :  { %v1877_v45 = vpop.f32.mrf.mxu3 }
 0x13e   :  { %v1864_v43 = vpop.f32.mrf.mxu2 }
 0x13f   :  { %v2148_v43 = vmul.f32 %v4653_v6, %v2147_v31 }
 0x14d   :  { %v1888_v49 = vpop.f32.mrf.mxu0  ;;  %v1901_v51 = vpop.f32.mrf.mxu1 }
 0x14e   :  { %v1889_v50 = vadd.f32 %v1888_v49, %v1876_v48  ;;  %v2149_v49 = vadd.f32 %v4653_v6, %v2148_v43  ;;  %v4300_v43 = vld [vmem:[#allocation4 + $0x1d0] sm:$0xf] }
 0x150   :  { %v1902_v52 = vadd.f32 %v1901_v51, %v1889_v50 }
 0x155   :  { %v1927_v55 = vpop.f32.mrf.mxu3  ;;  %v1890_v58 = vpop.f32.mrf.mxu0 }
 0x156   :  { %v1914_v53 = vpop.f32.mrf.mxu2  ;;  %v1903_v59 = vpop.f32.mrf.mxu1 }
 0x157   :  { %v1915_v54 = vadd.f32 %v1914_v53, %v1902_v52 }
 0x159   :  { %v4906_v57 = vadd.f32 %v1927_v55, %v1915_v54  ;;  %v4921_v55 = vsel %vm2150_vm1, %v4653_v6, %v2149_v49  ;;  %v4626_v6 = vld [vmem:[#allocation4 + $0x164] sm:$0xf0] }
 0x15b   :  { %2107 = vmatmul.f32.vlgmr.msrb.gmra.mxu2 %v4906_v57  ;;  %v2043_v63 = vmul.f32 %v4906_v57, %v4906_v57 }
 0x15d   :  { %v1929_v62 = vpop.f32.mrf.mxu3 }
 0x15e   :  { %v1916_v61 = vpop.f32.mrf.mxu2 }
 0x163   :  { %2110 = vmatmul.f32.gmra.mxu2 %v2043_v63 }
 0x16d   :  { %v1940_v0 = vpop.f32.mrf.mxu0  ;;  %v1953_v1 = vpop.f32.mrf.mxu1 }
 0x16e   :  { %v1954_v7 = vadd.f32 %v1953_v1, %v1940_v0 }
 0x175   :  { %v1979_v3 = vpop.f32.mrf.mxu3  ;;  %v1942_v4 = vpop.f32.mrf.mxu0 }
 0x176   :  { %v1966_v2 = vpop.f32.mrf.mxu2  ;;  %v1955_v9 = vpop.f32.mrf.mxu1 }
 0x177   :  { %v1967_v8 = vadd.f32 %v1966_v2, %v1954_v7  ;;  %v4124_v9 = vld [vmem:[#allocation4 + $0x70] sm:$0xf] }
 0x178   :  { %v4188_v7 = vld [vmem:[#allocation4 + $0xf0] sm:$0xf] }
 0x179   :  { %v1980_v10 = vadd.f32 %v1979_v3, %v1967_v8  ;;  %v4612_v8 = vld [vmem:[#allocation4 + $0xf4] sm:$0xf0] }
 0x17d   :  { %v1981_v17 = vpop.f32.mrf.mxu3 }
 0x17e   :  { %v1968_v16 = vpop.f32.mrf.mxu2 }
 0x17f   :  { %v4596_v16 = vld [vmem:[#allocation4 + $0x74] sm:$0xf0] }
 0x180   :  { %v4125_v17 = vor.u32 %v4596_v16, %v4124_v9  ;;  %v4220_v16 = vld [vmem:[#allocation4 + $0x130] sm:$0xf] }
 0x182   :  { %2684 = vmatpush.bf16.msrb.mxu0 %v4125_v17  ;;  %v4620_v17 = vld [vmem:[#allocation4 + $0x134] sm:$0xf0] }
 0x18d   :  { %v1992_v11 = vpop.f32.mrf.mxu0  ;;  %v2005_v14 = vpop.f32.mrf.mxu1 }
 0x18e   :  { %v1993_v15 = vadd.f32 %v1992_v11, %v1980_v10  ;;  %v4116_v10 = vld [vmem:[#allocation4 + $0x60] sm:$0xf] }
 0x190   :  { %v2006_v18 = vadd.f32 %v2005_v14, %v1993_v15  ;;  %v4189_v14 = vor.u32 %v4612_v8, %v4188_v7  ;;  %v4594_v15 = vld [vmem:[#allocation4 + $0x64] sm:$0xf0] }
 0x191   :  { %v4586_v8 = vld [vmem:[#allocation4 + $0x24] sm:$0xf0] }
 0x192   :  { %2697 = vmatpush.bf16.msrb.mxu1 %v4189_v14  ;;  %v4636_v14 = vld [vmem:[#allocation4 + $0x1b4] sm:$0xf0] }
 0x194   :  { %v2018_v19 = vpop.f32.mrf.mxu2 }
 0x195   :  { %v2019_v20 = vadd.f32 %v2018_v19, %v2006_v18  ;;  %v2031_v21 = vpop.f32.mrf.mxu3  ;;  %v1994_v42 = vpop.f32.mrf.mxu0  ;;  %v4180_v18 = vld [vmem:[#allocation4 + $0xe0] sm:$0xf]  ;;  %v4117_v19 = vor.u32 %v4594_v15, %v4116_v10  ;;  %v4284_v10 = vld [vmem:[#allocation4 + $0x1b0] sm:$0xf] }
 0x196   :  { %v2007_v44 = vpop.f32.mrf.mxu1  ;;  %v4628_v42 = vld [vmem:[#allocation4 + $0x174] sm:$0xf0] }
 0x197   :  { %v4914_v5 = vadd.f32 %v2031_v21, %v2019_v20  ;;  %v4610_v20 = vld [vmem:[#allocation4 + $0xe4] sm:$0xf0]  ;;  %v4252_v21 = vld [vmem:[#allocation4 + $0x170] sm:$0xf]  ;;  %2685 = vmatpush.bf16.msrb.mxu0 %v4117_v19 }
 0x198   :  { %v4181_v44 = vor.u32 %v4610_v20, %v4180_v18  ;;  %v4148_v18 = vld [vmem:[#allocation4 + $0xa0] sm:$0xf]  ;;  %v4602_v19 = vld [vmem:[#allocation4 + $0xa4] sm:$0xf0] }
 0x199   :  { %2130 = vmatmul.f32.vlgmr.msrb.gmra.mxu3 %v4914_v5  ;;  %v2044_v22 = vmul.f32 %v4914_v5, %v4914_v5  ;;  %v2039_v20 = vld [vmem:[%s5101_s3] sm:$0x1] }
 0x19a   :  { %2698 = vmatpush.bf16.msrb.mxu1 %v4181_v44 }
 0x19c   :  { %v2020_v56 = vpop.f32.mrf.mxu2 }
 0x19d   :  { %v2033_v12 = vpop.f32.mrf.mxu3  ;;  %v4253_v56 = vor.u32 %v4628_v42, %v4252_v21  ;;  %v4221_v42 = vor.u32 %v4620_v17, %v4220_v16  ;;  %v4614_v16 = vld [vmem:[#allocation4 + $0x104] sm:$0xf0] }
 0x19e   :  { %v4316_v12 = vld [vmem:[#allocation4 + $0x1f0] sm:$0xf] }
 0x19f   :  { %2710 = vmatpush.bf16.msrb.mxu2 %v4253_v56 }
 0x1a1   :  { %2133 = vmatmul.f32.gmra.mxu3 %v2044_v22  ;;  %v4644_v22 = vld [vmem:[#allocation4 + $0x1f4] sm:$0xf0] }
 0x1a4   :  { %v2062_v23 = vpop.f32.mrf.mxu2 }
 0x1a5   :  { %v2085_v24 = vpop.f32.mrf.mxu3 }
 0x1a6   :  { %v2086_v27 = vadd.f32 %v2085_v24, %v2062_v23  ;;  %v4108_v23 = vld [vmem:[#allocation4 + $0x50] sm:$0xf]  ;;  %v4317_v24 = vor.u32 %v4644_v22, %v4316_v12  ;;  %v4285_v12 = vor.u32 %v4636_v14, %v4284_v10  ;;  %v4630_v10 = vld [vmem:[#allocation4 + $0x184] sm:$0xf0]  ;;  %v4627_v14 = vld [vmem:[#allocation4 + $0x174] sm:$0xf] }
 0x1a7   :  { %v4076_v22 = vld [vmem:[#allocation4 + $0x10] sm:$0xf] }
 0x1a8   :  { %2723 = vmatpush.bf16.msrb.mxu3 %v4317_v24  ;;  %v4149_v24 = vor.u32 %v4602_v19, %v4148_v18  ;;  %v4254_v18 = vld [vmem:[#allocation4 + $0x178] sm:$0xf0]  ;;  %v4643_v19 = vld [vmem:[#allocation4 + $0x1f4] sm:$0xf] }
 0x1a9   :  { %v4257_v21 = vor.u32 %v4627_v14, %v4254_v18  ;;  %v4142_v14 = vld [vmem:[#allocation4 + $0x98] sm:$0xf0]  ;;  %v4214_v18 = vld [vmem:[#allocation4 + $0x128] sm:$0xf0] }
 0x1ac   :  { %v2065_v37 = vpop.f32.mrf.mxu2 }
 0x1ad   :  { %v2088_v40 = vpop.f32.mrf.mxu3 }
 0x1ae   :  { %v2089_v36 = vadd.f32 %v2088_v40, %v2065_v37  ;;  %v4592_v37 = vld [vmem:[#allocation4 + $0x54] sm:$0xf0] }
 0x1af   :  { %v4608_v40 = vld [vmem:[#allocation4 + $0xd4] sm:$0xf0] }
 0x1b0   :  { %v4173_v31 = vor.u32 %v4608_v40, %v4172_v25  ;;  %v4276_v25 = vld [vmem:[#allocation4 + $0x1a0] sm:$0xf]  ;;  %v4634_v40 = vld [vmem:[#allocation4 + $0x1a4] sm:$0xf0] }
 0x1b2   :  { %2699 = vmatpush.bf16.msrb.mxu1 %v4173_v31  ;;  %v4204_v31 = vld [vmem:[#allocation4 + $0x110] sm:$0xf] }
 0x1de   :  { %v2108_v26 = vpop.f32.mrf.mxu2 }
 0x1df   :  { %v2109_v13 = vadd.f32 %v2108_v26, %v2086_v27  ;;  %v4244_v26 = vld [vmem:[#allocation4 + $0x160] sm:$0xf] }
 0x1e0   :  { %v4308_v27 = vld [vmem:[#allocation4 + $0x1e0] sm:$0xf]  ;;  %v4245_v29 = vor.u32 %v4626_v6, %v4244_v26  ;;  %v4140_v6 = vld [vmem:[#allocation4 + $0x90] sm:$0xf] }
 0x1e2   :  { %2711 = vmatpush.bf16.msrb.mxu2 %v4245_v29 }
 0x1e6   :  { %v2111_v32 = vpop.f32.mrf.mxu2 }
 0x1e7   :  { %v2112_v41 = vadd.f32 %v2111_v32, %v2089_v36  ;;  %v4606_v36 = vld [vmem:[#allocation4 + $0xc4] sm:$0xf0] }
 0x21c   :  { %v2131_v30 = vpop.f32.mrf.mxu3 }
 0x21d   :  { %v2132_v28 = vadd.f32 %v2131_v30, %v2109_v13  ;;  %v4109_v13 = vor.u32 %v4592_v37, %v4108_v23  ;;  %v4642_v30 = vld [vmem:[#allocation4 + $0x1e4] sm:$0xf0]  ;;  %v4584_v37 = vld [vmem:[#allocation4 + $0x14] sm:$0xf0] }
 0x21e   :  { %v4309_v32 = vor.u32 %v4642_v30, %v4308_v27  ;;  %v4618_v23 = vld [vmem:[#allocation4 + $0x124] sm:$0xf0]  ;;  %v4600_v27 = vld [vmem:[#allocation4 + $0x94] sm:$0xf0]  ;;  %v2040_v30 = vld [vmem:[%s5102_s4] sm:$0x1] }
 0x21f   :  { %v2138_v33 = vsel %vm2137_vm0, %v2132_v28, 0.0  ;;  %v4100_v28 = vld [vmem:[#allocation4 + $0x40] sm:$0xf]  ;;  %2686 = vmatpush.bf16.msrb.mxu0 %v4109_v13 }
 0x220   :  { %v2139_v35 = vrot.slane %v2138_v33, 4  ;;  %2724 = vmatpush.bf16.msrb.mxu3 %v4309_v32  ;;  %v4616_v32 = vld [vmem:[#allocation4 + $0x114] sm:$0xf0] }
 0x222   :  { %v2140_v39 = vadd.f32 %v2139_v35, %v2138_v33  ;;  %v4590_v33 = vld [vmem:[#allocation4 + $0x44] sm:$0xf0]  ;;  %v4164_v35 = vld [vmem:[#allocation4 + $0xc0] sm:$0xf] }
 0x223   :  { %v4101_v49 = vor.u32 %v4590_v33, %v4100_v28  ;;  %v4077_v28 = vor.u32 %v4584_v37, %v4076_v22  ;;  %v4277_v33 = vor.u32 %v4634_v40, %v4276_v25  ;;  %v4246_v37 = vld [vmem:[#allocation4 + $0x168] sm:$0xf0]  ;;  %v4641_v25 = vld [vmem:[#allocation4 + $0x1e4] sm:$0xf] }
 0x224   :  { %v2141_v45 = vrot.slane %v2140_v39, 2  ;;  %v2134_v46 = vpop.f32.mrf.mxu3 }
 0x225   :  { %v2135_v47 = vadd.f32 %v2134_v46, %v2112_v41  ;;  %v4624_v41 = vld [vmem:[#allocation4 + $0x154] sm:$0xf0]  ;;  %2687 = vmatpush.bf16.msrb.mxu0 %v4101_v49  ;;  %v4126_v49 = vld [vmem:[#allocation4 + $0x78] sm:$0xf0] }
 0x226   :  { %v2142_v48 = vadd.f32 %v2141_v45, %v2140_v39  ;;  %v4236_v39 = vld [vmem:[#allocation4 + $0x150] sm:$0xf]  ;;  %v4640_v45 = vld [vmem:[#allocation4 + $0x1d4] sm:$0xf0] }
 0x227   :  { %v2154_v50 = vsel %vm2137_vm0, %v2135_v47, 0.0  ;;  %v4237_v47 = vor.u32 %v4624_v41, %v4236_v39  ;;  %v4068_v39 = vld [vmem:[#allocation4] sm:$0xf]  ;;  %v4582_v41 = vld [vmem:[#allocation4 + $0x4] sm:$0xf0] }
 0x228   :  { %v2143_v51 = vrot.slane %v2142_v48, 1  ;;  %v2155_v52 = vrot.slane %v2154_v50, 4 }
 0x229   :  { %2712 = vmatpush.bf16.msrb.mxu2 %v4237_v47  ;;  %v4595_v47 = vld [vmem:[#allocation4 + $0x74] sm:$0xf] }
 0x22a   :  { %v2144_v53 = vadd.f32 %v2143_v51, %v2142_v48  ;;  %v2156_v54 = vadd.f32 %v2155_v52, %v2154_v50  ;;  %v4301_v50 = vor.u32 %v4640_v45, %v4300_v43  ;;  %v4092_v51 = vld [vmem:[#allocation4 + $0x30] sm:$0xf]  ;;  %v4228_v52 = vld [vmem:[#allocation4 + $0x140] sm:$0xf] }
 0x22b   :  { %v4132_v45 = vld [vmem:[#allocation4 + $0x80] sm:$0xf] }
 0x22c   :  { %v2157_v58 = vrot.slane %v2156_v54, 2  ;;  %v2152_v59 = vmul.f32 %v4921_v55, %v2144_v53  ;;  %v4622_v53 = vld [vmem:[#allocation4 + $0x144] sm:$0xf0]  ;;  %2725 = vmatpush.bf16.msrb.mxu3 %v4301_v50  ;;  %v4611_v50 = vld [vmem:[#allocation4 + $0xf4] sm:$0xf] }
 0x22e   :  { %v2158_v60 = vadd.f32 %v2157_v58, %v2156_v54  ;;  %v4924_v62 = vmul.f32 0.015625, %v2152_v59  ;;  %v4165_v54 = vor.u32 %v4606_v36, %v4164_v35  ;;  %v4588_v58 = vld [vmem:[#allocation4 + $0x34] sm:$0xf0]  ;;  %v4292_v59 = vld [vmem:[#allocation4 + $0x1c0] sm:$0xf]  ;;  %v4141_v36 = vor.u32 %v4600_v27, %v4140_v6 }
 0x22f   :  { %v4589_v27 = vld [vmem:[#allocation4 + $0x44] sm:$0xf] }
 0x230   :  { %v2159_v61 = vrot.slane %v2158_v60, 1  ;;  %v2163_v1 = vmul.f32 %v4924_v62, %v4924_v62  ;;  %2700 = vmatpush.bf16.msrb.mxu1 %v4165_v54  ;;  %v4069_v54 = vor.u32 %v4582_v41, %v4068_v39  ;;  %v4302_v39 = vld [vmem:[#allocation4 + $0x1d8] sm:$0xf0] }
 0x232   :  { %v2160_v63 = vadd.f32 %v2159_v61, %v2158_v60  ;;  %v4638_v60 = vld [vmem:[#allocation4 + $0x1c4] sm:$0xf0] }
 0x233   :  { %v4293_v9 = vor.u32 %v4638_v60, %v4292_v59  ;;  %v4129_v60 = vor.u32 %v4595_v47, %v4126_v49 }
 0x234   :  { %v2161_v0 = vmul.f32 %v2160_v63, %v4921_v55  ;;  %v4156_v63 = vld [vmem:[#allocation4 + $0xb0] sm:$0xf] }
 0x235   :  { %2726 = vmatpush.bf16.msrb.mxu3 %v4293_v9  ;;  %v4196_v9 = vld [vmem:[#allocation4 + $0x100] sm:$0xf] }
 0x236   :  { %v2162_v2 = vmul.f32 0.015625, %v2161_v0  ;;  %v4604_v0 = vld [vmem:[#allocation4 + $0xb4] sm:$0xf0] }
 0x237   :  { %v4157_v7 = vor.u32 %v4604_v0, %v4156_v63  ;;  %v4593_v0 = vld [vmem:[#allocation4 + $0x64] sm:$0xf] }
 0x238   :  { %v2164_v3 = vsub.f32 %v2162_v2, %v2163_v1  ;;  %v4229_v1 = vor.u32 %v4622_v53, %v4228_v52  ;;  %v4084_v2 = vld [vmem:[#allocation4 + $0x20] sm:$0xf]  ;;  %v4268_v53 = vld [vmem:[#allocation4 + $0x190] sm:$0xf] }
 0x239   :  { %v4085_v56 = vor.u32 %v4586_v8, %v4084_v2  ;;  %2701 = vmatpush.bf16.msrb.mxu1 %v4157_v7  ;;  %2727 = vmatpush.bf16.msrb.mxu3 %v4285_v12  ;;  %v4609_v2 = vld [vmem:[#allocation4 + $0xe4] sm:$0xf]  ;;  %v4197_v7 = vor.u32 %v4614_v16, %v4196_v9  ;;  %v4260_v8 = vld [vmem:[#allocation4 + $0x180] sm:$0xf]  ;;  %v4607_v12 = vld [vmem:[#allocation4 + $0xd4] sm:$0xf] }
 0x23a   :  { %v2165_v4 = vmax.f32 %v2164_v3, 0.0  ;;  %2713 = vmatpush.bf16.msrb.mxu2 %v4229_v1  ;;  %v4118_v1 = vld [vmem:[#allocation4 + $0x68] sm:$0xf0]  ;;  %v4286_v9 = vld [vmem:[#allocation4 + $0x1b8] sm:$0xf0] }
 0x23c   :  { %v4929_v11 = vadd.f32 1e-05, %v2165_v4  ;;  %v4093_v4 = vor.u32 %v4588_v58, %v4092_v51  ;;  %v4190_v51 = vld [vmem:[#allocation4 + $0xf8] sm:$0xf0] }
 0x23d   :  { %2702 = vmatpush.bf16.msrb.mxu1 %v4149_v24  ;;  %2728 = vmatpush.bf16.msrb.mxu3 %v4277_v33  ;;  %v4625_v24 = vld [vmem:[#allocation4 + $0x164] sm:$0xf] }
 0x23e   :  { %4654 = vrsqrt.f32 %v4929_v11  ;;  %vm2173_vm3 = vweird.f32 %v4929_v11  ;;  %2688 = vmatpush.bf16.msrb.mxu0 %v4093_v4  ;;  %2714 = vmatpush.bf16.msrb.mxu2 %v4221_v42  ;;  %v4182_v4 = vld [vmem:[#allocation4 + $0xe8] sm:$0xf0]  ;;  %v4249_v40 = vor.u32 %v4625_v24, %v4246_v37  ;;  %v4615_v37 = vld [vmem:[#allocation4 + $0x114] sm:$0xf] }
 0x23f   :  { %v4185_v17 = vor.u32 %v4609_v2, %v4182_v4  ;;  %v4222_v2 = vld [vmem:[#allocation4 + $0x138] sm:$0xf0] }
 0x241   :  { %2703 = vmatpush.bf16.msrb.mxu1 %v4141_v36 }
 0x242   :  { %2689 = vmatpush.bf16.msrb.mxu0 %v4085_v56  ;;  %v4110_v56 = vld [vmem:[#allocation4 + $0x58] sm:$0xf0] }
 0x244   :  { %v4655_v46 = vpop.eup %4654 }
 0x245   :  { %v2168_v48 = vmul.f32 %v4655_v46, %v4929_v11  ;;  %vm2174_vm2 = vweird.f32 %v4655_v46  ;;  %v4212_v11 = vld [vmem:[#allocation4 + $0x120] sm:$0xf] }
 0x246   :  { %vm4938_vm4 = vmor %vm2173_vm3, %vm2174_vm2  ;;  %v4213_v29 = vor.u32 %v4618_v23, %v4212_v11  ;;  %2690 = vmatpush.bf16.msrb.mxu0 %v4077_v28  ;;  %v4174_v11 = vld [vmem:[#allocation4 + $0xd8] sm:$0xf0]  ;;  %v4166_v28 = vld [vmem:[#allocation4 + $0xc8] sm:$0xf0]  ;;  %vm3030_vm3 = vcmask 7168  }
 0x247   :  { %v2169_v61 = vmul.f32 %v4655_v46, %v2168_v48  ;;  %v4205_v48 = vor.u32 %v4616_v32, %v4204_v31  ;;  %v4177_v23 = vor.u32 %v4607_v12, %v4174_v11  ;;  %v4623_v31 = vld [vmem:[#allocation4 + $0x154] sm:$0xf]  ;;  %v4238_v32 = vld [vmem:[#allocation4 + $0x158] sm:$0xf0]  ;;  %v4070_v12 = vld [vmem:[#allocation4 + $0x8] sm:$0xf0] }
 0x248   :  { %2715 = vmatpush.bf16.msrb.mxu2 %v4213_v29  ;;  %v4605_v29 = vld [vmem:[#allocation4 + $0xc4] sm:$0xf]  ;;  %v4241_v36 = vor.u32 %v4623_v31, %v4238_v32  ;;  %v4134_v11 = vld [vmem:[#allocation4 + $0x88] sm:$0xf0] }
 0x249   :  { %v2170_v3 = vmul.f32 0.5, %v2169_v61  ;;  %v4193_v61 = vor.u32 %v4611_v50, %v4190_v51  ;;  %v4169_v33 = vor.u32 %v4605_v29, %v4166_v28  ;;  %v4621_v50 = vld [vmem:[#allocation4 + $0x144] sm:$0xf]  ;;  %v4230_v51 = vld [vmem:[#allocation4 + $0x148] sm:$0xf0] }
 0x24a   :  { %2691 = vmatpush.bf16.msrb.mxu0 %v4069_v54  ;;  %v4585_v54 = vld [vmem:[#allocation4 + $0x24] sm:$0xf]  ;;  %v4198_v29 = vld [vmem:[#allocation4 + $0x108] sm:$0xf0] }
 0x24b   :  { %v2171_v15 = vsub.f32 1.5, %v2170_v3  ;;  %v4121_v3 = vor.u32 %v4593_v0, %v4118_v1  ;;  %v4619_v1 = vld [vmem:[#allocation4 + $0x134] sm:$0xf] }
 0x24c   :  { %2716 = vmatpush.bf16.msrb.mxu2 %v4205_v48  ;;  %v4158_v48 = vld [vmem:[#allocation4 + $0xb8] sm:$0xf0]  ;;  %v4225_v4 = vor.u32 %v4619_v1, %v4222_v2 }
 0x24d   :  { %v2172_v44 = vmul.f32 %v4655_v46, %v2171_v15  ;;  %v4261_v15 = vor.u32 %v4630_v10, %v4260_v8  ;;  %v4599_v8 = vld [vmem:[#allocation4 + $0x94] sm:$0xf] }
 0x24f   :  { %v2176_v26 = vsel %vm4938_vm4, %v4655_v46, %v2172_v44  ;;  %v4598_v46 = vld [vmem:[#allocation4 + $0x84] sm:$0xf0]  ;;  %v4591_v44 = vld [vmem:[#allocation4 + $0x54] sm:$0xf] }
 0x250   :  { %v2177_v13 = vmul.f32 %v2176_v26, %v2039_v20  ;;  %v4133_v58 = vor.u32 %v4598_v46, %v4132_v45  ;;  %v4318_v20 = vld [vmem:[#allocation4 + $0x1f8] sm:$0xf0]  ;;  %2717 = vmatpush.bf16.msrb.mxu2 %v4197_v7  ;;  %v4113_v22 = vor.u32 %v4591_v44, %v4110_v56  ;;  %v4310_v26 = vld [vmem:[#allocation4 + $0x1e8] sm:$0xf0]  ;;  %v4603_v46 = vld [vmem:[#allocation4 + $0xb4] sm:$0xf] }
 0x251   :  { %v4321_v42 = vor.u32 %v4643_v19, %v4318_v20  ;;  %v4313_v6 = vor.u32 %v4641_v25, %v4310_v26  ;;  %v4094_v45 = vld [vmem:[#allocation4 + $0x38] sm:$0xf0]  ;;  %v4161_v49 = vor.u32 %v4603_v46, %v4158_v48  ;;  %v4145_v19 = vor.u32 %v4599_v8, %v4142_v14  ;;  %v4581_v44 = vld [vmem:[#allocation4 + $0x4] sm:$0xf]  ;;  %v2789_v8 = vld [vmem:[%s5104_s6 + $0x8] sm:$0xff] }
 0x252   :  { %v2178_v35 = vmul.f32 %v2177_v13, %v4924_v62  ;;  %v4632_v62 = vld [vmem:[#allocation4 + $0x194] sm:$0xf0]  ;;  %2704 = vmatpush.bf16.msrb.mxu1 %v4133_v58  ;;  %v4086_v58 = vld [vmem:[#allocation4 + $0x28] sm:$0xf0]  ;;  %v4078_v7 = vld [vmem:[#allocation4 + $0x18] sm:$0xf0] }
 0x253   :  { %v4269_v63 = vor.u32 %v4632_v62, %v4268_v53  ;;  %v4233_v53 = vor.u32 %v4621_v50, %v4230_v51  ;;  %v4294_v62 = vld [vmem:[#allocation4 + $0x1c8] sm:$0xf0]  ;;  %v4206_v25 = vld [vmem:[#allocation4 + $0x118] sm:$0xf0] }
 0x254   :  { %v2179_v43 = vsub.f32 %v2040_v30, %v2178_v35  ;;  %v4639_v35 = vld [vmem:[#allocation4 + $0x1d4] sm:$0xf]  ;;  %v4270_v26 = vld [vmem:[#allocation4 + $0x198] sm:$0xf0] }
 0x255   :  { %2729 = vmatpush.bf16.msrb.mxu3 %v4269_v63  ;;  %v4305_v41 = vor.u32 %v4639_v35, %v4302_v39  ;;  %v4150_v63 = vld [vmem:[#allocation4 + $0xa8] sm:$0xf0] }
 0x256   :  { %v2181_v52 = vperm.slane %v2179_v43, 0  ;;  %v4587_v43 = vld [vmem:[#allocation4 + $0x34] sm:$0xf] }
 0x257   :  { %v4097_v47 = vor.u32 %v4587_v43, %v4094_v45 }
 0x258   :  { %v2184_v59 = vsel %vm2183_vm5, %v2177_v13, %v2181_v52  ;;  %v4102_v13 = vld [vmem:[#allocation4 + $0x48] sm:$0xf0]  ;;  %v4637_v52 = vld [vmem:[#allocation4 + $0x1c4] sm:$0xf] }
 0x259   :  { %4062 = vmatmul.msk.f32.vlgmr.msra.gmra.mxu0 %vm2137_vm0, %v2184_v59  ;;  %4063 = vmatmul.msk.f32.vlgmr.msra.gmra.mxu1 %vm2137_vm0, %v2184_v59  ;;  %v4105_v30 = vor.u32 %v4589_v27, %v4102_v13  ;;  %v4613_v13 = vld [vmem:[#allocation4 + $0x104] sm:$0xf] }
 0x25a   :  { %4064 = vmatmul.msk.f32.vlgmr.msra.gmra.mxu2 %vm2137_vm0, %v2184_v59  ;;  %4065 = vmatmul.msk.f32.vlgmr.msra.gmra.mxu3 %vm2137_vm0, %v2184_v59  ;;  %v4297_v59 = vor.u32 %v4637_v52, %v4294_v62  ;;  %v4201_v28 = vor.u32 %v4613_v13, %v4198_v29 }
 0x25b   :  { %2736 = vmatpush.bf16.msra.mxu0 %v4129_v60  ;;  %2749 = vmatpush.bf16.msra.mxu1 %v4193_v61  ;;  %v4089_v60 = vor.u32 %v4585_v54, %v4086_v58  ;;  %v4601_v61 = vld [vmem:[#allocation4 + $0xa4] sm:$0xf] }
 0x25c   :  { %2730 = vmatpush.bf16.msrb.mxu3 %v4261_v15  ;;  %2762 = vmatpush.bf16.msra.mxu2 %v4257_v21  ;;  %v4153_v0 = vor.u32 %v4601_v61, %v4150_v63  ;;  %v4617_v15 = vld [vmem:[#allocation4 + $0x124] sm:$0xf] }
 0x25d   :  { %v4217_v20 = vor.u32 %v4617_v15, %v4214_v18  ;;  %v4633_v21 = vld [vmem:[#allocation4 + $0x1a4] sm:$0xf] }
 0x25f   :  { %2737 = vmatpush.bf16.msra.mxu0 %v4121_v3  ;;  %2750 = vmatpush.bf16.msra.mxu1 %v4185_v17  ;;  %v4635_v3 = vld [vmem:[#allocation4 + $0x1b4] sm:$0xf] }
 0x260   :  { %2775 = vmatpush.bf16.msra.mxu3 %v4321_v42  ;;  %2763 = vmatpush.bf16.msra.mxu2 %v4249_v40  ;;  %v4289_v16 = vor.u32 %v4635_v3, %v4286_v9  ;;  %v4583_v17 = vld [vmem:[#allocation4 + $0x14] sm:$0xf]  ;;  %v4278_v42 = vld [vmem:[#allocation4 + $0x1a8] sm:$0xf0] }
 0x261   :  { %v4081_v10 = vor.u32 %v4583_v17, %v4078_v7  ;;  %v4281_v56 = vor.u32 %v4633_v21, %v4278_v42  ;;  %v4631_v40 = vld [vmem:[#allocation4 + $0x194] sm:$0xf]  ;;  %v2791_v7 = vld [vmem:[%s5104_s6 + $0x18] sm:$0xff] }
 0x262   :  { %v4273_v27 = vor.u32 %v4631_v40, %v4270_v26 }
 0x263   :  { %2738 = vmatpush.bf16.msra.mxu0 %v4113_v22  ;;  %2751 = vmatpush.bf16.msra.mxu1 %v4177_v23  ;;  %v4597_v22 = vld [vmem:[#allocation4 + $0x84] sm:$0xf]  ;;  %v4073_v23 = vor.u32 %v4581_v44, %v4070_v12 }
 0x264   :  { %2776 = vmatpush.bf16.msra.mxu3 %v4313_v6  ;;  %2764 = vmatpush.bf16.msra.mxu2 %v4241_v36  ;;  %v4137_v24 = vor.u32 %v4597_v22, %v4134_v11  ;;  %v4209_v6 = vor.u32 %v4615_v37, %v4206_v25 }
 0x267   :  { %2739 = vmatpush.bf16.msra.mxu0 %v4105_v30  ;;  %2752 = vmatpush.bf16.msra.mxu1 %v4169_v33  ;;  %v4629_v30 = vld [vmem:[#allocation4 + $0x184] sm:$0xf]  ;;  %v4262_v33 = vld [vmem:[#allocation4 + $0x188] sm:$0xf0] }
 0x268   :  { %2777 = vmatpush.bf16.msra.mxu3 %v4305_v41  ;;  %2765 = vmatpush.bf16.msra.mxu2 %v4233_v53  ;;  %v4265_v31 = vor.u32 %v4629_v30, %v4262_v33 }
 0x26b   :  { %2740 = vmatpush.bf16.msra.mxu0 %v4097_v47  ;;  %2753 = vmatpush.bf16.msra.mxu1 %v4161_v49 }
 0x26c   :  { %2778 = vmatpush.bf16.msra.mxu3 %v4297_v59  ;;  %2766 = vmatpush.bf16.msra.mxu2 %v4225_v4 }
 0x26f   :  { %2741 = vmatpush.bf16.msra.mxu0 %v4089_v60  ;;  %2754 = vmatpush.bf16.msra.mxu1 %v4153_v0 }
 0x270   :  { %2779 = vmatpush.bf16.msra.mxu3 %v4289_v16  ;;  %2767 = vmatpush.bf16.msra.mxu2 %v4217_v20 }
 0x273   :  { %2742 = vmatpush.bf16.msra.mxu0 %v4081_v10  ;;  %2755 = vmatpush.bf16.msra.mxu1 %v4145_v19 }
 0x274   :  { %2780 = vmatpush.bf16.msra.mxu3 %v4281_v56  ;;  %2768 = vmatpush.bf16.msra.mxu2 %v4209_v6 }
 0x277   :  { %2743 = vmatpush.bf16.msra.mxu0 %v4073_v23  ;;  %2756 = vmatpush.bf16.msra.mxu1 %v4137_v24 }
 0x278   :  { %2781 = vmatpush.bf16.msra.mxu3 %v4273_v27  ;;  %2769 = vmatpush.bf16.msra.mxu2 %v4201_v28 }
 0x27c   :  { %2782 = vmatpush.bf16.msra.mxu3 %v4265_v31 }
 0x2d6   :  { %v2205_v32 = vpop.f32.mrf.mxu0  ;;  %v2225_v35 = vpop.f32.mrf.mxu1 }
 0x2d7   :  { %v2268_v36 = vperm.slane %v2205_v32, 0  ;;  %v2269_v39 = vperm.slane %v2225_v35, 0  ;;  %v2276_v43 = vperm.slane %v2205_v32, 1  ;;  %v2277_v46 = vperm.slane %v2225_v35, 1 }
 0x2d9   :  { %v2272_v41 = vmul.f32 %v2268_v36, %v4893_v34  ;;  %v2273_v45 = vmul.f32 %v2269_v39, %v4895_v38 }
 0x2db   :  { %v2280_v47 = vadd.f32 %v2276_v43, %v2272_v41  ;;  %v2281_v48 = vadd.f32 %v2277_v46, %v2273_v45 }
 0x2dd   :  { %vm2284_vm6 = vcmp.ge.f32.partialorder %v2280_v47, 0.0  ;;  %v2288_v49 = vmul.f32 0.01, %v2280_v47  ;;  %vm2285_vm7 = vcmp.ge.f32.partialorder %v2281_v48, 0.0  ;;  %v2289_v50 = vmul.f32 0.01, %v2281_v48  ;;  %v2245_v51 = vpop.f32.mrf.mxu2  ;;  %v2265_v52 = vpop.f32.mrf.mxu3 }
 0x2de   :  { %v2270_v53 = vperm.slane %v2245_v51, 0  ;;  %v2271_v62 = vperm.slane %v2265_v52, 0  ;;  %v2278_v54 = vperm.slane %v2245_v51, 1  ;;  %v2279_v58 = vperm.slane %v2265_v52, 1 }
 0x2df   :  { %v2292_v59 = vsel %vm2284_vm6, %v2280_v47, %v2288_v49  ;;  %v2293_v60 = vsel %vm2285_vm7, %v2281_v48, %v2289_v50 }
 0x2e0   :  { %v2274_v34 = vmul.f32 %v2270_v53, %v4906_v57  ;;  %v2275_v61 = vmul.f32 %v2271_v62, %v4914_v5  ;;  %v2360_v38 = vpack.c.bf16 %v2292_v59, %v2292_v59  ;;  %v2361_v63 = vpack.c.bf16 %v2293_v60, %v2293_v60  ;;  %v2790_v57 = vld [vmem:[%s5104_s6 + $0x10] sm:$0xff]  ;;  %v2788_v5 = vld [vmem:[%s5104_s6] sm:$0xff] }
 0x2e2   :  { %v2282_v0 = vadd.f32 %v2278_v54, %v2274_v34  ;;  %v2283_v1 = vadd.f32 %v2279_v58, %v2275_v61  ;;  %2692 = vmatmul.bf16.vlgmr.msrb.gmra.mxu0 %v2360_v38  ;;  %2705 = vmatmul.bf16.vlgmr.msrb.gmra.mxu1 %v2361_v63 }
 0x2e3   :  { %2810 = vmatpush.xpose.msrb.mxu0 %v2790_v57  ;;  %2833 = vmatpush.xpose.msrb.mxu1 %v2791_v7 }
 0x2e4   :  { %vm2286_vm8 = vcmp.ge.f32.partialorder %v2282_v0, 0.0  ;;  %v2290_v2 = vmul.f32 0.01, %v2282_v0  ;;  %vm2287_vm9 = vcmp.ge.f32.partialorder %v2283_v1, 0.0  ;;  %v2291_v3 = vmul.f32 0.01, %v2283_v1 }
 0x2e6   :  { %v2294_v4 = vsel %vm2286_vm8, %v2282_v0, %v2290_v2  ;;  %v2295_v9 = vsel %vm2287_vm9, %v2283_v1, %v2291_v3  ;;  %v2970_v0 = vld [vmem:[%s5107_s9 + $0xf8] sm:$0xff]  ;;  %v2953_v1 = vld [vmem:[%s5107_s9 + $0x70] sm:$0xff]  ;;  %v2952_v3 = vld [vmem:[%s5107_s9 + $0x68] sm:$0xff] }
 0x2e7   :  { %v2362_v16 = vpack.c.bf16 %v2294_v4, %v2294_v4  ;;  %v2363_v17 = vpack.c.bf16 %v2295_v9, %v2295_v9  ;;  %2811 = vmatpush.xpose.msrb.mxu0 %v2788_v5  ;;  %2834 = vmatpush.xpose.msrb.mxu1 %v2789_v8  ;;  %v2968_v4 = vld [vmem:[%s5107_s9 + $0xe8] sm:$0xff] }
 0x2e9   :  { %2718 = vmatmul.bf16.vlgmr.msrb.gmra.mxu2 %v2362_v16  ;;  %2731 = vmatmul.bf16.vlgmr.msrb.gmra.mxu3 %v2363_v17 }
 0x2ea   :  { %2899 = vmatpush.msrb.mxu2 %v2790_v57  ;;  %2919 = vmatpush.msrb.mxu3 %v2791_v7  ;;  %v2950_v57 = vld [vmem:[%s5107_s9 + $0x58] sm:$0xff]  ;;  %v2949_v7 = vld [vmem:[%s5107_s9 + $0x50] sm:$0xff] }
 0x2ec   :  { %2900 = vmatpush.msrb.mxu2 %v2788_v5  ;;  %2920 = vmatpush.msrb.mxu3 %v2789_v8  ;;  %v2966_v5 = vld [vmem:[%s5107_s9 + $0xd8] sm:$0xff]  ;;  %v2965_v8 = vld [vmem:[%s5107_s9 + $0xd0] sm:$0xff] }
 0x2f2   :  { %2744 = vmatmul.bf16.vlgmr.msra.gmra.mxu0 %v2360_v38  ;;  %2757 = vmatmul.bf16.vlgmr.msra.gmra.mxu1 %v2361_v63  ;;  %v2954_v63 = vld [vmem:[%s5107_s9 + $0x78] sm:$0xff] }
 0x2f3   :  { %2971 = vmatpush.msra.mxu0 %v2954_v63  ;;  %2991 = vmatpush.msra.mxu1 %v2970_v0 }
 0x2f5   :  { %2972 = vmatpush.msra.mxu0 %v2953_v1 }
 0x2f7   :  { %2973 = vmatpush.msra.mxu0 %v2952_v3 }
 0x2f9   :  { %2770 = vmatmul.bf16.vlgmr.msra.gmra.mxu2 %v2362_v16  ;;  %2783 = vmatmul.bf16.vlgmr.msra.gmra.mxu3 %v2363_v17  ;;  %v2951_v16 = vld [vmem:[%s5107_s9 + $0x60] sm:$0xff] }
 0x2fa   :  { %v2967_v17 = vld [vmem:[%s5107_s9 + $0xe0] sm:$0xff]  ;;  %2974 = vmatpush.msra.mxu0 %v2951_v16 }
 0x2fc   :  { %2975 = vmatpush.msra.mxu0 %v2950_v57 }
 0x2fe   :  { %2976 = vmatpush.msra.mxu0 %v2949_v7 }
 0x35f   :  { %v2693_v10 = vpop.f32.mrf.mxu0  ;;  %v2706_v14 = vpop.f32.mrf.mxu1 }
 0x360   :  { %v2707_v19 = vadd.f32 %v2706_v14, %v2693_v10  ;;  %v2948_v10 = vld [vmem:[%s5107_s9 + $0x48] sm:$0xff] }
 0x361   :  { %v2964_v14 = vld [vmem:[%s5107_s9 + $0xc8] sm:$0xff]  ;;  %2977 = vmatpush.msra.mxu0 %v2948_v10 }
 0x367   :  { %v2695_v15 = vpop.f32.mrf.mxu0  ;;  %v2708_v18 = vpop.f32.mrf.mxu1 }
 0x36c   :  { %v2719_v20 = vpop.f32.mrf.mxu2  ;;  %v2732_v21 = vpop.f32.mrf.mxu3 }
 0x36d   :  { %v2720_v42 = vadd.f32 %v2719_v20, %v2707_v19  ;;  %v2947_v19 = vld [vmem:[%s5107_s9 + $0x40] sm:$0xff] }
 0x36e   :  { %v2963_v20 = vld [vmem:[%s5107_s9 + $0xc0] sm:$0xff]  ;;  %2978 = vmatpush.msra.mxu0 %v2947_v19 }
 0x36f   :  { %v4969_v44 = vadd.f32 %v2732_v21, %v2720_v42  ;;  %v2745_v56 = vpop.f32.mrf.mxu0  ;;  %v2758_v12 = vpop.f32.mrf.mxu1  ;;  %v2946_v42 = vld [vmem:[%s5107_s9 + $0x38] sm:$0xff] }
 0x370   :  { %v2759_v25 = vadd.f32 %v2758_v12, %v2745_v56  ;;  %v2962_v56 = vld [vmem:[%s5107_s9 + $0xb8] sm:$0xff]  ;;  %2979 = vmatpush.msra.mxu0 %v2946_v42 }
 0x371   :  { %2812 = vmatmul.f32.vlgmr.msrb.gmra.mxu0 %v4969_v44  ;;  %v2794_v37 = vmul.f32 %v4969_v44, %v4969_v44 }
 0x374   :  { %v2721_v22 = vpop.f32.mrf.mxu2  ;;  %v2734_v11 = vpop.f32.mrf.mxu3 }
 0x375   :  { %v2945_v22 = vld [vmem:[%s5107_s9 + $0x30] sm:$0xff] }
 0x376   :  { %v2961_v11 = vld [vmem:[%s5107_s9 + $0xb0] sm:$0xff]  ;;  %2980 = vmatpush.msra.mxu0 %v2945_v22 }
 0x377   :  { %v2747_v23 = vpop.f32.mrf.mxu0  ;;  %v2760_v24 = vpop.f32.mrf.mxu1 }
 0x378   :  { %v2944_v24 = vld [vmem:[%s5107_s9 + $0x28] sm:$0xff] }
 0x379   :  { %2815 = vmatmul.f32.gmra.mxu0 %v2794_v37  ;;  %v2960_v37 = vld [vmem:[%s5107_s9 + $0xa8] sm:$0xff] }
 0x37a   :  { %2981 = vmatpush.msra.mxu0 %v2944_v24 }
 0x37c   :  { %v2771_v40 = vpop.f32.mrf.mxu2  ;;  %v2784_v26 = vpop.f32.mrf.mxu3 }
 0x37d   :  { %v2772_v6 = vadd.f32 %v2771_v40, %v2759_v25  ;;  %v2792_v25 = vld [vmem:[%s5105_s7] sm:$0x1] }
 0x37f   :  { %v4974_v27 = vadd.f32 %v2784_v26, %v2772_v6 }
 0x381   :  { %2835 = vmatmul.f32.vlgmr.msrb.gmra.mxu1 %v4974_v27  ;;  %v2795_v30 = vmul.f32 %v4974_v27, %v4974_v27 }
 0x384   :  { %v2773_v13 = vpop.f32.mrf.mxu2  ;;  %v2786_v29 = vpop.f32.mrf.mxu3 }
 0x385   :  { %v2793_v13 = vld [vmem:[%s5106_s8] sm:$0x1] }
 0x389   :  { %2838 = vmatmul.f32.gmra.mxu1 %v2795_v30 }
 0x3ee   :  { %v2813_v28 = vpop.f32.mrf.mxu0 }
 0x3f6   :  { %v2816_v39 = vpop.f32.mrf.mxu0 }
 0x3fe   :  { %v2836_v33 = vpop.f32.mrf.mxu1 }
 0x3ff   :  { %v2837_v31 = vadd.f32 %v2836_v33, %v2813_v28 }
 0x401   :  { %v2843_v32 = vsel %vm2842_vm10, %v2837_v31, 0.0  ;;  %v2943_v31 = vld [vmem:[%s5107_s9 + $0x20] sm:$0xff] }
 0x402   :  { %v2844_v35 = vrot.slane %v2843_v32, 4  ;;  %2982 = vmatpush.msra.mxu0 %v2943_v31 }
 0x404   :  { %v2845_v36 = vadd.f32 %v2844_v35, %v2843_v32  ;;  %v2959_v32 = vld [vmem:[%s5107_s9 + $0xa0] sm:$0xff]  ;;  %v2942_v35 = vld [vmem:[%s5107_s9 + $0x18] sm:$0xff] }
 0x405   :  { %2983 = vmatpush.msra.mxu0 %v2942_v35 }
 0x406   :  { %v2846_v41 = vrot.slane %v2845_v36, 2  ;;  %v2839_v43 = vpop.f32.mrf.mxu1 }
 0x407   :  { %v2840_v45 = vadd.f32 %v2839_v43, %v2816_v39  ;;  %v2941_v39 = vld [vmem:[%s5107_s9 + $0x10] sm:$0xff]  ;;  %v2940_v43 = vld [vmem:[%s5107_s9 + $0x8] sm:$0xff] }
 0x408   :  { %v2847_v46 = vadd.f32 %v2846_v41, %v2845_v36  ;;  %v2958_v36 = vld [vmem:[%s5107_s9 + $0x98] sm:$0xff]  ;;  %v2957_v41 = vld [vmem:[%s5107_s9 + $0x90] sm:$0xff]  ;;  %2984 = vmatpush.msra.mxu0 %v2941_v39 }
 0x409   :  { %v2852_v47 = vsel %vm2842_vm10, %v2840_v45, 0.0  ;;  %v2956_v45 = vld [vmem:[%s5107_s9 + $0x88] sm:$0xff] }
 0x40a   :  { %v2848_v48 = vrot.slane %v2847_v46, 1  ;;  %v2853_v49 = vrot.slane %v2852_v47, 4  ;;  %2985 = vmatpush.msra.mxu0 %v2940_v43 }
 0x40c   :  { %v2849_v50 = vadd.f32 %v2848_v48, %v2847_v46  ;;  %v2854_v51 = vadd.f32 %v2853_v49, %v2852_v47  ;;  %v2939_v46 = vld [vmem:[%s5107_s9] sm:$0xff] }
 0x40d   :  { %v2955_v47 = vld [vmem:[%s5107_s9 + $0x80] sm:$0xff]  ;;  %2986 = vmatpush.msra.mxu0 %v2939_v46 }
 0x40e   :  { %v2855_v52 = vrot.slane %v2854_v51, 2  ;;  %v2850_v53 = vmul.f32 %v2849_v50, %v4921_v55 }
 0x410   :  { %v2856_v62 = vadd.f32 %v2855_v52, %v2854_v51  ;;  %v4982_v58 = vmul.f32 0.0625, %v2850_v53 }
 0x412   :  { %v2857_v54 = vrot.slane %v2856_v62, 1  ;;  %v2861_v34 = vmul.f32 %v4982_v58, %v4982_v58 }
 0x414   :  { %v2858_v59 = vadd.f32 %v2857_v54, %v2856_v62 }
 0x416   :  { %v2859_v60 = vmul.f32 %v2858_v59, %v4921_v55  ;;  %v2969_v55 = vld [vmem:[%s5107_s9 + $0xf0] sm:$0xff] }
 0x417   :  { %2992 = vmatpush.msra.mxu1 %v2969_v55 }
 0x418   :  { %v2860_v61 = vmul.f32 0.0625, %v2859_v60 }
 0x419   :  { %2993 = vmatpush.msra.mxu1 %v2968_v4 }
 0x41a   :  { %v2862_v38 = vsub.f32 %v2860_v61, %v2861_v34 }
 0x41b   :  { %2994 = vmatpush.msra.mxu1 %v2967_v17 }
 0x41c   :  { %v2863_v2 = vmax.f32 %v2862_v38, 0.0 }
 0x41d   :  { %2995 = vmatpush.msra.mxu1 %v2966_v5 }
 0x41e   :  { %v2864_v9 = vadd.f32 1e-05, %v2863_v2 }
 0x41f   :  { %2996 = vmatpush.msra.mxu1 %v2965_v8 }
 0x420   :  { %4656 = vrsqrt.f32 %v2864_v9  ;;  %vm2871_vm12 = vweird.f32 %v2864_v9 }
 0x421   :  { %2997 = vmatpush.msra.mxu1 %v2964_v14 }
 0x423   :  { %2998 = vmatpush.msra.mxu1 %v2963_v20 }
 0x425   :  { %2999 = vmatpush.msra.mxu1 %v2962_v56 }
 0x426   :  { %v4657_v15 = vpop.eup %4656 }
 0x427   :  { %v2866_v18 = vmul.f32 %v4657_v15, %v2864_v9  ;;  %vm2872_vm11 = vweird.f32 %v4657_v15  ;;  %3000 = vmatpush.msra.mxu1 %v2961_v11 }
 0x428   :  { %vm2873_vm13 = vmor %vm2871_vm12, %vm2872_vm11 }
 0x429   :  { %v2867_v21 = vmul.f32 %v4657_v15, %v2866_v18  ;;  %3001 = vmatpush.msra.mxu1 %v2960_v37 }
 0x42b   :  { %v2868_v12 = vmul.f32 0.5, %v2867_v21  ;;  %3002 = vmatpush.msra.mxu1 %v2959_v32 }
 0x42d   :  { %v2869_v23 = vsub.f32 1.5, %v2868_v12  ;;  %3003 = vmatpush.msra.mxu1 %v2958_v36 }
 0x42f   :  { %v2870_v40 = vmul.f32 %v4657_v15, %v2869_v23  ;;  %3004 = vmatpush.msra.mxu1 %v2957_v41 }
 0x431   :  { %v2874_v26 = vsel %vm2873_vm13, %v4657_v15, %v2870_v40  ;;  %3005 = vmatpush.msra.mxu1 %v2956_v45 }
 0x432   :  { %v2875_v6 = vmul.f32 %v2874_v26, %v2792_v25 }
 0x433   :  { %3006 = vmatpush.msra.mxu1 %v2955_v47 }
 0x434   :  { %v2876_v29 = vmul.f32 %v2875_v6, %v4982_v58 }
 0x436   :  { %v2877_v30 = vsub.f32 %v2793_v13, %v2876_v29 }
 0x438   :  { %v2879_v28 = vperm.slane %v2877_v30, 0 }
 0x43a   :  { %v2881_v33 = vsel %vm2183_vm5, %v2875_v6, %v2879_v28 }
 0x43b   :  { %4322 = vmatmul.msk.f32.vlgmr.msrb.gmra.mxu2 %vm2842_vm10, %v2881_v33  ;;  %4323 = vmatmul.msk.f32.vlgmr.msrb.gmra.mxu3 %vm2842_vm10, %v2881_v33 }
 0x4be   :  { %v2902_v48 = vpop.f32.mrf.mxu2  ;;  %v2922_v49 = vpop.f32.mrf.mxu3 }
 0x4bf   :  { %v2925_v50 = vperm.slane %v2902_v48, 0  ;;  %v2926_v51 = vperm.slane %v2922_v49, 0  ;;  %v2929_v53 = vperm.slane %v2902_v48, 1  ;;  %v2930_v54 = vperm.slane %v2922_v49, 1 }
 0x4c1   :  { %v2927_v52 = vmul.f32 %v2925_v50, %v4969_v44  ;;  %v2928_v62 = vmul.f32 %v2926_v51, %v4974_v27 }
 0x4c3   :  { %v2931_v58 = vadd.f32 %v2929_v53, %v2927_v52  ;;  %v2932_v59 = vadd.f32 %v2930_v54, %v2928_v62 }
 0x4c5   :  { %v2935_v60 = vmul.f32 0.01, %v2931_v58  ;;  %v2936_v34 = vmul.f32 0.01, %v2932_v59  ;;  %vm2933_vm14 = vcmp.ge.f32.partialorder %v2931_v58, 0.0  ;;  %vm2934_vm15 = vcmp.ge.f32.partialorder %v2932_v59, 0.0 }
 0x4c7   :  { %v2937_v61 = vsel %vm2933_vm14, %v2931_v58, %v2935_v60  ;;  %v2938_v38 = vsel %vm2934_vm15, %v2932_v59, %v2936_v34 }
 0x4c8   :  { %2987 = vmatmul.f32.vlgmr.msra.gmra.mxu0 %v2937_v61  ;;  %3007 = vmatmul.f32.vlgmr.msra.gmra.mxu1 %v2938_v38 }
 0x545   :  { %v2988_v63 = vpop.f32.mrf.mxu0  ;;  %v3008_v0 = vpop.f32.mrf.mxu1 }
 0x546   :  { %v3009_v1 = vadd.f32 %v3008_v0, %v2988_v63 }
 0x548   :  { %v4324_v2 = vmul.f32 -1.442695, %v3009_v1 }
 0x54a   :  { %4658 = vpow2.f32 %v4324_v2 }
 0x550   :  { %v4659_v44 = vpop.eup %4658 }
 0x551   :  { %v3014_v55 = vadd.f32 1.0, %v4659_v44 }
 0x553   :  { %4660 = vrcp.f32 %v3014_v55  ;;  %v3026_v9 = vand.u32 2147483648, %v3014_v55  ;;  %v3024_v17 = vand.u32 2147483647, %v3014_v55  ;;  %vm3020_vm1 = vweird.f32 %v3014_v55 }
 0x555   :  { %v3027_v5 = vor.u32 1.1754944e-38, %v3026_v9  ;;  %vm3025_vm4 = vcmp.eq.f32.partialorder %v3024_v17, 8.507059e+37 }
 0x559   :  { %v4661_v27 = vpop.eup %4660 }
 0x55a   :  { %v3016_v3 = vmul.f32 %v4661_v27, %v3014_v55  ;;  %vm3021_vm0 = vweird.f32 %v4661_v27 }
 0x55b   :  { %vm3022_vm2 = vmor %vm3020_vm1, %vm3021_vm0 }
 0x55c   :  { %v3017_v4 = vsub.f32 1.0, %v3016_v3 }
 0x55e   :  { %v3018_v16 = vmul.f32 %v4661_v27, %v3017_v4 }
 0x560   :  { %v3019_v57 = vadd.f32 %v4661_v27, %v3018_v16 }
 0x562   :  { %v3023_v7 = vsel %vm3022_vm2, %v4661_v27, %v3019_v57 }
 0x563   :  { %v3028_v8 = vsel %vm3025_vm4, %v3027_v5, %v3023_v7 }
 0x564   :  { %3031 = vst.msk [vmem:[%s5108_s10] sm:$0xff] %vm3030_vm3, %v3028_v8 }
 0x565   :  { %3036 = vsyncpa [#allocation3], 1 }
 0x566   :  { %3037 = vsyncpa [#allocation5], 1 }

</bundles_post_ra>
